<compile_context>
chip_gen: v6e
topology: v6e:2x2x1
jax: 0.10.0
libtpu: 0.0.40
codegen_flags: <defaults>
</compile_context>

<pallas_src>
import functools

import jax
import jax.numpy as jnp
from jax.experimental import pallas as pl
from jax.experimental.pallas import tpu as pltpu


def _times_attention_kernel(x_ref, wqkv_ref, wproj_ref, bias_ref, out_ref, *,
                            num_heads, head_dim):
    C, Bt, T = x_ref.shape                    # channels, frames, tokens(on lanes)
    H, D = num_heads, head_dim
    HBD = H * Bt * D                          # == C * Bt

    # ---- load + flatten to (C*Bt, T), rows ordered (c, f).  With Bt == 8 this
    # reshape folds whole sublane tiles (layout-free); cast to bf16 for the MXU.
    x = x_ref[...].reshape(C * Bt, T).astype(jnp.bfloat16)

    # ---- fused frame-block-diagonal QKV projection: ONE MXU matmul with
    # K = C*Bt = 256 (full MXU depth) and N = T tokens on lanes (lane dense).
    qkv = jnp.dot(wqkv_ref[...], x, preferred_element_type=jnp.float32)  # (3*HBD, T)

    q = qkv[0 * HBD:1 * HBD].reshape(H, Bt, D, T)   # rows (h, qf, d)
    k = qkv[1 * HBD:2 * HBD].reshape(H, D, Bt, T)   # rows (h, d, kf): kf on sublanes
    v = qkv[2 * HBD:3 * HBD].reshape(H, Bt, D, T)   # rows (h, kf, d)

    # ---- token-on-lanes attention (VPU/EUP/XLU, full 128-lane density).
    # scores s[h, qf, kf, t] = sum_d q[h,qf,d,t] * k[h,d,kf,t]  (scale folded in Wq)
    s = q[:, :, 0:1, :] * k[:, 0][:, None, :, :]
    for d in range(1, D):
        s = s + q[:, :, d:d + 1, :] * k[:, d][:, None, :, :]

    # softmax over key-frames (sublane axis), numerically stabilized.
    s = s - jnp.max(s, axis=2, keepdims=True)
    p = jnp.exp(s)
    p = p * pl.reciprocal(jnp.sum(p, axis=2, keepdims=True), approx=True)

    # o[h, qf, d, t] = sum_kf p[h,qf,kf,t] * v[h,kf,d,t]
    o = p[:, :, 0:1, :] * v[:, 0][:, None, :, :]
    for f in range(1, Bt):
        o = o + p[:, :, f:f + 1, :] * v[:, f][:, None, :, :]

    # ---- fused frame-block-diagonal output projection: ONE MXU matmul.
    o_flat = o.reshape(HBD, T).astype(jnp.bfloat16)        # rows (h, qf, d)
    out = jnp.dot(wproj_ref[...], o_flat,
                  preferred_element_type=jnp.float32)       # (C*Bt, T), rows (c, f)
    out = out + bias_ref[...]                               # (C*Bt, 1) bias broadcast
    out_ref[...] = out.reshape(C, Bt, T).astype(out_ref.dtype)


def _pick_tile_tokens(hw, batch, *, max_tile=512, target_steps=8):
    """Token-tile (lane) size: a multiple of 128 that divides h*w when possible,
    sized so the grid has >= target_steps steps (pipelining + v7x's 2 TCs)
    while keeping per-block VMEM modest (tile <= 512)."""
    if hw % 128 != 0:
        # Full-extent block (legal per the (8,128) rule). Fine for small hw.
        return hw
    cands = [t for t in range(128, min(hw, max_tile) + 1, 128) if hw % t == 0]
    for t in sorted(cands, reverse=True):
        if batch * (hw // t) >= target_steps:
            return t
    return cands[0]   # smallest (=128): maximize step count for small problems


def times_attention_3d(x, w_qkv, w_proj, b_proj, *, num_head, tile_tokens=None):
    """x: (b, C, B, h, w) float32. Returns (b, C, B, h, w) float32.

    Weight layout (synthetic, a pure re-layout of the PyTorch Linears):
      w_qkv:  (3, num_heads, C, head_dim)   (qkv_bias=False per module default)
      w_proj: (num_heads, head_dim, C),  b_proj: (C,)
    """
    b, C, Bt, h, w = x.shape
    D = num_head                       # head_dim
    assert C % D == 0
    H = C // D                         # num_heads
    scale = D ** (-0.5)
    hw = h * w

    if tile_tokens is None:
        tile_tokens = _pick_tile_tokens(hw, b)
    assert hw % tile_tokens == 0, (hw, tile_tokens)

    # ---- frame-block-diagonal fused weights (wrapper-side, tiny, built once).
    # Row orderings are chosen so all in-kernel reshapes are sublane-aligned:
    #   QKV in-rows  : (c, f)            QKV out-rows: Q,V -> (h, f, d); K -> (h, d, f)
    #   proj in-rows : (h, f, d)         proj out-rows: (c_out, f)  -> output (C, Bt, T)
    eyeB = jnp.eye(Bt, dtype=jnp.float32)
    w_q = w_qkv[0] * scale             # fold softmax scale into Q weights
    wq_big = jnp.einsum('hcd,fg->hfdcg', w_q, eyeB).reshape(H * Bt * D, C * Bt)
    wk_big = jnp.einsum('hcd,fg->hdfcg', w_qkv[1], eyeB).reshape(H * D * Bt, C * Bt)
    wv_big = jnp.einsum('hcd,fg->hfdcg', w_qkv[2], eyeB).reshape(H * Bt * D, C * Bt)
    wqkv_big = jnp.concatenate([wq_big, wk_big, wv_big], axis=0).astype(jnp.bfloat16)
    wproj_big = jnp.einsum('hdc,fg->cfhgd', w_proj, eyeB
                           ).reshape(C * Bt, H * Bt * D).astype(jnp.bfloat16)
    bias_big = jnp.repeat(b_proj, Bt).reshape(C * Bt, 1).astype(jnp.float32)

    # ---- no wrapper transposes: (b, C, B, h, w) -> (b, C, B, h*w) is free and
    # the kernel reads/writes that layout directly (f32 in, f32 out).
    x4 = x.reshape(b, C, Bt, hw)

    grid = (b, hw // tile_tokens)
    kernel = functools.partial(_times_attention_kernel, num_heads=H, head_dim=D)

    n_tok = b * hw
    flops = n_tok * (2 * (3 * C * Bt) * (C * Bt)     # block-diag QKV matmul
                     + 4 * H * Bt * Bt * D           # scores + attn@v (VPU)
                     + 2 * (C * Bt) * (C * Bt))      # block-diag proj matmul
    cost = pl.CostEstimate(
        flops=flops,
        transcendentals=n_tok * H * Bt * Bt,
        bytes_accessed=n_tok * Bt * C * (4 + 4) + (4 * C * Bt * C * Bt) * 2)

    out = pl.pallas_call(
        kernel,
        out_shape=jax.ShapeDtypeStruct((b, C, Bt, hw), jnp.float32),
        grid=grid,
        in_specs=[
            pl.BlockSpec((None, C, Bt, tile_tokens),
                         lambda ib, it: (ib, 0, 0, it)),
            pl.BlockSpec((3 * C * Bt, C * Bt), lambda ib, it: (0, 0)),
            pl.BlockSpec((C * Bt, C * Bt), lambda ib, it: (0, 0)),
            pl.BlockSpec((C * Bt, 1), lambda ib, it: (0, 0)),
        ],
        out_specs=pl.BlockSpec((None, C, Bt, tile_tokens),
                               lambda ib, it: (ib, 0, 0, it)),
        compiler_params=pltpu.CompilerParams(
            dimension_semantics=("parallel", "parallel"),
            vmem_limit_bytes=28 * 1024 * 1024),
        cost_estimate=cost,
    )(x4, wqkv_big, wproj_big, bias_big)

    return out.reshape(b, C, Bt, h, w)


def reference_jax(x, w_qkv, w_proj, b_proj, num_head):
    """Pure-JAX f32 mirror of the PyTorch forward (same weight layout)."""
    b, C, Bt, h, w = x.shape
    D = num_head
    scale = D ** (-0.5)
    xt = jnp.transpose(x, (0, 3, 4, 2, 1)).reshape(b * h * w, Bt, C)
    q = jnp.einsum('nbc,hcd->nhbd', xt, w_qkv[0]) * scale
    k = jnp.einsum('nbc,hcd->nhbd', xt, w_qkv[1])
    v = jnp.einsum('nbc,hcd->nhbd', xt, w_qkv[2])
    attn = jax.nn.softmax(jnp.einsum('nhqd,nhkd->nhqk', q, k), axis=-1)
    o = jnp.einsum('nhqk,nhkd->nhqd', attn, v)
    o = jnp.einsum('nhqd,hdc->nqc', o, w_proj) + b_proj
    o = o.reshape(b, h, w, Bt, C)
    return jnp.transpose(o, (0, 4, 3, 1, 2))


if __name__ == "__main__":
    # Small shapes consistent with the module: dim=32, num_head (head_dim)=8
    # -> num_heads=4; batch=2, frames B=8, spatial 16x16 (exercises the
    # 128-token lane-dense tiling path with a 4-step grid).
    b, C, Bt, h, w = 2, 32, 8, 16, 16
    num_head = 8                       # head_dim
    num_heads = C // num_head

    key = jax.random.PRNGKey(0)
    k1, k2, k3, k4 = jax.random.split(key, 4)
    x = jax.random.normal(k1, (b, C, Bt, h, w), jnp.float32)
    w_qkv = 0.05 * jax.random.normal(k2, (3, num_heads, C, num_head), jnp.float32)
    w_proj = 0.05 * jax.random.normal(k3, (num_heads, num_head, C), jnp.float32)
    b_proj = 0.05 * jax.random.normal(k4, (C,), jnp.float32)

    out = times_attention_3d(x, w_qkv, w_proj, b_proj, num_head=num_head)
    out = jax.block_until_ready(out)

    ref = reference_jax(x, w_qkv, w_proj, b_proj, num_head)
    assert out.shape == (b, C, Bt, h, w)
    # Tolerance accounts for bf16 MXU inputs (f32 accumulation) and the
    # approximate EUP reciprocal in the softmax; f32 reference above.
    max_err = float(jnp.max(jnp.abs(out - ref)))
    assert max_err < 4e-3, f"mismatch vs reference: {max_err}"
    print("KERNEL_OK")
</pallas_src>

<mosaic_0001>
module attributes {stable_mosaic.version = 11 : i64} {
  func.func @_times_attention_kernel(%arg0: i32, %arg1: i32, %arg2: memref<1x32x8x128xf32, #tpu.memory_space<vmem>>, %arg3: memref<768x256xbf16, #tpu.memory_space<vmem>>, %arg4: memref<256x256xbf16, #tpu.memory_space<vmem>>, %arg5: memref<256x1xf32, #tpu.memory_space<vmem>>, %arg6: memref<1x32x8x128xf32, #tpu.memory_space<vmem>>) attributes {dimension_semantics = [#tpu.dimension_semantics<parallel>, #tpu.dimension_semantics<parallel>], iteration_bounds = array<i64: 2, 2>, scalar_prefetch = 0 : i64, scratch_operands = 0 : i64, tpu.core_type = #tpu.core_type<tc>, window_params = [{transform_indices = @transform_0, window_bounds = array<i64: 1, 32, 8, 128>}, {pipeline_mode = #tpu.pipeline_mode<synchronous>, transform_indices = @transform_1, window_bounds = array<i64: 768, 256>}, {pipeline_mode = #tpu.pipeline_mode<synchronous>, transform_indices = @transform_2, window_bounds = array<i64: 256, 256>}, {pipeline_mode = #tpu.pipeline_mode<synchronous>, transform_indices = @transform_3, window_bounds = array<i64: 256, 1>}, {transform_indices = @transform_4, window_bounds = array<i64: 1, 32, 8, 128>}]} {
    %c0 = arith.constant 0 : index
    %c0_0 = arith.constant 0 : index
    %c0_1 = arith.constant 0 : index
    %c0_2 = arith.constant 0 : index
    %0 = vector.load %arg2[%c0, %c0_0, %c0_1, %c0_2] : memref<1x32x8x128xf32, #tpu.memory_space<vmem>>, vector<1x32x8x128xf32>
    %1 = vector.shape_cast %0 : vector<1x32x8x128xf32> to vector<32x8x128xf32>
    %2 = vector.shape_cast %1 : vector<32x8x128xf32> to vector<256x128xf32>
    %3 = arith.truncf %2 : vector<256x128xf32> to vector<256x128xbf16>
    %c0_3 = arith.constant 0 : index
    %c0_4 = arith.constant 0 : index
    %4 = vector.load %arg3[%c0_3, %c0_4] : memref<768x256xbf16, #tpu.memory_space<vmem>>, vector<768x256xbf16>
    %cst = arith.constant dense<0.000000e+00> : vector<768x128xf32>
    %5 = tpu.matmul %4, %3, %cst {dimension_numbers = #tpu.dot_dimension_numbers<[1], [0], [0], [1], [0, 0, 1, 1], [], []>} : vector<768x256xbf16>, vector<256x128xbf16>, vector<768x128xf32> -> vector<768x128xf32>
    %6 = vector.extract_strided_slice %5 {offsets = [0, 0], sizes = [256, 128], strides = [1, 1]} : vector<768x128xf32> to vector<256x128xf32>
    %7 = vector.shape_cast %6 : vector<256x128xf32> to vector<4x8x8x128xf32>
    %8 = vector.extract_strided_slice %5 {offsets = [256, 0], sizes = [256, 128], strides = [1, 1]} : vector<768x128xf32> to vector<256x128xf32>
    %9 = vector.shape_cast %8 : vector<256x128xf32> to vector<4x8x8x128xf32>
    %10 = vector.extract_strided_slice %5 {offsets = [512, 0], sizes = [256, 128], strides = [1, 1]} : vector<768x128xf32> to vector<256x128xf32>
    %11 = vector.shape_cast %10 : vector<256x128xf32> to vector<4x8x8x128xf32>
    %12 = vector.extract_strided_slice %7 {offsets = [0, 0, 0, 0], sizes = [4, 8, 1, 128], strides = [1, 1, 1, 1]} : vector<4x8x8x128xf32> to vector<4x8x1x128xf32>
    %13 = vector.extract_strided_slice %9 {offsets = [0, 0, 0, 0], sizes = [4, 1, 8, 128], strides = [1, 1, 1, 1]} : vector<4x8x8x128xf32> to vector<4x1x8x128xf32>
    %14 = vector.shape_cast %13 : vector<4x1x8x128xf32> to vector<4x8x128xf32>
    %15 = vector.shape_cast %14 : vector<4x8x128xf32> to vector<4x1x8x128xf32>
    %16 = vector.broadcast %12 : vector<4x8x1x128xf32> to vector<4x8x8x128xf32>
    %17 = vector.broadcast %15 : vector<4x1x8x128xf32> to vector<4x8x8x128xf32>
    %18 = arith.mulf %16, %17 : vector<4x8x8x128xf32>
    %19 = vector.extract_strided_slice %7 {offsets = [0, 0, 1, 0], sizes = [4, 8, 1, 128], strides = [1, 1, 1, 1]} : vector<4x8x8x128xf32> to vector<4x8x1x128xf32>
    %20 = vector.extract_strided_slice %9 {offsets = [0, 1, 0, 0], sizes = [4, 1, 8, 128], strides = [1, 1, 1, 1]} : vector<4x8x8x128xf32> to vector<4x1x8x128xf32>
    %21 = vector.shape_cast %20 : vector<4x1x8x128xf32> to vector<4x8x128xf32>
    %22 = vector.shape_cast %21 : vector<4x8x128xf32> to vector<4x1x8x128xf32>
    %23 = vector.broadcast %19 : vector<4x8x1x128xf32> to vector<4x8x8x128xf32>
    %24 = vector.broadcast %22 : vector<4x1x8x128xf32> to vector<4x8x8x128xf32>
    %25 = arith.mulf %23, %24 : vector<4x8x8x128xf32>
    %26 = arith.addf %18, %25 : vector<4x8x8x128xf32>
    %27 = vector.extract_strided_slice %7 {offsets = [0, 0, 2, 0], sizes = [4, 8, 1, 128], strides = [1, 1, 1, 1]} : vector<4x8x8x128xf32> to vector<4x8x1x128xf32>
    %28 = vector.extract_strided_slice %9 {offsets = [0, 2, 0, 0], sizes = [4, 1, 8, 128], strides = [1, 1, 1, 1]} : vector<4x8x8x128xf32> to vector<4x1x8x128xf32>
    %29 = vector.shape_cast %28 : vector<4x1x8x128xf32> to vector<4x8x128xf32>
    %30 = vector.shape_cast %29 : vector<4x8x128xf32> to vector<4x1x8x128xf32>
    %31 = vector.broadcast %27 : vector<4x8x1x128xf32> to vector<4x8x8x128xf32>
    %32 = vector.broadcast %30 : vector<4x1x8x128xf32> to vector<4x8x8x128xf32>
    %33 = arith.mulf %31, %32 : vector<4x8x8x128xf32>
    %34 = arith.addf %26, %33 : vector<4x8x8x128xf32>
    %35 = vector.extract_strided_slice %7 {offsets = [0, 0, 3, 0], sizes = [4, 8, 1, 128], strides = [1, 1, 1, 1]} : vector<4x8x8x128xf32> to vector<4x8x1x128xf32>
    %36 = vector.extract_strided_slice %9 {offsets = [0, 3, 0, 0], sizes = [4, 1, 8, 128], strides = [1, 1, 1, 1]} : vector<4x8x8x128xf32> to vector<4x1x8x128xf32>
    %37 = vector.shape_cast %36 : vector<4x1x8x128xf32> to vector<4x8x128xf32>
    %38 = vector.shape_cast %37 : vector<4x8x128xf32> to vector<4x1x8x128xf32>
    %39 = vector.broadcast %35 : vector<4x8x1x128xf32> to vector<4x8x8x128xf32>
    %40 = vector.broadcast %38 : vector<4x1x8x128xf32> to vector<4x8x8x128xf32>
    %41 = arith.mulf %39, %40 : vector<4x8x8x128xf32>
    %42 = arith.addf %34, %41 : vector<4x8x8x128xf32>
    %43 = vector.extract_strided_slice %7 {offsets = [0, 0, 4, 0], sizes = [4, 8, 1, 128], strides = [1, 1, 1, 1]} : vector<4x8x8x128xf32> to vector<4x8x1x128xf32>
    %44 = vector.extract_strided_slice %9 {offsets = [0, 4, 0, 0], sizes = [4, 1, 8, 128], strides = [1, 1, 1, 1]} : vector<4x8x8x128xf32> to vector<4x1x8x128xf32>
    %45 = vector.shape_cast %44 : vector<4x1x8x128xf32> to vector<4x8x128xf32>
    %46 = vector.shape_cast %45 : vector<4x8x128xf32> to vector<4x1x8x128xf32>
    %47 = vector.broadcast %43 : vector<4x8x1x128xf32> to vector<4x8x8x128xf32>
    %48 = vector.broadcast %46 : vector<4x1x8x128xf32> to vector<4x8x8x128xf32>
    %49 = arith.mulf %47, %48 : vector<4x8x8x128xf32>
    %50 = arith.addf %42, %49 : vector<4x8x8x128xf32>
    %51 = vector.extract_strided_slice %7 {offsets = [0, 0, 5, 0], sizes = [4, 8, 1, 128], strides = [1, 1, 1, 1]} : vector<4x8x8x128xf32> to vector<4x8x1x128xf32>
    %52 = vector.extract_strided_slice %9 {offsets = [0, 5, 0, 0], sizes = [4, 1, 8, 128], strides = [1, 1, 1, 1]} : vector<4x8x8x128xf32> to vector<4x1x8x128xf32>
    %53 = vector.shape_cast %52 : vector<4x1x8x128xf32> to vector<4x8x128xf32>
    %54 = vector.shape_cast %53 : vector<4x8x128xf32> to vector<4x1x8x128xf32>
    %55 = vector.broadcast %51 : vector<4x8x1x128xf32> to vector<4x8x8x128xf32>
    %56 = vector.broadcast %54 : vector<4x1x8x128xf32> to vector<4x8x8x128xf32>
    %57 = arith.mulf %55, %56 : vector<4x8x8x128xf32>
    %58 = arith.addf %50, %57 : vector<4x8x8x128xf32>
    %59 = vector.extract_strided_slice %7 {offsets = [0, 0, 6, 0], sizes = [4, 8, 1, 128], strides = [1, 1, 1, 1]} : vector<4x8x8x128xf32> to vector<4x8x1x128xf32>
    %60 = vector.extract_strided_slice %9 {offsets = [0, 6, 0, 0], sizes = [4, 1, 8, 128], strides = [1, 1, 1, 1]} : vector<4x8x8x128xf32> to vector<4x1x8x128xf32>
    %61 = vector.shape_cast %60 : vector<4x1x8x128xf32> to vector<4x8x128xf32>
    %62 = vector.shape_cast %61 : vector<4x8x128xf32> to vector<4x1x8x128xf32>
    %63 = vector.broadcast %59 : vector<4x8x1x128xf32> to vector<4x8x8x128xf32>
    %64 = vector.broadcast %62 : vector<4x1x8x128xf32> to vector<4x8x8x128xf32>
    %65 = arith.mulf %63, %64 : vector<4x8x8x128xf32>
    %66 = arith.addf %58, %65 : vector<4x8x8x128xf32>
    %67 = vector.extract_strided_slice %7 {offsets = [0, 0, 7, 0], sizes = [4, 8, 1, 128], strides = [1, 1, 1, 1]} : vector<4x8x8x128xf32> to vector<4x8x1x128xf32>
    %68 = vector.extract_strided_slice %9 {offsets = [0, 7, 0, 0], sizes = [4, 1, 8, 128], strides = [1, 1, 1, 1]} : vector<4x8x8x128xf32> to vector<4x1x8x128xf32>
    %69 = vector.shape_cast %68 : vector<4x1x8x128xf32> to vector<4x8x128xf32>
    %70 = vector.shape_cast %69 : vector<4x8x128xf32> to vector<4x1x8x128xf32>
    %71 = vector.broadcast %67 : vector<4x8x1x128xf32> to vector<4x8x8x128xf32>
    %72 = vector.broadcast %70 : vector<4x1x8x128xf32> to vector<4x8x8x128xf32>
    %73 = arith.mulf %71, %72 : vector<4x8x8x128xf32>
    %74 = arith.addf %66, %73 : vector<4x8x8x128xf32>
    %cst_5 = arith.constant dense<0xFF800000> : vector<4x8x128xf32>
    %75 = vector.multi_reduction <maximumf>, %74, %cst_5 [2] : vector<4x8x8x128xf32> to vector<4x8x128xf32>
    %76 = vector.shape_cast %75 : vector<4x8x128xf32> to vector<4x8x1x128xf32>
    %77 = vector.broadcast %76 : vector<4x8x1x128xf32> to vector<4x8x8x128xf32>
    %78 = arith.subf %74, %77 : vector<4x8x8x128xf32>
    %79 = math.exp %78 : vector<4x8x8x128xf32>
    %cst_6 = arith.constant dense<0.000000e+00> : vector<4x8x128xf32>
    %80 = vector.multi_reduction <add>, %79, %cst_6 [2] : vector<4x8x8x128xf32> to vector<4x8x128xf32>
    %81 = vector.shape_cast %80 : vector<4x8x128xf32> to vector<4x8x1x128xf32>
    %82 = tpu.reciprocal %81 {approx = true} : vector<4x8x1x128xf32> -> vector<4x8x1x128xf32>
    %83 = vector.broadcast %82 : vector<4x8x1x128xf32> to vector<4x8x8x128xf32>
    %84 = arith.mulf %79, %83 : vector<4x8x8x128xf32>
    %85 = vector.extract_strided_slice %84 {offsets = [0, 0, 0, 0], sizes = [4, 8, 1, 128], strides = [1, 1, 1, 1]} : vector<4x8x8x128xf32> to vector<4x8x1x128xf32>
    %86 = vector.extract_strided_slice %11 {offsets = [0, 0, 0, 0], sizes = [4, 1, 8, 128], strides = [1, 1, 1, 1]} : vector<4x8x8x128xf32> to vector<4x1x8x128xf32>
    %87 = vector.shape_cast %86 : vector<4x1x8x128xf32> to vector<4x8x128xf32>
    %88 = vector.shape_cast %87 : vector<4x8x128xf32> to vector<4x1x8x128xf32>
    %89 = vector.broadcast %85 : vector<4x8x1x128xf32> to vector<4x8x8x128xf32>
    %90 = vector.broadcast %88 : vector<4x1x8x128xf32> to vector<4x8x8x128xf32>
    %91 = arith.mulf %89, %90 : vector<4x8x8x128xf32>
    %92 = vector.extract_strided_slice %84 {offsets = [0, 0, 1, 0], sizes = [4, 8, 1, 128], strides = [1, 1, 1, 1]} : vector<4x8x8x128xf32> to vector<4x8x1x128xf32>
    %93 = vector.extract_strided_slice %11 {offsets = [0, 1, 0, 0], sizes = [4, 1, 8, 128], strides = [1, 1, 1, 1]} : vector<4x8x8x128xf32> to vector<4x1x8x128xf32>
    %94 = vector.shape_cast %93 : vector<4x1x8x128xf32> to vector<4x8x128xf32>
    %95 = vector.shape_cast %94 : vector<4x8x128xf32> to vector<4x1x8x128xf32>
    %96 = vector.broadcast %92 : vector<4x8x1x128xf32> to vector<4x8x8x128xf32>
    %97 = vector.broadcast %95 : vector<4x1x8x128xf32> to vector<4x8x8x128xf32>
    %98 = arith.mulf %96, %97 : vector<4x8x8x128xf32>
    %99 = arith.addf %91, %98 : vector<4x8x8x128xf32>
    %100 = vector.extract_strided_slice %84 {offsets = [0, 0, 2, 0], sizes = [4, 8, 1, 128], strides = [1, 1, 1, 1]} : vector<4x8x8x128xf32> to vector<4x8x1x128xf32>
    %101 = vector.extract_strided_slice %11 {offsets = [0, 2, 0, 0], sizes = [4, 1, 8, 128], strides = [1, 1, 1, 1]} : vector<4x8x8x128xf32> to vector<4x1x8x128xf32>
    %102 = vector.shape_cast %101 : vector<4x1x8x128xf32> to vector<4x8x128xf32>
    %103 = vector.shape_cast %102 : vector<4x8x128xf32> to vector<4x1x8x128xf32>
    %104 = vector.broadcast %100 : vector<4x8x1x128xf32> to vector<4x8x8x128xf32>
    %105 = vector.broadcast %103 : vector<4x1x8x128xf32> to vector<4x8x8x128xf32>
    %106 = arith.mulf %104, %105 : vector<4x8x8x128xf32>
    %107 = arith.addf %99, %106 : vector<4x8x8x128xf32>
    %108 = vector.extract_strided_slice %84 {offsets = [0, 0, 3, 0], sizes = [4, 8, 1, 128], strides = [1, 1, 1, 1]} : vector<4x8x8x128xf32> to vector<4x8x1x128xf32>
    %109 = vector.extract_strided_slice %11 {offsets = [0, 3, 0, 0], sizes = [4, 1, 8, 128], strides = [1, 1, 1, 1]} : vector<4x8x8x128xf32> to vector<4x1x8x128xf32>
    %110 = vector.shape_cast %109 : vector<4x1x8x128xf32> to vector<4x8x128xf32>
    %111 = vector.shape_cast %110 : vector<4x8x128xf32> to vector<4x1x8x128xf32>
    %112 = vector.broadcast %108 : vector<4x8x1x128xf32> to vector<4x8x8x128xf32>
    %113 = vector.broadcast %111 : vector<4x1x8x128xf32> to vector<4x8x8x128xf32>
    %114 = arith.mulf %112, %113 : vector<4x8x8x128xf32>
    %115 = arith.addf %107, %114 : vector<4x8x8x128xf32>
    %116 = vector.extract_strided_slice %84 {offsets = [0, 0, 4, 0], sizes = [4, 8, 1, 128], strides = [1, 1, 1, 1]} : vector<4x8x8x128xf32> to vector<4x8x1x128xf32>
    %117 = vector.extract_strided_slice %11 {offsets = [0, 4, 0, 0], sizes = [4, 1, 8, 128], strides = [1, 1, 1, 1]} : vector<4x8x8x128xf32> to vector<4x1x8x128xf32>
    %118 = vector.shape_cast %117 : vector<4x1x8x128xf32> to vector<4x8x128xf32>
    %119 = vector.shape_cast %118 : vector<4x8x128xf32> to vector<4x1x8x128xf32>
    %120 = vector.broadcast %116 : vector<4x8x1x128xf32> to vector<4x8x8x128xf32>
    %121 = vector.broadcast %119 : vector<4x1x8x128xf32> to vector<4x8x8x128xf32>
    %122 = arith.mulf %120, %121 : vector<4x8x8x128xf32>
    %123 = arith.addf %115, %122 : vector<4x8x8x128xf32>
    %124 = vector.extract_strided_slice %84 {offsets = [0, 0, 5, 0], sizes = [4, 8, 1, 128], strides = [1, 1, 1, 1]} : vector<4x8x8x128xf32> to vector<4x8x1x128xf32>
    %125 = vector.extract_strided_slice %11 {offsets = [0, 5, 0, 0], sizes = [4, 1, 8, 128], strides = [1, 1, 1, 1]} : vector<4x8x8x128xf32> to vector<4x1x8x128xf32>
    %126 = vector.shape_cast %125 : vector<4x1x8x128xf32> to vector<4x8x128xf32>
    %127 = vector.shape_cast %126 : vector<4x8x128xf32> to vector<4x1x8x128xf32>
    %128 = vector.broadcast %124 : vector<4x8x1x128xf32> to vector<4x8x8x128xf32>
    %129 = vector.broadcast %127 : vector<4x1x8x128xf32> to vector<4x8x8x128xf32>
    %130 = arith.mulf %128, %129 : vector<4x8x8x128xf32>
    %131 = arith.addf %123, %130 : vector<4x8x8x128xf32>
    %132 = vector.extract_strided_slice %84 {offsets = [0, 0, 6, 0], sizes = [4, 8, 1, 128], strides = [1, 1, 1, 1]} : vector<4x8x8x128xf32> to vector<4x8x1x128xf32>
    %133 = vector.extract_strided_slice %11 {offsets = [0, 6, 0, 0], sizes = [4, 1, 8, 128], strides = [1, 1, 1, 1]} : vector<4x8x8x128xf32> to vector<4x1x8x128xf32>
    %134 = vector.shape_cast %133 : vector<4x1x8x128xf32> to vector<4x8x128xf32>
    %135 = vector.shape_cast %134 : vector<4x8x128xf32> to vector<4x1x8x128xf32>
    %136 = vector.broadcast %132 : vector<4x8x1x128xf32> to vector<4x8x8x128xf32>
    %137 = vector.broadcast %135 : vector<4x1x8x128xf32> to vector<4x8x8x128xf32>
    %138 = arith.mulf %136, %137 : vector<4x8x8x128xf32>
    %139 = arith.addf %131, %138 : vector<4x8x8x128xf32>
    %140 = vector.extract_strided_slice %84 {offsets = [0, 0, 7, 0], sizes = [4, 8, 1, 128], strides = [1, 1, 1, 1]} : vector<4x8x8x128xf32> to vector<4x8x1x128xf32>
    %141 = vector.extract_strided_slice %11 {offsets = [0, 7, 0, 0], sizes = [4, 1, 8, 128], strides = [1, 1, 1, 1]} : vector<4x8x8x128xf32> to vector<4x1x8x128xf32>
    %142 = vector.shape_cast %141 : vector<4x1x8x128xf32> to vector<4x8x128xf32>
    %143 = vector.shape_cast %142 : vector<4x8x128xf32> to vector<4x1x8x128xf32>
    %144 = vector.broadcast %140 : vector<4x8x1x128xf32> to vector<4x8x8x128xf32>
    %145 = vector.broadcast %143 : vector<4x1x8x128xf32> to vector<4x8x8x128xf32>
    %146 = arith.mulf %144, %145 : vector<4x8x8x128xf32>
    %147 = arith.addf %139, %146 : vector<4x8x8x128xf32>
    %148 = vector.shape_cast %147 : vector<4x8x8x128xf32> to vector<256x128xf32>
    %149 = arith.truncf %148 : vector<256x128xf32> to vector<256x128xbf16>
    %c0_7 = arith.constant 0 : index
    %c0_8 = arith.constant 0 : index
    %150 = vector.load %arg4[%c0_7, %c0_8] : memref<256x256xbf16, #tpu.memory_space<vmem>>, vector<256x256xbf16>
    %cst_9 = arith.constant dense<0.000000e+00> : vector<256x128xf32>
    %151 = tpu.matmul %150, %149, %cst_9 {dimension_numbers = #tpu.dot_dimension_numbers<[1], [0], [0], [1], [0, 0, 1, 1], [], []>} : vector<256x256xbf16>, vector<256x128xbf16>, vector<256x128xf32> -> vector<256x128xf32>
    %c0_10 = arith.constant 0 : index
    %c0_11 = arith.constant 0 : index
    %152 = vector.load %arg5[%c0_10, %c0_11] : memref<256x1xf32, #tpu.memory_space<vmem>>, vector<256x1xf32>
    %153 = vector.broadcast %152 : vector<256x1xf32> to vector<256x128xf32>
    %154 = arith.addf %151, %153 : vector<256x128xf32>
    %155 = vector.shape_cast %154 : vector<256x128xf32> to vector<32x8x128xf32>
    %c0_12 = arith.constant 0 : index
    %c0_13 = arith.constant 0 : index
    %c0_14 = arith.constant 0 : index
    %c0_15 = arith.constant 0 : index
    %156 = vector.load %arg6[%c0_12, %c0_13, %c0_14, %c0_15] : memref<1x32x8x128xf32, #tpu.memory_space<vmem>>, vector<1x32x8x128xf32>
    %157 = vector.shape_cast %156 : vector<1x32x8x128xf32> to vector<32x8x128xf32>
    %158 = vector.shape_cast %155 : vector<32x8x128xf32> to vector<1x32x8x128xf32>
    tpu.vector_store %arg6[%c0_12, %c0_13, %c0_14, %c0_15], %158 {strides = array<i32>} : memref<1x32x8x128xf32, #tpu.memory_space<vmem>>, vector<1x32x8x128xf32>,
    return
  }
  func.func @transform_0(%arg0: i32, %arg1: i32) -> (i32, i32, i32, i32) {
    %c0_i32 = arith.constant 0 : i32
    %c0_i32_0 = arith.constant 0 : i32
    %c0_i32_1 = arith.constant 0 : i32
    return %arg0, %c0_i32, %c0_i32_0, %arg1 : i32, i32, i32, i32
  }
  func.func @transform_1(%arg0: i32, %arg1: i32) -> (i32, i32) {
    %c0_i32 = arith.constant 0 : i32
    %c0_i32_0 = arith.constant 0 : i32
    %c0_i32_1 = arith.constant 0 : i32
    return %c0_i32, %c0_i32_0 : i32, i32
  }
  func.func @transform_2(%arg0: i32, %arg1: i32) -> (i32, i32) {
    %c0_i32 = arith.constant 0 : i32
    %c0_i32_0 = arith.constant 0 : i32
    %c0_i32_1 = arith.constant 0 : i32
    return %c0_i32, %c0_i32_0 : i32, i32
  }
  func.func @transform_3(%arg0: i32, %arg1: i32) -> (i32, i32) {
    %c0_i32 = arith.constant 0 : i32
    %c0_i32_0 = arith.constant 0 : i32
    %c0_i32_1 = arith.constant 0 : i32
    return %c0_i32, %c0_i32_0 : i32, i32
  }
  func.func @transform_4(%arg0: i32, %arg1: i32) -> (i32, i32, i32, i32) {
    %c0_i32 = arith.constant 0 : i32
    %c0_i32_0 = arith.constant 0 : i32
    %c0_i32_1 = arith.constant 0 : i32
    return %arg0, %c0_i32, %c0_i32_0, %arg1 : i32, i32, i32, i32
  }
}

</mosaic_0001>

<bundles_post_ra>
// kernel: tpu_custom_call.1
= control target key start
LH: loop header
LB: loop body
LE: loop exit
PB: predicated region body
PF: predicated region fallthrough
CT: control target
= control target key end

     0   :  { %s10157_s0 = inlined_call_operand.hbm [shape: f32[2,32,8,256], index: 0, kind: input, shape index: {}]   ;;  %s10158_s1 = inlined_call_operand.hbm [shape: bf16[768,256], index: 1, kind: input, shape index: {}]   ;;  %s10159_s2 = inlined_call_operand.vmem [shape: bf16[256,256], index: 2, kind: input, shape index: {}]   ;;  %s10160_s3 = inlined_call_operand.vmem [shape: f32[256,1], index: 3, kind: input, shape index: {}]   ;;  %s10161_s4 = inlined_call_operand.hbm [shape: f32[2,32,8,256], index: 4, kind: output, shape index: {}]  }
   0x1   :  { %10325 = sst [smem:[#allocation124_spill]] %s10158_s1 }
   0x2   :  { %9 = vsyncpa [#allocation3], 0 }
   0x3   :  { %11 = vsyncpa [#allocation3 + $0x1], 0 }
   0x4   :  { %12 = vsyncpa [#allocation6], 0 }
   0x5   :  { %13 = vsyncpa [#allocation4], 0 }
   0x6   :  { %15 = vsyncpa [#allocation4 + $0x1], 0  ;;  %s6446_s15 = smov 0   ;;  %s6448_s16 = smov 0  }
   0x7   :  { %s6450_s17 = smov 0   ;;  %s6452_s18 = smov 0  }
   0x8   :  { %s6454_s19 = smov 0   ;;  %s6456_s20 = smov 0  }
   0x9   :  { %s6458_s21 = smov 0   ;;  %s6460_s22 = smov 0  }
   0xa LB: > { %10326 = sst [smem:[#allocation11_spill]] %s6381_s15  ;;  %s5548_s23 = sadd.s32 4294967295, %s6409_s22   ;;  %s6409_s22 = sphi %s6460_s22, %s21_s22   ;;  %s6405_s21 = sphi %s6458_s21, %s10942_s21   ;;  %s6401_s20 = sphi %s6456_s20, %s10937_s20   ;;  %s6397_s19 = sphi %s6454_s19, %s10941_s19   ;;  %s6393_s18 = sphi %s6452_s18, %s10936_s18   ;;  %s6389_s17 = sphi %s6450_s17, %s10940_s17   ;;  %s6385_s16 = sphi %s6448_s16, %s10939_s16   ;;  %s6381_s15 = sphi %s6446_s15, %s10938_s15  }
   0xb   : > { %10327 = sst [smem:[#allocation12_spill]] %s6401_s20  ;;  %s5549_s24 = sadd.s32 4294967294, %s6409_s22  }
   0xc   : > { %10328 = sst [smem:[#allocation13_spill]] %s6409_s22  ;;  %p49_p0 = scmp.ne.s32.totalorder %s6389_s17, %s6385_s16 }
   0xd   : > { %p50_p1 = scmp.eq.s32.totalorder %s6409_s22, 0  ;;  %p55_p2 = scmp.ne.s32.totalorder %s6385_s16, %s6381_s15 }
   0xe   : > { %p6494_p3 = scmp.eq.s32.totalorder %s5548_s23, 0  ;;  %p144_p4 = scmp.eq.s32.totalorder %s5548_s23, 3 }
   0xf   : > { %p6498_p5 = por %p50_p1, %p49_p0  ;;  %p150_p6 = scmp.eq.s32.totalorder %s5549_s24, 3 }
  0x10   : > { %p6504_p7 = por %p6494_p3, %p55_p2  ;;  %p6508_p8 = por %p144_p4, %p49_p0 }
  0x11   : > { %p6512_p9 = por %p150_p6, %p55_p2  ;;  %p5550_p10 = scmp.ge.s32.totalorder %s6409_s22, 1 }
  0x12   : > { %s10331_s28 = scalar_select %p6504_p7, 1, 0 }
  0x13   : > { %s10332_s29 = scalar_select %p6508_p8, 1, 0 }
  0x14   : > { %s10333_s30 = scalar_select %p6512_p9, 1, 0 }
  0x15   : > { %p157_p11 = scmp.lt.s32.totalorder %s6409_s22, 5  ;;  %s6411_s6 = smov [#allocation5]  }
  0x16   : > { %10334 = sst [smem:[#allocation14_spill]] %s10333_s30  ;;  %s169_s7 = sshll.u32 %s6411_s6, 4  ;;  %s170_s7 = int_to_ptr.vmem [resolvable:$true] %s169_s7 }
  0x17   : > { %p6518_p12 = pnand %p5550_p10, %p157_p11  ;;  %p5858_p0 = scmp.lt.s32.totalorder %s6409_s22, 4 }
  0x18   : > { %s6266_s10 = scalar_lea.vmem %s170_s7, 12288  ;;  %p6274_p9 = scmp.lt.s32.totalorder %s170_s7, %s170_s7 }
  0x19   : > { %s10335_s5 = scalar_select %p6518_p12, 1, 0 }
  0x1a   : > { %p5845_p13 = pneg %p6518_p12  ;;  %p6533_p2 = pnand %p5858_p0, %p6498_p5 }
  0x1b   : > { %p6267_p6 = scmp.ne.s32.totalorder %s170_s7, %s6266_s10  ;;  %p6275_p8 = scmp.lt.s32.totalorder %s6266_s10, %s6266_s10 }
  0x1c   : > { %p6527_p1 = pnand %p5845_p13, %p6494_p3 }
  0x1d   : > { %p6276_p7 = por %p6275_p8, %p6274_p9 }
  0x1e   : > { %p6257_p4 = pneg %p6527_p1 }
  0x20   : > { %p6269_p10 = pnand %p6267_p6, %p6257_p4 }
  0x22   : > { %p6270_p11 = pneg %p6269_p10 }
  0x24   : > { %p6277_p12 = pnand %p6276_p7, %p6270_p11 }
  0x26   : > { %6280 = shalt.err (!%p6277_p12)
}
  0x27   : > { %s10165_s11 = smov 128   ;;  %s10166_s12 = smov 8  }
  0x28   : > { %s10338_s1 = sld [smem:[#allocation124_spill]]  ;;  %s30_s23 = sadd.s32 1, %s6401_s20 }
  0x29   : > { %p31_p5 = scmp.ge.s32.totalorder %s30_s23, 2  ;;  %s33_s24 = sadd.s32 1, %s6405_s21 }
  0x2a   : > { %s189_s27 = sand.u32 1, %s6389_s17   ;;  %s5554_s6 = sshll.u32 %s6405_s21, 6 }
  0x2b   : > { %s10944_s23 = smov (%p31_p5, %s30_s23), 0  ;;  %s10946_s24 = smov (!%p31_p5, %s33_s24), %s6405_s21 }
  0x2c   : > { %10339 = sst [smem:[#allocation15_spill]] %s10944_s23  ;;  %s38_s10 = ssub.s32 %s6401_s20, %s10944_s23 }
  0x2d   : > { %p35_p7 = scmp.ge.s32.totalorder %s10946_s24, 2  ;;  %s5553_s8 = sshll.u32 %s189_s27, 8 }
  0x2e   : > { %5848 = dma.hbm_to_vmem [thread:$0]  (!%p6527_p1), %s10338_s1, 12288, %s170_s7, [#allocation6], %s10165_s11, %s10165_s11, %s10166_s12  }
  0x2f   : > { %s198_s25 = sadd.s32 %s6401_s20, %s5554_s6  ;;  %s10948_s24 = smov (%p35_p7, %s10946_s24), 0 }
  0x30   : > { %s5555_s13 = sshll.u32 %s198_s25, 7  ;;  %s193_s7 = scalar_lea.vmem [#allocation2], %s5553_s8 }
  0x31   : > { %s201_s14 = sshll.u32 %s193_s7, 4  ;;  %s37_s11 = ssub.s32 %s6405_s21, %s10948_s24  ;;  %s202_s14 = int_to_ptr.vmem [resolvable:$true] %s201_s14 }
  0x32   : > { %s200_s30 = scalar_lea.hbm %s10157_s0, %s5555_s13  ;;  %s39_s15 = sor.u32 %s38_s10, %s37_s11 }
  0x33   : > { %p40_p8 = scmp.eq.s32.totalorder %s39_s15, 0  ;;  %s190_s22 = scalar_lea.sflag [#allocation3], %s189_s27 }
  0x34   : > { %p6283_p9 = pneg %p6533_p2  ;;  %s6294_s23 = scalar_lea.vmem %s202_s14, 4096 }
  0x35   : > { %p6295_p12 = scmp.ne.s32.totalorder %s202_s14, %s6294_s23  ;;  %s6414_s6 = smov [#allocation2]  }
  0x36   : > { %s6299_s20 = sshll.u32 %s6414_s6, 4  ;;  %s6300_s20 = int_to_ptr.vmem [resolvable:$false] %s6299_s20 }
  0x37   : > { %p6297_p13 = pnand %p6295_p12, %p6283_p9  ;;  %s6301_s25 = scalar_lea.vmem %s6300_s20, 8192 }
  0x38   : > { %p6302_p1 = scmp.lt.s32.totalorder %s202_s14, %s6300_s20  ;;  %p6303_p4 = scmp.lt.s32.totalorder %s6301_s25, %s6294_s23 }
  0x39   : > { %p6298_p0 = pneg %p6297_p13 }
  0x3a   : > { %p6304_p6 = por %p6303_p4, %p6302_p1 }
  0x3c   : > { %p6305_p10 = pnand %p6304_p6, %p6298_p0 }
  0x3e   : > { %6308 = shalt.err (!%p6305_p10)
}
  0x3f   : > { %s6415_s1 = smov 256   ;;  %s10340_s11 = smov 8  }
  0x40   : > { %s10341_s12 = smov 128   ;;  %s10342_s27 = sadd.s32 1, %s6389_s17 }
  0x41   : > { %5852 = dma.hbm_to_vmem [thread:$0]  (!%p6533_p2), %s200_s30, 4096, %s202_s14, %s190_s22, %s6415_s1, %s10341_s12, %s10340_s11  }
  0x42   : > { %s6574_s10 = scalar_select %p40_p8, %s6389_s17, %s10342_s27  }
  0x43   : > { %p10343_p11 = scmp.ne.s32.totalorder %s10335_s5, 0 }
  0x45   : > { %213 = sbr.rel (%p10343_p11) target bundleno = 1327 (0x52f), region = 36 }
  0x4a   : > { %s6579_s20 = sand.u32 1, %s6385_s16   ;;  %p10344_p2 = scmp.ne.s32.totalorder %s10331_s28, 0 }
  0x4b   : > { %s5557_s9 = sshll.u32 %s6579_s20, 8  ;;  %s216_s23 = scalar_lea.sflag [#allocation3], %s6579_s20 }
  0x4c   : > { %s6585_s8 = scalar_lea.vmem [#allocation2], %s5557_s9 }
  0x4d   : > { %6368 = dma.done.wait (%p10344_p2), %s216_s23, 4096  }
  0x4e   : > { %6370 = vsyncadd (%p10344_p2), %s216_s23, 4294963200 }
  0x4f   : > { %6372 = dma.done.wait (%p6494_p3), [#allocation6], 12288  }
  0x50   : > { %6374 = vsyncadd (%p6494_p3), [#allocation6], 4294955008  ;;  %v6416_v0 = vmov 0   ;;  %v263_v1 = vld [vmem:[%s6585_s8 + $0x70] sm:$0xff]  ;;  %v264_v2 = vld [vmem:[%s6585_s8 + $0x78] sm:$0xff]  ;;  %s10062_s6 = scalar_lea.vmem [#allocation7], %s5557_s9 }
  0x51   : > { %873 = vmatprep.subr.bf16.mxu0 %v6416_v0  ;;  %5805 = vmatprep.subr.bf16.mxu1 %v6416_v0  ;;  %v261_v3 = vld [vmem:[%s6585_s8 + $0x60] sm:$0xff]  ;;  %v288_v4 = vpack.c.bf16 %v264_v2, %v263_v1  ;;  %v262_v5 = vld [vmem:[%s6585_s8 + $0x68] sm:$0xff]  ;;  %v259_v7 = vld [vmem:[%s6585_s8 + $0x50] sm:$0xff]  ;;  %s5689_s9 = sshll.u32 %s6397_s19, 6  ;;  %s5450_s1 = sshll.u32 %s10062_s6, 4  ;;  %s10098_s1 = int_to_ptr.vmem [resolvable:$true] %s5450_s1 }
  0x52   : > { %5933 = vset.pattern.permute.xlu0 %v6416_v0  ;;  %5934 = vset.pattern.permute.xlu1 %v6416_v0  ;;  %v287_v6 = vpack.c.bf16 %v262_v5, %v261_v3  ;;  %v260_v8 = vld [vmem:[%s6585_s8 + $0x58] sm:$0xff]  ;;  %v257_v10 = vld [vmem:[%s6585_s8 + $0x40] sm:$0xff]  ;;  %v258_v11 = vld [vmem:[%s6585_s8 + $0x48] sm:$0xff]  ;;  %s5447_s25 = sadd.s32 %s6393_s18, %s5689_s9  ;;  %s5436_s27 = scalar_lea.sflag [#allocation4], %s6579_s20 }
  0x53   : > { %874 = vmatpush1.bf16.msra.mxu0 %v288_v4  ;;  %5821 = vmatpush1.bf16.msra.mxu1 %v288_v4  ;;  %v286_v9 = vpack.c.bf16 %v260_v8, %v259_v7  ;;  %v285_v12 = vpack.c.bf16 %v258_v11, %v257_v10  ;;  %v255_v13 = vld [vmem:[%s6585_s8 + $0x30] sm:$0xff]  ;;  %v5937_v14 = vld [vmem:[#allocation5 + $0x4] ss:$8 sps:$4 sm:$0xff]   ;;  %v256_v15 = vld [vmem:[%s6585_s8 + $0x38] sm:$0xff]  ;;  %s5690_s11 = sshll.u32 %s5447_s25, 7  ;;  %s6309_s23 = scalar_lea.vmem %s10098_s1, 4096 }
  0x54   : > { %875 = vmatprep.subr.bf16.mxu0 %v6416_v0  ;;  %5806 = vmatprep.subr.bf16.mxu1 %v6416_v0  ;;  %v284_v16 = vpack.c.bf16 %v256_v15, %v255_v13  ;;  %v253_v17 = vld [vmem:[%s6585_s8 + $0x20] sm:$0xff]  ;;  %v254_v18 = vld [vmem:[%s6585_s8 + $0x28] sm:$0xff]  ;;  %v251_v20 = vld [vmem:[%s6585_s8 + $0x10] sm:$0xff]  ;;  %s10103_s12 = scalar_lea.hbm %s10161_s4, %s5690_s11  ;;  %p6310_p3 = scmp.ne.s32.totalorder %s10098_s1, %s6309_s23 }
  0x55   : > { %905 = vmatprep.mubr.bf16.mxu0 %v5937_v14  ;;  %v283_v19 = vpack.c.bf16 %v254_v18, %v253_v17  ;;  %v252_v21 = vld [vmem:[%s6585_s8 + $0x18] sm:$0xff]  ;;  %v249_v23 = vld [vmem:[%s6585_s8] sm:$0xff]  ;;  %v250_v24 = vld [vmem:[%s6585_s8 + $0x8] sm:$0xff]  ;;  %p10931_p5 = scmp.ne.s32.totalorder %s10332_s29, 0 }
  0x56   : > { %v282_v22 = vpack.c.bf16 %v252_v21, %v251_v20  ;;  %v281_v25 = vpack.c.bf16 %v250_v24, %v249_v23  ;;  %v279_v26 = vld [vmem:[%s6585_s8 + $0xf0] sm:$0xff]  ;;  %v280_v27 = vld [vmem:[%s6585_s8 + $0xf8] sm:$0xff]  ;;  %v277_v28 = vld [vmem:[%s6585_s8 + $0xe0] sm:$0xff] }
  0x57   : > { %876 = vmatpush1.bf16.msra.mxu0 %v287_v6  ;;  %5822 = vmatpush1.bf16.msra.mxu1 %v287_v6  ;;  %v278_v29 = vld [vmem:[%s6585_s8 + $0xe8] sm:$0xff]  ;;  %v296_v30 = vpack.c.bf16 %v280_v27, %v279_v26  ;;  %v275_v31 = vld [vmem:[%s6585_s8 + $0xd0] sm:$0xff]  ;;  %v276_v33 = vld [vmem:[%s6585_s8 + $0xd8] sm:$0xff]  ;;  %p6311_p7 = pnand %p6310_p3, %p10931_p5 }
  0x58   : > { %877 = vmatprep.subr.bf16.mxu0 %v6416_v0  ;;  %5807 = vmatprep.subr.bf16.mxu1 %v6416_v0  ;;  %v295_v32 = vpack.c.bf16 %v278_v29, %v277_v28  ;;  %v273_v34 = vld [vmem:[%s6585_s8 + $0xc0] sm:$0xff]  ;;  %v274_v35 = vld [vmem:[%s6585_s8 + $0xc8] sm:$0xff]  ;;  %v294_v36 = vpack.c.bf16 %v276_v33, %v275_v31  ;;  %v271_v37 = vld [vmem:[%s6585_s8 + $0xb0] sm:$0xff] }
  0x59   : > { %v293_v38 = vpack.c.bf16 %v274_v35, %v273_v34  ;;  %v272_v39 = vld [vmem:[%s6585_s8 + $0xb8] sm:$0xff]  ;;  %v269_v40 = vld [vmem:[%s6585_s8 + $0xa0] sm:$0xff]  ;;  %v270_v41 = vld [vmem:[%s6585_s8 + $0xa8] sm:$0xff]  ;;  %p6312_p8 = pneg %p6311_p7 }
  0x5a   : > { %v292_v42 = vpack.c.bf16 %v272_v39, %v271_v37  ;;  %v267_v43 = vld [vmem:[%s6585_s8 + $0x90] sm:$0xff]  ;;  %v291_v44 = vpack.c.bf16 %v270_v41, %v269_v40  ;;  %v268_v45 = vld [vmem:[%s6585_s8 + $0x98] sm:$0xff]  ;;  %v265_v46 = vld [vmem:[%s6585_s8 + $0x80] sm:$0xff] }
  0x5b   : > { %878 = vmatpush1.bf16.msra.mxu0 %v286_v9  ;;  %5823 = vmatpush1.bf16.msra.mxu1 %v286_v9  ;;  %v266_v47 = vld [vmem:[%s6585_s8 + $0x88] sm:$0xff]  ;;  %v290_v48 = vpack.c.bf16 %v268_v45, %v267_v43  ;;  %v5938_v51 = vld [vmem:[#allocation5 + $0x14] ss:$8 sps:$4 sm:$0xff]   ;;  %v5940_v52 = vld [vmem:[#allocation5 + $0x10] ss:$8 sps:$4 sm:$0xff]   ;;  %s6417_s8 = smov [#allocation7]  }
  0x5c   : > { %879 = vmatprep.subr.bf16.mxu0 %v6416_v0  ;;  %5808 = vmatprep.subr.bf16.mxu1 %v6416_v0  ;;  %v289_v49 = vpack.c.bf16 %v266_v47, %v265_v46  ;;  %v5935_v50 = vld [vmem:[#allocation5] ss:$8 sps:$4 sm:$0xff]   ;;  %v5941_v53 = vld [vmem:[#allocation5 + $0x24] ss:$8 sps:$4 sm:$0xff]   ;;  %v5944_v55 = vld [vmem:[#allocation5 + $0x34] ss:$8 sps:$4 sm:$0xff]  }
  0x5d   : > { %v5943_v54 = vld [vmem:[#allocation5 + $0x20] ss:$8 sps:$4 sm:$0xff]   ;;  %v5946_v56 = vld [vmem:[#allocation5 + $0x30] ss:$8 sps:$4 sm:$0xff]   ;;  %v5947_v57 = vld [vmem:[#allocation5 + $0x44] ss:$8 sps:$4 sm:$0xff]  }
  0x5e   : > { %v5949_v58 = vld [vmem:[#allocation5 + $0x40] ss:$8 sps:$4 sm:$0xff]   ;;  %v5950_v59 = vld [vmem:[#allocation5 + $0x54] ss:$8 sps:$4 sm:$0xff]   ;;  %v5952_v60 = vld [vmem:[#allocation5 + $0x50] ss:$8 sps:$4 sm:$0xff]  }
  0x5f   : > { %880 = vmatpush1.bf16.msra.mxu0 %v285_v12  ;;  %5824 = vmatpush1.bf16.msra.mxu1 %v285_v12  ;;  %v5953_v61 = vld [vmem:[#allocation5 + $0x64] ss:$8 sps:$4 sm:$0xff]   ;;  %v5955_v62 = vld [vmem:[#allocation5 + $0x60] ss:$8 sps:$4 sm:$0xff]   ;;  %v5956_v63 = vld [vmem:[#allocation5 + $0x74] ss:$8 sps:$4 sm:$0xff]  }
  0x60   : > { %881 = vmatprep.subr.bf16.mxu0 %v6416_v0  ;;  %5809 = vmatprep.subr.bf16.mxu1 %v6416_v0  ;;  %v5959_v1 = vld [vmem:[#allocation5 + $0x84] ss:$8 sps:$4 sm:$0xff]   ;;  %v6009_v2 = vld [vmem:[#allocation5 + $0x200] ss:$8 sps:$4 sm:$0xff]   ;;  %v5962_v5 = vld [vmem:[#allocation5 + $0x94] ss:$8 sps:$4 sm:$0xff]  }
  0x61   : > { %v6011_v3 = vld [vmem:[#allocation5 + $0x204] ss:$8 sps:$4 sm:$0xff]   ;;  %v5961_v4 = vld [vmem:[#allocation5 + $0x80] ss:$8 sps:$4 sm:$0xff]   ;;  %v5964_v6 = vld [vmem:[#allocation5 + $0x90] ss:$8 sps:$4 sm:$0xff]  }
  0x62   : > { %1161 = vmatprep.mubr.bf16.mxu1 %v6011_v3  ;;  %v5965_v7 = vld [vmem:[#allocation5 + $0xa4] ss:$8 sps:$4 sm:$0xff]   ;;  %v6015_v8 = vld [vmem:[#allocation5 + $0x214] ss:$8 sps:$4 sm:$0xff]   ;;  %v6018_v9 = vld [vmem:[#allocation5 + $0x210] ss:$8 sps:$4 sm:$0xff]  }
  0x63   : > { %882 = vmatpush1.bf16.msra.mxu0 %v284_v16  ;;  %5825 = vmatpush1.bf16.msra.mxu1 %v284_v16  ;;  %v5967_v10 = vld [vmem:[#allocation5 + $0xa0] ss:$8 sps:$4 sm:$0xff]   ;;  %v5968_v11 = vld [vmem:[#allocation5 + $0xb4] ss:$8 sps:$4 sm:$0xff]   ;;  %v6021_v12 = vld [vmem:[#allocation5 + $0x224] ss:$8 sps:$4 sm:$0xff]  }
  0x64   : > { %883 = vmatprep.subr.bf16.mxu0 %v6416_v0  ;;  %5810 = vmatprep.subr.bf16.mxu1 %v6416_v0  ;;  %v6024_v13 = vld [vmem:[#allocation5 + $0x220] ss:$8 sps:$4 sm:$0xff]   ;;  %v5970_v14 = vld [vmem:[#allocation5 + $0xb0] ss:$8 sps:$4 sm:$0xff]   ;;  %v5971_v15 = vld [vmem:[#allocation5 + $0xc4] ss:$8 sps:$4 sm:$0xff]  }
  0x65   : > { %v6027_v16 = vld [vmem:[#allocation5 + $0x234] ss:$8 sps:$4 sm:$0xff]   ;;  %v6030_v17 = vld [vmem:[#allocation5 + $0x230] ss:$8 sps:$4 sm:$0xff]   ;;  %v5973_v18 = vld [vmem:[#allocation5 + $0xc0] ss:$8 sps:$4 sm:$0xff]  }
  0x66   : > { %v6034_v20 = vld [vmem:[#allocation5 + $0x244] ss:$8 sps:$4 sm:$0xff]   ;;  %v6036_v21 = vld [vmem:[#allocation5 + $0x240] ss:$8 sps:$4 sm:$0xff]   ;;  %v6040_v24 = vld [vmem:[#allocation5 + $0x254] ss:$8 sps:$4 sm:$0xff]  }
  0x67   : > { %884 = vmatpush1.bf16.msra.mxu0 %v283_v19  ;;  %5826 = vmatpush1.bf16.msra.mxu1 %v283_v19  ;;  %v5974_v19 = vld [vmem:[#allocation5 + $0xd4] ss:$8 sps:$4 sm:$0xff]   ;;  %v5977_v23 = vld [vmem:[#allocation5 + $0xe4] ss:$8 sps:$4 sm:$0xff]   ;;  %v5979_v26 = vld [vmem:[#allocation5 + $0xe0] ss:$8 sps:$4 sm:$0xff]  }
  0x68   : > { %885 = vmatprep.subr.bf16.mxu0 %v6416_v0  ;;  %5811 = vmatprep.subr.bf16.mxu1 %v6416_v0  ;;  %v5980_v27 = vld [vmem:[#allocation5 + $0xf4] ss:$8 sps:$4 sm:$0xff]   ;;  %v6046_v28 = vld [vmem:[#allocation5 + $0x264] ss:$8 sps:$4 sm:$0xff]   ;;  %v6048_v29 = vld [vmem:[#allocation5 + $0x260] ss:$8 sps:$4 sm:$0xff]  }
  0x69   : > { %v5983_v31 = vld [vmem:[#allocation5 + $0x104] ss:$8 sps:$4 sm:$0xff]   ;;  %v6054_v33 = vld [vmem:[#allocation5 + $0x270] ss:$8 sps:$4 sm:$0xff]   ;;  %v5985_v34 = vld [vmem:[#allocation5 + $0x100] ss:$8 sps:$4 sm:$0xff]  }
  0x6a   : > { %v5986_v35 = vld [vmem:[#allocation5 + $0x114] ss:$8 sps:$4 sm:$0xff]   ;;  %v6057_v37 = vld [vmem:[#allocation5 + $0x280] ss:$8 sps:$4 sm:$0xff]   ;;  %v5989_v39 = vld [vmem:[#allocation5 + $0x124] ss:$8 sps:$4 sm:$0xff]  }
  0x6b   : > { %886 = vmatpush1.bf16.msra.mxu0 %v282_v22  ;;  %5827 = vmatpush1.bf16.msra.mxu1 %v282_v22  ;;  %v5976_v22 = vld [vmem:[#allocation5 + $0xd0] ss:$8 sps:$4 sm:$0xff]   ;;  %v6058_v40 = vld [vmem:[#allocation5 + $0x294] ss:$8 sps:$4 sm:$0xff]   ;;  %v6063_v45 = vld [vmem:[#allocation5 + $0x2a0] ss:$8 sps:$4 sm:$0xff]  }
  0x6c   : > { %887 = vmatprep.subr.bf16.mxu0 %v6416_v0  ;;  %5812 = vmatprep.subr.bf16.mxu1 %v6416_v0  ;;  %v6060_v41 = vld [vmem:[#allocation5 + $0x290] ss:$8 sps:$4 sm:$0xff]   ;;  %v5992_v43 = vld [vmem:[#allocation5 + $0x134] ss:$8 sps:$4 sm:$0xff]   ;;  %v5995_v47 = vld [vmem:[#allocation5 + $0x144] ss:$8 sps:$4 sm:$0xff]  }
  0x6d   : > { %v5994_v46 = vld [vmem:[#allocation5 + $0x130] ss:$8 sps:$4 sm:$0xff]   ;;  %v6013_v3 = vld [vmem:[#allocation5 + $0x194] ss:$8 sps:$4 sm:$0xff]   ;;  %s6313_s15 = sshll.u32 %s6417_s8, 4  ;;  %s6314_s15 = int_to_ptr.vmem [resolvable:$false] %s6313_s15 }
  0x6e   : > { %s6315_s22 = scalar_lea.vmem %s6314_s15, 8192  ;;  %p6316_p9 = scmp.lt.s32.totalorder %s10098_s1, %s6314_s15 }
  0x6f   : > { %888 = vmatpush1.bf16.msra.mxu0 %v281_v25  ;;  %5828 = vmatpush1.bf16.msra.mxu1 %v281_v25  ;;  %v6042_v25 = vld [vmem:[#allocation5 + $0x250] ss:$8 sps:$4 sm:$0xff]   ;;  %p6317_p12 = scmp.lt.s32.totalorder %s6315_s22, %s6309_s23 }
  0x70   : > { %889 = vmatprep.subr.bf16.mxu0 %v6416_v0  ;;  %5813 = vmatprep.subr.bf16.mxu1 %v6416_v0 }
  0x71   : > { %p6318_p13 = por %p6317_p12, %p6316_p9 }
  0x73   : > { %890 = vmatpush2.bf16.msra.mxu0 %v296_v30  ;;  %5829 = vmatpush2.bf16.msra.mxu1 %v296_v30  ;;  %v5982_v30 = vld [vmem:[#allocation5 + $0xf0] ss:$8 sps:$4 sm:$0xff]   ;;  %p6319_p0 = pnand %p6318_p13, %p6312_p8 }
  0x74   : > { %891 = vmatprep.subr.bf16.mxu0 %v6416_v0  ;;  %5814 = vmatprep.subr.bf16.mxu1 %v6416_v0 }
  0x77   : > { %892 = vmatpush2.bf16.msra.mxu0 %v295_v32  ;;  %5830 = vmatpush2.bf16.msra.mxu1 %v295_v32  ;;  %v6052_v32 = vld [vmem:[#allocation5 + $0x274] ss:$8 sps:$4 sm:$0xff]  }
  0x78   : > { %893 = vmatprep.subr.bf16.mxu0 %v6416_v0  ;;  %5815 = vmatprep.subr.bf16.mxu1 %v6416_v0 }
  0x7b   : > { %894 = vmatpush2.bf16.msra.mxu0 %v294_v36  ;;  %5831 = vmatpush2.bf16.msra.mxu1 %v294_v36  ;;  %v6055_v36 = vld [vmem:[#allocation5 + $0x284] ss:$8 sps:$4 sm:$0xff]  }
  0x7c   : > { %895 = vmatprep.subr.bf16.mxu0 %v6416_v0  ;;  %5816 = vmatprep.subr.bf16.mxu1 %v6416_v0 }
  0x7f   : > { %896 = vmatpush2.bf16.msra.mxu0 %v293_v38  ;;  %5832 = vmatpush2.bf16.msra.mxu1 %v293_v38  ;;  %v5988_v38 = vld [vmem:[#allocation5 + $0x110] ss:$8 sps:$4 sm:$0xff]  }
  0x80   : > { %897 = vmatprep.subr.bf16.mxu0 %v6416_v0  ;;  %5817 = vmatprep.subr.bf16.mxu1 %v6416_v0 }
  0x83   : > { %898 = vmatpush2.bf16.msra.mxu0 %v292_v42  ;;  %5833 = vmatpush2.bf16.msra.mxu1 %v292_v42  ;;  %v5991_v42 = vld [vmem:[#allocation5 + $0x120] ss:$8 sps:$4 sm:$0xff]  }
  0x84   : > { %899 = vmatprep.subr.bf16.mxu0 %v6416_v0  ;;  %5818 = vmatprep.subr.bf16.mxu1 %v6416_v0 }
  0x87   : > { %900 = vmatpush2.bf16.msra.mxu0 %v291_v44  ;;  %5834 = vmatpush2.bf16.msra.mxu1 %v291_v44  ;;  %v6061_v44 = vld [vmem:[#allocation5 + $0x2a4] ss:$8 sps:$4 sm:$0xff]  }
  0x88   : > { %901 = vmatprep.subr.bf16.mxu0 %v6416_v0  ;;  %5819 = vmatprep.subr.bf16.mxu1 %v6416_v0 }
  0x8b   : > { %902 = vmatpush2.bf16.msra.mxu0 %v290_v48  ;;  %5835 = vmatpush2.bf16.msra.mxu1 %v290_v48  ;;  %v6064_v48 = vld [vmem:[#allocation5 + $0x2b4] ss:$8 sps:$4 sm:$0xff]  }
  0x8c   : > { %903 = vmatprep.subr.bf16.mxu0 %v6416_v0  ;;  %5820 = vmatprep.subr.bf16.mxu1 %v6416_v0  ;;  %v5958_v0 = vld [vmem:[#allocation5 + $0x70] ss:$8 sps:$4 sm:$0xff]  }
  0x8f   : > { %904 = vmatpush2.bf16.msra.mxu0 %v289_v49  ;;  %5836 = vmatpush2.bf16.msra.mxu1 %v289_v49  ;;  %v6066_v49 = vld [vmem:[#allocation5 + $0x2b0] ss:$8 sps:$4 sm:$0xff]  }
  0x92   : > { %906 = vmatmul.mubr.bf16.vlgmr.msra.gmra.mxu0 %v5935_v50  ;;  %1162 = vmatmul.mubr.bf16.vlgmr.msra.gmra.mxu1 %v6009_v2  ;;  %v5997_v50 = vld [vmem:[#allocation5 + $0x140] ss:$8 sps:$4 sm:$0xff]  }
  0x93   : > { %913 = vmatprep.mubr.bf16.mxu0 %v5938_v51  ;;  %1169 = vmatprep.mubr.bf16.mxu1 %v6015_v8  ;;  %v5998_v51 = vld [vmem:[#allocation5 + $0x154] ss:$8 sps:$4 sm:$0xff]   ;;  %v6012_v2 = vld [vmem:[#allocation5 + $0x180] ss:$8 sps:$4 sm:$0xff]   ;;  %v6019_v8 = vld [vmem:[#allocation5 + $0x1a4] ss:$8 sps:$4 sm:$0xff]  }
  0x9a   : > { %914 = vmatmul.mubr.bf16.gmra.mxu0 %v5940_v52  ;;  %1170 = vmatmul.mubr.bf16.gmra.mxu1 %v6018_v9  ;;  %v6067_v52 = vld [vmem:[#allocation5 + $0x2c4] ss:$8 sps:$4 sm:$0xff]  }
  0x9b   : > { %921 = vmatprep.mubr.bf16.mxu0 %v5941_v53  ;;  %1177 = vmatprep.mubr.bf16.mxu1 %v6021_v12  ;;  %v6069_v53 = vld [vmem:[#allocation5 + $0x2c0] ss:$8 sps:$4 sm:$0xff]  }
  0xa2   : > { %922 = vmatmul.mubr.bf16.gmra.mxu0 %v5943_v54  ;;  %1178 = vmatmul.mubr.bf16.gmra.mxu1 %v6024_v13  ;;  %v6000_v54 = vld [vmem:[#allocation5 + $0x150] ss:$8 sps:$4 sm:$0xff]   ;;  %v6023_v13 = vld [vmem:[#allocation5 + $0x1a0] ss:$8 sps:$4 sm:$0xff]  }
  0xa3   : > { %929 = vmatprep.mubr.bf16.mxu0 %v5944_v55  ;;  %1185 = vmatprep.mubr.bf16.mxu1 %v6027_v16  ;;  %v6001_v55 = vld [vmem:[#allocation5 + $0x164] ss:$8 sps:$4 sm:$0xff]  }
  0xaa   : > { %930 = vmatmul.mubr.bf16.gmra.mxu0 %v5946_v56  ;;  %1186 = vmatmul.mubr.bf16.gmra.mxu1 %v6030_v17  ;;  %v6070_v56 = vld [vmem:[#allocation5 + $0x2d4] ss:$8 sps:$4 sm:$0xff]  }
  0xab   : > { %937 = vmatprep.mubr.bf16.mxu0 %v5947_v57  ;;  %1193 = vmatprep.mubr.bf16.mxu1 %v6034_v20  ;;  %v6072_v57 = vld [vmem:[#allocation5 + $0x2d0] ss:$8 sps:$4 sm:$0xff]   ;;  %v6033_v20 = vld [vmem:[#allocation5 + $0x1c4] ss:$8 sps:$4 sm:$0xff]  }
  0xb2   : > { %938 = vmatmul.mubr.bf16.gmra.mxu0 %v5949_v58  ;;  %1194 = vmatmul.mubr.bf16.gmra.mxu1 %v6036_v21  ;;  %v6003_v58 = vld [vmem:[#allocation5 + $0x160] ss:$8 sps:$4 sm:$0xff]  }
  0xb3   : > { %945 = vmatprep.mubr.bf16.mxu0 %v5950_v59  ;;  %1201 = vmatprep.mubr.bf16.mxu1 %v6040_v24  ;;  %v6004_v59 = vld [vmem:[#allocation5 + $0x174] ss:$8 sps:$4 sm:$0xff]  }
  0xba   : > { %946 = vmatmul.mubr.bf16.gmra.mxu0 %v5952_v60  ;;  %1202 = vmatmul.mubr.bf16.gmra.mxu1 %v6042_v25  ;;  %v6073_v60 = vld [vmem:[#allocation5 + $0x2e4] ss:$8 sps:$4 sm:$0xff]   ;;  %v6031_v25 = vld [vmem:[#allocation5 + $0x1c0] ss:$8 sps:$4 sm:$0xff]  }
  0xbb   : > { %953 = vmatprep.mubr.bf16.mxu0 %v5953_v61  ;;  %1209 = vmatprep.mubr.bf16.mxu1 %v6046_v28  ;;  %v6075_v61 = vld [vmem:[#allocation5 + $0x2e0] ss:$8 sps:$4 sm:$0xff]  }
  0xc2   : > { %954 = vmatmul.mubr.bf16.gmra.mxu0 %v5955_v62  ;;  %1210 = vmatmul.mubr.bf16.gmra.mxu1 %v6048_v29  ;;  %v6006_v62 = vld [vmem:[#allocation5 + $0x170] ss:$8 sps:$4 sm:$0xff]  }
  0xc3   : > { %961 = vmatprep.mubr.bf16.mxu0 %v5956_v63  ;;  %1217 = vmatprep.mubr.bf16.mxu1 %v6052_v32  ;;  %v6007_v63 = vld [vmem:[#allocation5 + $0x184] ss:$8 sps:$4 sm:$0xff]  }
  0xc4   : > { %v6045_v32 = vld [vmem:[#allocation5 + $0x1e4] ss:$8 sps:$4 sm:$0xff]  }
  0xca   : > { %962 = vmatmul.mubr.bf16.gmra.mxu0 %v5958_v0  ;;  %1218 = vmatmul.mubr.bf16.gmra.mxu1 %v6054_v33  ;;  %v6076_v0 = vld [vmem:[#allocation5 + $0x2f4] ss:$8 sps:$4 sm:$0xff]  }
  0xcb   : > { %969 = vmatprep.mubr.bf16.mxu0 %v5959_v1  ;;  %1225 = vmatprep.mubr.bf16.mxu1 %v6055_v36  ;;  %v6078_v1 = vld [vmem:[#allocation5 + $0x2f0] ss:$8 sps:$4 sm:$0xff]  }
  0xd2   : > { %970 = vmatmul.mubr.bf16.gmra.mxu0 %v5961_v4  ;;  %1226 = vmatmul.mubr.bf16.gmra.mxu1 %v6057_v37  ;;  %v6043_v37 = vld [vmem:[#allocation5 + $0x1e0] ss:$8 sps:$4 sm:$0xff]  }
  0xd3   : > { %977 = vmatprep.mubr.bf16.mxu0 %v5962_v5  ;;  %1233 = vmatprep.mubr.bf16.mxu1 %v6058_v40 }
  0xda   : > { %978 = vmatmul.mubr.bf16.gmra.mxu0 %v5964_v6  ;;  %1234 = vmatmul.mubr.bf16.gmra.mxu1 %v6060_v41 }
  0xdb   : > { %985 = vmatprep.mubr.bf16.mxu0 %v5965_v7  ;;  %1241 = vmatprep.mubr.bf16.mxu1 %v6061_v44  ;;  %v6017_v7 = vld [vmem:[#allocation5 + $0x190] ss:$8 sps:$4 sm:$0xff]  }
  0xe2   : > { %986 = vmatmul.mubr.bf16.gmra.mxu0 %v5967_v10  ;;  %1242 = vmatmul.mubr.bf16.gmra.mxu1 %v6063_v45  ;;  %v1290_v45 = vlaneseq }
  0xe3   : > { %993 = vmatprep.mubr.bf16.mxu0 %v5968_v11  ;;  %1249 = vmatprep.mubr.bf16.mxu1 %v6064_v48 }
  0xe4   : > { %v1291_v48 = vshrl.u32 %v1290_v45, 7 }
  0xea   : > { %994 = vmatmul.mubr.bf16.gmra.mxu0 %v5970_v14  ;;  %1250 = vmatmul.mubr.bf16.gmra.mxu1 %v6066_v49  ;;  %v6025_v14 = vld [vmem:[#allocation5 + $0x1b4] ss:$8 sps:$4 sm:$0xff]  }
  0xeb   : > { %1001 = vmatprep.mubr.bf16.mxu0 %v5971_v15  ;;  %1257 = vmatprep.mubr.bf16.mxu1 %v6067_v52  ;;  %v6695_v52 = vsub.s32 1, %v1291_v48 }
  0xed   : > { %10346 = vst [vmem:[#allocation17_spill] sm:$0xff] %v6695_v52 }
  0xf2   : > { %1002 = vmatmul.mubr.bf16.gmra.mxu0 %v5973_v18  ;;  %1258 = vmatmul.mubr.bf16.gmra.mxu1 %v6069_v53  ;;  %v6697_v53 = vsub.s32 2, %v1291_v48 }
  0xf3   : > { %1009 = vmatprep.mubr.bf16.mxu0 %v5974_v19  ;;  %1265 = vmatprep.mubr.bf16.mxu1 %v6070_v56  ;;  %v6029_v19 = vld [vmem:[#allocation5 + $0x1b0] ss:$8 sps:$4 sm:$0xff]   ;;  %v6703_v56 = vsub.s32 5, %v1291_v48 }
  0xf4   : > { %10347 = vst [vmem:[#allocation18_spill] sm:$0xff] %v6697_v53 }
  0xfa   : > { %1010 = vmatmul.mubr.bf16.gmra.mxu0 %v5976_v22  ;;  %1266 = vmatmul.mubr.bf16.gmra.mxu1 %v6072_v57  ;;  %v6705_v57 = vsub.s32 6, %v1291_v48 }
  0xfb   : > { %1017 = vmatprep.mubr.bf16.mxu0 %v5977_v23  ;;  %1273 = vmatprep.mubr.bf16.mxu1 %v6073_v60 }
  0xfc   : > { %10349 = vst [vmem:[#allocation20_spill] sm:$0xff] %v6705_v57 }
 0x102   : > { %1018 = vmatmul.mubr.bf16.gmra.mxu0 %v5979_v26  ;;  %1274 = vmatmul.mubr.bf16.gmra.mxu1 %v6075_v61  ;;  %v6039_v26 = vld [vmem:[#allocation5 + $0x1d4] ss:$8 sps:$4 sm:$0xff]  }
 0x103   : > { %1025 = vmatprep.mubr.bf16.mxu0 %v5980_v27  ;;  %1281 = vmatprep.mubr.bf16.mxu1 %v6076_v0 }
 0x10a   : > { %1026 = vmatmul.mubr.bf16.gmra.mxu0 %v5982_v30  ;;  %1282 = vmatmul.mubr.bf16.gmra.mxu1 %v6078_v1 }
 0x10b   : > { %1033 = vmatprep.mubr.bf16.mxu0 %v5983_v31  ;;  %v6037_v31 = vld [vmem:[#allocation5 + $0x1d0] ss:$8 sps:$4 sm:$0xff]  }
 0x112   : > { %1034 = vmatmul.mubr.bf16.gmra.mxu0 %v5985_v34 }
 0x113   : > { %1041 = vmatprep.mubr.bf16.mxu0 %v5986_v35 }
 0x11a   : > { %1042 = vmatmul.mubr.bf16.gmra.mxu0 %v5988_v38  ;;  %v6051_v38 = vld [vmem:[#allocation5 + $0x1f4] ss:$8 sps:$4 sm:$0xff]  }
 0x11b   : > { %1049 = vmatprep.mubr.bf16.mxu0 %v5989_v39 }
 0x122   : > { %1050 = vmatmul.mubr.bf16.gmra.mxu0 %v5991_v42 }
 0x123   : > { %1057 = vmatprep.mubr.bf16.mxu0 %v5992_v43  ;;  %v6049_v43 = vld [vmem:[#allocation5 + $0x1f0] ss:$8 sps:$4 sm:$0xff]  }
 0x12a   : > { %1058 = vmatmul.mubr.bf16.gmra.mxu0 %v5994_v46 }
 0x12b   : > { %1065 = vmatprep.mubr.bf16.mxu0 %v5995_v47 }
 0x132   : > { %1066 = vmatmul.mubr.bf16.gmra.mxu0 %v5997_v50 }
 0x133   : > { %1073 = vmatprep.mubr.bf16.mxu0 %v5998_v51  ;;  %v6693_v51 = vsub.s32 0, %v1291_v48 }
 0x135   : > { %10345 = vst [vmem:[#allocation16_spill] sm:$0xff] %v6693_v51 }
 0x13a   : > { %1074 = vmatmul.mubr.bf16.gmra.mxu0 %v6000_v54  ;;  %v6699_v54 = vsub.s32 3, %v1291_v48 }
 0x13b   : > { %1081 = vmatprep.mubr.bf16.mxu0 %v6001_v55  ;;  %v6701_v55 = vsub.s32 4, %v1291_v48 }
 0x13c   : > { %10348 = vst [vmem:[#allocation19_spill] sm:$0xff] %v6699_v54 }
 0x142   : > { %1082 = vmatmul.mubr.bf16.gmra.mxu0 %v6003_v58  ;;  %v6707_v58 = vsub.s32 7, %v1291_v48 }
 0x143   : > { %1089 = vmatprep.mubr.bf16.mxu0 %v6004_v59 }
 0x144   : > { %10350 = vst [vmem:[#allocation21_spill] sm:$0xff] %v6707_v58 }
 0x14a   : > { %1090 = vmatmul.mubr.bf16.gmra.mxu0 %v6006_v62 }
 0x14b   : > { %1097 = vmatprep.mubr.bf16.mxu0 %v6007_v63 }
 0x152   : > { %v6661_v4 = vpop.f32.mrf.mxu0  ;;  %1098 = vmatmul.mubr.bf16.gmra.mxu0 %v6012_v2 }
 0x153   : > { %1105 = vmatprep.mubr.bf16.mxu0 %v6013_v3  ;;  %v1293_v61 = vrot.slane %v6661_v4, %v6693_v51  ;;  %v1453_v62 = vrot.slane %v6661_v4, %v6695_v52 }
 0x154   : > { %v909_v5 = vpop.f32.mrf.mxu0 }
 0x156   : > { %v6663_v6 = vpop.f32.mrf.mxu0 }
 0x158   : > { %v912_v9 = vpop.f32.mrf.mxu0 }
 0x159   : > { %v1457_v9 = vrot.slane %v6663_v6, %v6695_v52 }
 0x15a   : > { %v6665_v10 = vpop.f32.mrf.mxu0  ;;  %1106 = vmatmul.mubr.bf16.gmra.mxu0 %v6017_v7 }
 0x15b   : > { %1113 = vmatprep.mubr.bf16.mxu0 %v6019_v8  ;;  %v1297_v8 = vrot.slane %v6663_v6, %v6693_v51 }
 0x15c   : > { %v917_v11 = vpop.f32.mrf.mxu0 }
 0x15e   : > { %v6667_v12 = vpop.f32.mrf.mxu0 }
 0x160   : > { %v920_v15 = vpop.f32.mrf.mxu0 }
 0x162   : > { %v6669_v16 = vpop.f32.mrf.mxu0  ;;  %1114 = vmatmul.mubr.bf16.gmra.mxu0 %v6023_v13 }
 0x163   : > { %1121 = vmatprep.mubr.bf16.mxu0 %v6025_v14  ;;  %v1309_v48 = vrot.slane %v6669_v16, %v6693_v51 }
 0x164   : > { %v925_v17 = vpop.f32.mrf.mxu0 }
 0x166   : > { %v6671_v18 = vpop.f32.mrf.mxu0 }
 0x168   : > { %v928_v21 = vpop.f32.mrf.mxu0 }
 0x169   : > { %v1301_v21 = vrot.slane %v6665_v10, %v6693_v51 }
 0x16a   : > { %v6673_v22 = vpop.f32.mrf.mxu0  ;;  %1122 = vmatmul.mubr.bf16.gmra.mxu0 %v6029_v19 }
 0x16b   : > { %1129 = vmatprep.mubr.bf16.mxu0 %v6033_v20  ;;  %v1317_v15 = vrot.slane %v6673_v22, %v6693_v51 }
 0x16c   : > { %v933_v23 = vpop.f32.mrf.mxu0 }
 0x16d   : > { %v1461_v23 = vrot.slane %v6665_v10, %v6695_v52 }
 0x16e   : > { %v6675_v24 = vpop.f32.mrf.mxu0 }
 0x170   : > { %v936_v27 = vpop.f32.mrf.mxu0 }
 0x171   : > { %v1321_v27 = vrot.slane %v6675_v24, %v6693_v51 }
 0x172   : > { %v6677_v28 = vpop.f32.mrf.mxu0  ;;  %1130 = vmatmul.mubr.bf16.gmra.mxu0 %v6031_v25 }
 0x173   : > { %1137 = vmatprep.mubr.bf16.mxu0 %v6039_v26 }
 0x174   : > { %v941_v29 = vpop.f32.mrf.mxu0 }
 0x176   : > { %v6679_v30 = vpop.f32.mrf.mxu0 }
 0x178   : > { %v944_v33 = vpop.f32.mrf.mxu0 }
 0x17a   : > { %v6681_v34 = vpop.f32.mrf.mxu0  ;;  %1138 = vmatmul.mubr.bf16.gmra.mxu0 %v6037_v31  ;;  %v10366_v31 = vrot.slane %v6671_v18, %v6695_v52 }
 0x17b   : > { %1145 = vmatprep.mubr.bf16.mxu0 %v6045_v32 }
 0x17c   : > { %v949_v35 = vpop.f32.mrf.mxu0 }
 0x17d   : > { %v1305_v35 = vrot.slane %v6667_v12, %v6693_v51 }
 0x17e   : > { %v6683_v36 = vpop.f32.mrf.mxu0 }
 0x180   : > { %v952_v39 = vpop.f32.mrf.mxu0 }
 0x181   : > { %v10367_v39 = vrot.slane %v6673_v22, %v6695_v52 }
 0x182   : > { %v6685_v40 = vpop.f32.mrf.mxu0  ;;  %1146 = vmatmul.mubr.bf16.gmra.mxu0 %v6043_v37  ;;  %v1465_v37 = vrot.slane %v6667_v12, %v6695_v52 }
 0x183   : > { %1153 = vmatprep.mubr.bf16.mxu0 %v6051_v38 }
 0x184   : > { %v957_v41 = vpop.f32.mrf.mxu0 }
 0x186   : > { %v6687_v42 = vpop.f32.mrf.mxu0 }
 0x188   : > { %v960_v44 = vpop.f32.mrf.mxu0 }
 0x189   : > { %v1313_v44 = vrot.slane %v6671_v18, %v6693_v51 }
 0x18a   : > { %v6689_v46 = vpop.f32.mrf.mxu0  ;;  %1154 = vmatmul.mubr.bf16.gmra.mxu0 %v6049_v43 }
 0x18c   : > { %v965_v47 = vpop.f32.mrf.mxu0 }
 0x18e   : > { %v6691_v49 = vpop.f32.mrf.mxu0 }
 0x190   : > { %v968_v50 = vpop.f32.mrf.mxu0 }
 0x191   : > { %v1469_v50 = vrot.slane %v6669_v16, %v6695_v52 }
 0x192   : > { %v6709_v59 = vpop.f32.mrf.mxu0 }
 0x194   : > { %v973_v60 = vpop.f32.mrf.mxu0 }
 0x196   : > { %v6727_v7 = vpop.f32.mrf.mxu0 }
 0x198   : > { %v976_v20 = vpop.f32.mrf.mxu0 }
 0x199   : > { %v7103_v20 = vpop.f32.mrf.mxu1 }
 0x19a   : > { %v6761_v33 = vpop.f32.mrf.mxu0  ;;  %10361 = vst [vmem:[#allocation32_spill] sm:$0xff] %v7103_v20 }
 0x19c   : > { %v981_v47 = vpop.f32.mrf.mxu0 }
 0x19e   : > { %v6795_v5 = vpop.f32.mrf.mxu0 }
 0x19f   : > { %10351 = vst [vmem:[#allocation22_spill] sm:$0xff] %v6795_v5 }
 0x1a0   : > { %v984_v29 = vpop.f32.mrf.mxu0 }
 0x1a2   : > { %v6829_v41 = vpop.f32.mrf.mxu0 }
 0x1a3   : > { %10352 = vst [vmem:[#allocation23_spill] sm:$0xff] %v6829_v41 }
 0x1a4   : > { %v989_v3 = vpop.f32.mrf.mxu0 }
 0x1a6   : > { %v6863_v47 = vpop.f32.mrf.mxu0 }
 0x1a7   : > { %10353 = vst [vmem:[#allocation24_spill] sm:$0xff] %v6863_v47 }
 0x1a8   : > { %v992_v26 = vpop.f32.mrf.mxu0 }
 0x1aa   : > { %v6897_v29 = vpop.f32.mrf.mxu0 }
 0x1ab   : > { %10354 = vst [vmem:[#allocation25_spill] sm:$0xff] %v6897_v29 }
 0x1ac   : > { %v997_v13 = vpop.f32.mrf.mxu0 }
 0x1ae   : > { %v6931_v3 = vpop.f32.mrf.mxu0 }
 0x1af   : > { %10355 = vst [vmem:[#allocation26_spill] sm:$0xff] %v6931_v3 }
 0x1b0   : > { %v1000_v0 = vpop.f32.mrf.mxu0 }
 0x1b2   : > { %v6965_v26 = vpop.f32.mrf.mxu0 }
 0x1b3   : > { %10356 = vst [vmem:[#allocation27_spill] sm:$0xff] %v6965_v26 }
 0x1b4   : > { %v1005_v45 = vpop.f32.mrf.mxu0 }
 0x1b6   : > { %v6999_v43 = vpop.f32.mrf.mxu0 }
 0x1b7   : > { %10357 = vst [vmem:[#allocation28_spill] sm:$0xff] %v6999_v43 }
 0x1b8   : > { %v1008_v32 = vpop.f32.mrf.mxu0 }
 0x1ba   : > { %v7033_v0 = vpop.f32.mrf.mxu0 }
 0x1bb   : > { %10358 = vst [vmem:[#allocation29_spill] sm:$0xff] %v7033_v0 }
 0x1bc   : > { %v1013_v17 = vpop.f32.mrf.mxu0 }
 0x1bd   : > { %v1165_v17 = vpop.f32.mrf.mxu1 }
 0x1be   : > { %v7067_v45 = vpop.f32.mrf.mxu0 }
 0x1bf   : > { %10359 = vst [vmem:[#allocation30_spill] sm:$0xff] %v7067_v45  ;;  %v7181_v38 = vpop.f32.mrf.mxu1 }
 0x1c0   : > { %v1016_v60 = vpop.f32.mrf.mxu0  ;;  %10364 = vst [vmem:[#allocation35_spill] sm:$0xff] %v7181_v38 }
 0x1c1   : > { %v1168_v60 = vpop.f32.mrf.mxu1 }
 0x1c2   : > { %v7101_v32 = vpop.f32.mrf.mxu0 }
 0x1c3   : > { %10360 = vst [vmem:[#allocation31_spill] sm:$0xff] %v7101_v32 }
 0x1c4   : > { %v1021_v25 = vpop.f32.mrf.mxu0 }
 0x1c6   : > { %v7137_v19 = vpop.f32.mrf.mxu0 }
 0x1c7   : > { %10362 = vst [vmem:[#allocation33_spill] sm:$0xff] %v7137_v19 }
 0x1c8   : > { %v1024_v11 = vpop.f32.mrf.mxu0 }
 0x1ca   : > { %v7171_v1 = vpop.f32.mrf.mxu0 }
 0x1cb   : > { %10363 = vst [vmem:[#allocation34_spill] sm:$0xff] %v7171_v1 }
 0x1cc   : > { %v1029_v63 = vpop.f32.mrf.mxu0 }
 0x1ce   : > { %v7207_v13 = vpop.f32.mrf.mxu0 }
 0x1cf   : > { %10365 = vst [vmem:[#allocation36_spill] sm:$0xff] %v7207_v13 }
 0x1d0   : > { %v1032_v2 = vpop.f32.mrf.mxu0 }
 0x1d2   : > { %v1035_v60 = vpop.f32.mrf.mxu0 }
 0x1d3   : > { %v1418_v25 = vmul.f32 %v1293_v61, %v1035_v60  ;;  %v1419_v63 = vmul.f32 %v1297_v8, %v1035_v60  ;;  %v1420_v17 = vmul.f32 %v1301_v21, %v1035_v60  ;;  %v1421_v2 = vmul.f32 %v1305_v35, %v1035_v60 }
 0x1d4   : > { %v1422_v14 = vmul.f32 %v1309_v48, %v1035_v60  ;;  %v1423_v61 = vmul.f32 %v1313_v44, %v1035_v60  ;;  %v1424_v8 = vmul.f32 %v1317_v15, %v1035_v60  ;;  %v1425_v21 = vmul.f32 %v1321_v27, %v1035_v60  ;;  %v1037_v11 = vpop.f32.mrf.mxu0 }
 0x1d5   : > { %v10368_v35 = vrot.slane %v6675_v24, %v6695_v52 }
 0x1d6   : > { %v1038_v60 = vpop.f32.mrf.mxu0 }
 0x1d7   : > { %v1578_v48 = vmul.f32 %v1453_v62, %v1038_v60  ;;  %v1579_v44 = vmul.f32 %v1457_v9, %v1038_v60  ;;  %v1580_v15 = vmul.f32 %v1461_v23, %v1038_v60  ;;  %v1581_v27 = vmul.f32 %v1465_v37, %v1038_v60 }
 0x1d8   : > { %v1582_v11 = vmul.f32 %v1469_v50, %v1038_v60  ;;  %v1583_v62 = vmul.f32 %v10366_v31, %v1038_v60  ;;  %v1584_v9 = vmul.f32 %v10367_v39, %v1038_v60  ;;  %v1585_v23 = vmul.f32 %v10368_v35, %v1038_v60  ;;  %v1040_v13 = vpop.f32.mrf.mxu0 }
 0x1d9   : > { %v1610_v1 = vadd.f32 %v1578_v48, %v1418_v25  ;;  %v1611_v19 = vadd.f32 %v1579_v44, %v1419_v63  ;;  %v1612_v37 = vadd.f32 %v1580_v15, %v1420_v17  ;;  %v1613_v32 = vadd.f32 %v1581_v27, %v1421_v2 }
 0x1da   : > { %v1614_v45 = vadd.f32 %v1582_v11, %v1422_v14  ;;  %v1615_v0 = vadd.f32 %v1583_v62, %v1423_v61  ;;  %v1616_v50 = vadd.f32 %v1584_v9, %v1424_v8  ;;  %v1617_v43 = vadd.f32 %v1585_v23, %v1425_v21  ;;  %v1043_v26 = vpop.f32.mrf.mxu0 }
 0x1db   : > { %v10369_v31 = vrot.slane %v6661_v4, %v6697_v53  ;;  %v10370_v39 = vrot.slane %v6663_v6, %v6697_v53  ;;  %v10371_v13 = vrot.slane %v6665_v10, %v6697_v53  ;;  %v10372_v17 = vrot.slane %v6667_v12, %v6697_v53 }
 0x1dc   : > { %v10373_v63 = vrot.slane %v6669_v16, %v6697_v53  ;;  %v10374_v61 = vrot.slane %v6671_v18, %v6697_v53  ;;  %v10375_v21 = vrot.slane %v6673_v22, %v6697_v53  ;;  %v10376_v48 = vrot.slane %v6675_v24, %v6697_v53  ;;  %v1045_v15 = vpop.f32.mrf.mxu0 }
 0x1dd   : > { %v1770_v38 = vmul.f32 %v10369_v31, %v1043_v26  ;;  %v1771_v20 = vmul.f32 %v10370_v39, %v1043_v26  ;;  %v1772_v25 = vmul.f32 %v10371_v13, %v1043_v26  ;;  %v1773_v14 = vmul.f32 %v10372_v17, %v1043_v26 }
 0x1de   : > { %v1774_v2 = vmul.f32 %v10373_v63, %v1043_v26  ;;  %v1775_v8 = vmul.f32 %v10374_v61, %v1043_v26  ;;  %v1776_v35 = vmul.f32 %v10375_v21, %v1043_v26  ;;  %v1777_v44 = vmul.f32 %v10376_v48, %v1043_v26  ;;  %v1046_v13 = vpop.f32.mrf.mxu0 }
 0x1df   : > { %v1802_v27 = vadd.f32 %v1770_v38, %v1610_v1  ;;  %v1803_v11 = vadd.f32 %v1771_v20, %v1611_v19  ;;  %v1804_v60 = vadd.f32 %v1772_v25, %v1612_v37  ;;  %v1805_v62 = vadd.f32 %v1773_v14, %v1613_v32 }
 0x1e0   : > { %v1806_v9 = vadd.f32 %v1774_v2, %v1614_v45  ;;  %v1807_v23 = vadd.f32 %v1775_v8, %v1615_v0  ;;  %v1808_v31 = vadd.f32 %v1776_v35, %v1616_v50  ;;  %v1809_v39 = vadd.f32 %v1777_v44, %v1617_v43  ;;  %v1048_v14 = vpop.f32.mrf.mxu0  ;;  %v7353_v44 = vpop.f32.mrf.mxu1 }
 0x1e1   : > { %v10377_v17 = vrot.slane %v6661_v4, %v6699_v54  ;;  %v10378_v61 = vrot.slane %v6663_v6, %v6699_v54  ;;  %v10379_v26 = vrot.slane %v6665_v10, %v6699_v54  ;;  %v10380_v19 = vrot.slane %v6667_v12, %v6699_v54  ;;  %10385 = vst [vmem:[#allocation37_spill] sm:$0xff] %v7353_v44 }
 0x1e2   : > { %v10381_v43 = vrot.slane %v6669_v16, %v6699_v54  ;;  %v10382_v0 = vrot.slane %v6671_v18, %v6699_v54  ;;  %v10383_v32 = vrot.slane %v6673_v22, %v6699_v54  ;;  %v10384_v50 = vrot.slane %v6675_v24, %v6699_v54 }
 0x1e3   : > { %v1962_v63 = vmul.f32 %v10377_v17, %v1046_v13  ;;  %v1963_v21 = vmul.f32 %v10378_v61, %v1046_v13  ;;  %v1964_v1 = vmul.f32 %v10379_v26, %v1046_v13  ;;  %v1965_v38 = vmul.f32 %v10380_v19, %v1046_v13  ;;  %v1051_v19 = vpop.f32.mrf.mxu0 }
 0x1e4   : > { %v1966_v20 = vmul.f32 %v10381_v43, %v1046_v13  ;;  %v1967_v45 = vmul.f32 %v10382_v0, %v1046_v13  ;;  %v1968_v37 = vmul.f32 %v10383_v32, %v1046_v13  ;;  %v1969_v25 = vmul.f32 %v10384_v50, %v1046_v13 }
 0x1e5   : > { %v1994_v2 = vadd.f32 %v1962_v63, %v1802_v27  ;;  %v1995_v8 = vadd.f32 %v1963_v21, %v1803_v11  ;;  %v1996_v35 = vadd.f32 %v1964_v1, %v1804_v60  ;;  %v1997_v48 = vadd.f32 %v1965_v38, %v1805_v62 }
 0x1e6   : > { %v1998_v15 = vadd.f32 %v1966_v20, %v1806_v9  ;;  %v1999_v17 = vadd.f32 %v1967_v45, %v1807_v23  ;;  %v2000_v61 = vadd.f32 %v1968_v37, %v1808_v31  ;;  %v2001_v26 = vadd.f32 %v1969_v25, %v1809_v39  ;;  %v1173_v9 = vpop.f32.mrf.mxu1  ;;  %v1053_v45 = vpop.f32.mrf.mxu0 }
 0x1e7   : > { %v10386_v43 = vrot.slane %v6661_v4, %v6701_v55  ;;  %v10387_v32 = vrot.slane %v6663_v6, %v6701_v55  ;;  %v10388_v27 = vrot.slane %v6665_v10, %v6701_v55  ;;  %v10389_v60 = vrot.slane %v6667_v12, %v6701_v55 }
 0x1e8   : > { %v10390_v23 = vrot.slane %v6669_v16, %v6701_v55  ;;  %v10391_v39 = vrot.slane %v6671_v18, %v6701_v55  ;;  %v10392_v21 = vrot.slane %v6673_v22, %v6701_v55  ;;  %v10393_v38 = vrot.slane %v6675_v24, %v6701_v55  ;;  %v1054_v9 = vpop.f32.mrf.mxu0 }
 0x1e9   : > { %v2154_v0 = vmul.f32 %v10386_v43, %v1051_v19  ;;  %v2155_v13 = vmul.f32 %v10387_v32, %v1051_v19  ;;  %v2156_v11 = vmul.f32 %v10388_v27, %v1051_v19  ;;  %v2157_v62 = vmul.f32 %v10389_v60, %v1051_v19 }
 0x1ea   : > { %v2158_v31 = vmul.f32 %v10390_v23, %v1051_v19  ;;  %v2159_v63 = vmul.f32 %v10391_v39, %v1051_v19  ;;  %v2160_v1 = vmul.f32 %v10392_v21, %v1051_v19  ;;  %v2161_v20 = vmul.f32 %v10393_v38, %v1051_v19 }
 0x1eb   : > { %v2186_v37 = vadd.f32 %v2154_v0, %v1994_v2  ;;  %v2187_v50 = vadd.f32 %v2155_v13, %v1995_v8  ;;  %v2188_v25 = vadd.f32 %v2156_v11, %v1996_v35  ;;  %v2189_v14 = vadd.f32 %v2157_v62, %v1997_v48  ;;  %v1056_v62 = vpop.f32.mrf.mxu0 }
 0x1ec   : > { %v2190_v43 = vadd.f32 %v2158_v31, %v1998_v15  ;;  %v2191_v32 = vadd.f32 %v2159_v63, %v1999_v17  ;;  %v2192_v27 = vadd.f32 %v2160_v1, %v2000_v61  ;;  %v2193_v60 = vadd.f32 %v2161_v20, %v2001_v26  ;;  %v7403_v20 = vpop.f32.mrf.mxu1 }
 0x1ed   : > { %v10394_v23 = vrot.slane %v6661_v4, %v6703_v56  ;;  %v10395_v21 = vrot.slane %v6663_v6, %v6703_v56  ;;  %v10396_v19 = vrot.slane %v6665_v10, %v6703_v56  ;;  %v10397_v8 = vrot.slane %v6667_v12, %v6703_v56  ;;  %10402 = vst [vmem:[#allocation38_spill] sm:$0xff] %v7403_v20 }
 0x1ee   : > { %v10398_v48 = vrot.slane %v6669_v16, %v6703_v56  ;;  %v10399_v17 = vrot.slane %v6671_v18, %v6703_v56  ;;  %v10400_v26 = vrot.slane %v6673_v22, %v6703_v56  ;;  %v10401_v13 = vrot.slane %v6675_v24, %v6703_v56 }
 0x1ef   : > { %v2346_v39 = vmul.f32 %v10394_v23, %v1054_v9  ;;  %v2347_v44 = vmul.f32 %v10395_v21, %v1054_v9  ;;  %v2348_v2 = vmul.f32 %v10396_v19, %v1054_v9  ;;  %v2349_v35 = vmul.f32 %v10397_v8, %v1054_v9  ;;  %v1059_v8 = vpop.f32.mrf.mxu0 }
 0x1f0   : > { %v2350_v15 = vmul.f32 %v10398_v48, %v1054_v9  ;;  %v2351_v61 = vmul.f32 %v10399_v17, %v1054_v9  ;;  %v2352_v0 = vmul.f32 %v10400_v26, %v1054_v9  ;;  %v2353_v11 = vmul.f32 %v10401_v13, %v1054_v9 }
 0x1f1   : > { %v2378_v31 = vadd.f32 %v2346_v39, %v2186_v37  ;;  %v2379_v63 = vadd.f32 %v2347_v44, %v2187_v50  ;;  %v2380_v1 = vadd.f32 %v2348_v2, %v2188_v25  ;;  %v2381_v38 = vadd.f32 %v2349_v35, %v2189_v14  ;;  %v1176_v14 = vpop.f32.mrf.mxu1 }
 0x1f2   : > { %v2382_v45 = vadd.f32 %v2350_v15, %v2190_v43  ;;  %v2383_v23 = vadd.f32 %v2351_v61, %v2191_v32  ;;  %v2384_v21 = vadd.f32 %v2352_v0, %v2192_v27  ;;  %v2385_v19 = vadd.f32 %v2353_v11, %v2193_v60  ;;  %v1061_v61 = vpop.f32.mrf.mxu0 }
 0x1f3   : > { %v10403_v48 = vrot.slane %v6661_v4, %v6705_v57  ;;  %v10404_v26 = vrot.slane %v6663_v6, %v6705_v57  ;;  %v10405_v44 = vrot.slane %v6665_v10, %v6705_v57  ;;  %v10406_v50 = vrot.slane %v6667_v12, %v6705_v57 }
 0x1f4   : > { %v10407_v43 = vrot.slane %v6669_v16, %v6705_v57  ;;  %v10408_v27 = vrot.slane %v6671_v18, %v6705_v57  ;;  %v10409_v39 = vrot.slane %v6673_v22, %v6705_v57  ;;  %v10410_v35 = vrot.slane %v6675_v24, %v6705_v57 }
 0x1f5   : > { %v2538_v17 = vmul.f32 %v10403_v48, %v1059_v8  ;;  %v2539_v9 = vmul.f32 %v10404_v26, %v1059_v8  ;;  %v2540_v37 = vmul.f32 %v10405_v44, %v1059_v8  ;;  %v2541_v25 = vmul.f32 %v10406_v50, %v1059_v8  ;;  %v7429_v48 = vpop.f32.mrf.mxu1 }
 0x1f6   : > { %v2542_v32 = vmul.f32 %v10407_v43, %v1059_v8  ;;  %v2543_v60 = vmul.f32 %v10408_v27, %v1059_v8  ;;  %v2544_v2 = vmul.f32 %v10409_v39, %v1059_v8  ;;  %v2545_v15 = vmul.f32 %v10410_v35, %v1059_v8  ;;  %10411 = vst [vmem:[#allocation39_spill] sm:$0xff] %v7429_v48  ;;  %v1062_v43 = vpop.f32.mrf.mxu0 }
 0x1f7   : > { %v2570_v0 = vadd.f32 %v2538_v17, %v2378_v31  ;;  %v2571_v13 = vadd.f32 %v2539_v9, %v2379_v63  ;;  %v2572_v11 = vadd.f32 %v2540_v37, %v2380_v1  ;;  %v2573_v62 = vadd.f32 %v2541_v25, %v2381_v38 }
 0x1f8   : > { %v2574_v26 = vadd.f32 %v2542_v32, %v2382_v45  ;;  %v2575_v44 = vadd.f32 %v2543_v60, %v2383_v23  ;;  %v2576_v50 = vadd.f32 %v2544_v2, %v2384_v21  ;;  %v2577_v14 = vadd.f32 %v2545_v15, %v2385_v19  ;;  %v1181_v45 = vpop.f32.mrf.mxu1  ;;  %v1064_v9 = vpop.f32.mrf.mxu0 }
 0x1f9   : > { %v10412_v27 = vrot.slane %v6661_v4, %v6707_v58  ;;  %v10413_v20 = vrot.slane %v6663_v6, %v6707_v58  ;;  %v10414_v31 = vrot.slane %v6665_v10, %v6707_v58  ;;  %v10415_v1 = vrot.slane %v6667_v12, %v6707_v58 }
 0x1fa   : > { %v10416_v23 = vrot.slane %v6669_v16, %v6707_v58  ;;  %v10417_v4 = vrot.slane %v6671_v18, %v6707_v58  ;;  %v10418_v6 = vrot.slane %v6673_v22, %v6707_v58  ;;  %v10419_v10 = vrot.slane %v6675_v24, %v6707_v58  ;;  %v7463_v32 = vpop.f32.mrf.mxu1  ;;  %v7473_v24 = vpop.f32.mrf.mxu0 }
 0x1fb   : > { %v2730_v39 = vmul.f32 %v10412_v27, %v1062_v43  ;;  %v2731_v8 = vmul.f32 %v10413_v20, %v1062_v43  ;;  %v2732_v63 = vmul.f32 %v10414_v31, %v1062_v43  ;;  %v2733_v38 = vmul.f32 %v10415_v1, %v1062_v43  ;;  %10420 = vst [vmem:[#allocation40_spill] sm:$0xff] %v7463_v32 }
 0x1fc   : > { %v2734_v21 = vmul.f32 %v10416_v23, %v1062_v43  ;;  %v2735_v19 = vmul.f32 %v10417_v4, %v1062_v43  ;;  %v2736_v20 = vmul.f32 %v10418_v6, %v1062_v43  ;;  %v2737_v17 = vmul.f32 %v10419_v10, %v1062_v43 }
 0x1fd   : > { %v7455_v12 = vadd.f32 %v2730_v39, %v2570_v0  ;;  %v7457_v37 = vadd.f32 %v2731_v8, %v2571_v13  ;;  %v7459_v25 = vadd.f32 %v2732_v63, %v2572_v11  ;;  %v7461_v16 = vadd.f32 %v2733_v38, %v2573_v62  ;;  %v1184_v13 = vpop.f32.mrf.mxu1 }
 0x1fe   : > { %v7465_v18 = vadd.f32 %v2734_v21, %v2574_v26  ;;  %v7467_v60 = vadd.f32 %v2735_v19, %v2575_v44  ;;  %v7469_v22 = vadd.f32 %v2736_v20, %v2576_v50  ;;  %v7471_v2 = vadd.f32 %v2737_v17, %v2577_v14  ;;  %v1069_v50 = vpop.f32.mrf.mxu0 }
 0x1ff   : > { %v2794_v35 = vrot.slane %v7455_v12, 4  ;;  %v2800_v15 = vrot.slane %v7457_v37, 4  ;;  %v2806_v61 = vrot.slane %v7459_v25, 4  ;;  %v2812_v0 = vrot.slane %v7461_v16, 4  ;;  %v7487_v8 = vpop.f32.mrf.mxu1 }
 0x200   : > { %v2818_v11 = vrot.slane %v7465_v18, 4  ;;  %v2824_v62 = vrot.slane %v7467_v60, 4  ;;  %v2830_v26 = vrot.slane %v7469_v22, 4  ;;  %v2836_v44 = vrot.slane %v7471_v2, 4  ;;  %10421 = vst [vmem:[#allocation41_spill] sm:$0xff] %v7487_v8  ;;  %v7493_v45 = vpop.f32.mrf.mxu0 }
 0x201   : > { %v2795_v14 = vmax.f32 %v7455_v12, %v2794_v35  ;;  %v2801_v43 = vmax.f32 %v7457_v37, %v2800_v15  ;;  %v2807_v27 = vmax.f32 %v7459_v25, %v2806_v61  ;;  %v2813_v39 = vmax.f32 %v7461_v16, %v2812_v0  ;;  %v1189_v6 = vpop.f32.mrf.mxu1 }
 0x202   : > { %v2819_v31 = vmax.f32 %v7465_v18, %v2818_v11  ;;  %v2825_v63 = vmax.f32 %v7467_v60, %v2824_v62  ;;  %v2831_v1 = vmax.f32 %v7469_v22, %v2830_v26  ;;  %v2837_v38 = vmax.f32 %v7471_v2, %v2836_v44  ;;  %v1072_v35 = vpop.f32.mrf.mxu0 }
 0x203   : > { %v2796_v23 = vrot.slane %v2795_v14, 2  ;;  %v2802_v21 = vrot.slane %v2801_v43, 2  ;;  %v2808_v4 = vrot.slane %v2807_v27, 2  ;;  %v2814_v19 = vrot.slane %v2813_v39, 2 }
 0x204   : > { %v2820_v20 = vrot.slane %v2819_v31, 2  ;;  %v2826_v10 = vrot.slane %v2825_v63, 2  ;;  %v2832_v17 = vrot.slane %v2831_v1, 2  ;;  %v2838_v9 = vrot.slane %v2837_v38, 2  ;;  %v7495_v50 = vpop.f32.mrf.mxu0 }
 0x205   : > { %v2797_v15 = vmax.f32 %v2795_v14, %v2796_v23  ;;  %v2803_v61 = vmax.f32 %v2801_v43, %v2802_v21  ;;  %v2809_v0 = vmax.f32 %v2807_v27, %v2808_v4  ;;  %v2815_v13 = vmax.f32 %v2813_v39, %v2814_v19 }
 0x206   : > { %v2821_v11 = vmax.f32 %v2819_v31, %v2820_v20  ;;  %v2827_v62 = vmax.f32 %v2825_v63, %v2826_v10  ;;  %v2833_v26 = vmax.f32 %v2831_v1, %v2832_v17  ;;  %v2839_v44 = vmax.f32 %v2837_v38, %v2838_v9  ;;  %v1077_v5 = vpop.f32.mrf.mxu0  ;;  %v7503_v20 = vpop.f32.mrf.mxu1 }
 0x207   : > { %v2798_v8 = vrot.slane %v2797_v15, 1  ;;  %v2804_v32 = vrot.slane %v2803_v61, 1  ;;  %v2810_v48 = vrot.slane %v2809_v0, 1  ;;  %v2816_v3 = vrot.slane %v2815_v13, 1  ;;  %10422 = vst [vmem:[#allocation42_spill] sm:$0xff] %v7503_v20 }
 0x208   : > { %v2822_v6 = vrot.slane %v2821_v11, 1  ;;  %v2828_v29 = vrot.slane %v2827_v62, 1  ;;  %v2834_v47 = vrot.slane %v2833_v26, 1  ;;  %v2840_v41 = vrot.slane %v2839_v44, 1  ;;  %v7497_v38 = vpop.f32.mrf.mxu0 }
 0x209   : > { %v2799_v35 = vmax.f32 %v2797_v15, %v2798_v8  ;;  %v2805_v14 = vmax.f32 %v2803_v61, %v2804_v32  ;;  %v2811_v43 = vmax.f32 %v2809_v0, %v2810_v48  ;;  %v2817_v27 = vmax.f32 %v2815_v13, %v2816_v3 }
 0x20a   : > { %v2823_v39 = vmax.f32 %v2821_v11, %v2822_v6  ;;  %v2829_v31 = vmax.f32 %v2827_v62, %v2828_v29  ;;  %v2835_v63 = vmax.f32 %v2833_v26, %v2834_v47  ;;  %v2841_v1 = vmax.f32 %v2839_v44, %v2840_v41  ;;  %v1080_v47 = vpop.f32.mrf.mxu0 }
 0x20b   : > { %v2986_v23 = vsub.f32 %v7455_v12, %v2799_v35  ;;  %v2987_v21 = vsub.f32 %v7457_v37, %v2805_v14  ;;  %v2988_v4 = vsub.f32 %v7459_v25, %v2811_v43  ;;  %v2989_v19 = vsub.f32 %v7461_v16, %v2817_v27  ;;  %v1192_v16 = vpop.f32.mrf.mxu1 }
 0x20c   : > { %v2990_v5 = vsub.f32 %v7465_v18, %v2823_v39  ;;  %v2991_v3 = vsub.f32 %v7467_v60, %v2829_v31  ;;  %v2992_v29 = vsub.f32 %v7469_v22, %v2835_v63  ;;  %v2993_v41 = vsub.f32 %v7471_v2, %v2841_v1  ;;  %v7517_v22 = vpop.f32.mrf.mxu0 }
 0x20d   : > { %v3018_v48 = vmul.f32 1.442695, %v2986_v23  ;;  %v3020_v32 = vmul.f32 1.442695, %v2987_v21  ;;  %v3022_v12 = vmul.f32 1.442695, %v2988_v4  ;;  %v10423_v37 = vrot.slane %v6677_v28, %v6693_v51 }
 0x20e   : > { %v3024_v8 = vmul.f32 1.442695, %v2989_v19  ;;  %v3026_v10 = vmul.f32 1.442695, %v2990_v5  ;;  %v3028_v17 = vmul.f32 1.442695, %v2991_v3  ;;  %v10424_v18 = vrot.slane %v6679_v30, %v6693_v51  ;;  %v1085_v6 = vpop.f32.mrf.mxu0 }
 0x20f   : > { %v1426_v25 = vmul.f32 %v10423_v37, %v7473_v24  ;;  %6127 = vpow2.f32 %v3018_v48  ;;  %v3030_v2 = vmul.f32 1.442695, %v2992_v29  ;;  %v3032_v9 = vmul.f32 1.442695, %v2993_v41 }
 0x210   : > { %v1427_v60 = vmul.f32 %v10424_v18, %v7473_v24  ;;  %v10425_v15 = vrot.slane %v6681_v34, %v6693_v51  ;;  %6129 = vpow2.f32 %v3020_v32  ;;  %v10426_v0 = vrot.slane %v6683_v36, %v6693_v51  ;;  %v7559_v19 = vpop.f32.mrf.mxu0 }
 0x211   : > { %v10427_v11 = vrot.slane %v6685_v40, %v6693_v51  ;;  %v10428_v26 = vrot.slane %v6687_v42, %v6693_v51  ;;  %6131 = vpow2.f32 %v3022_v12  ;;  %v10429_v35 = vrot.slane %v6689_v46, %v6693_v51 }
 0x212   : > { %v1428_v61 = vmul.f32 %v10425_v15, %v7473_v24  ;;  %v1429_v13 = vmul.f32 %v10426_v0, %v7473_v24  ;;  %v10430_v43 = vrot.slane %v6691_v49, %v6693_v51  ;;  %v10431_v39 = vrot.slane %v6677_v28, %v6695_v52 }
 0x213   : > { %v1430_v62 = vmul.f32 %v10427_v11, %v7473_v24  ;;  %v1431_v44 = vmul.f32 %v10428_v26, %v7473_v24  ;;  %v1432_v14 = vmul.f32 %v10429_v35, %v7473_v24  ;;  %6133 = vpow2.f32 %v3024_v8  ;;  %v1088_v8 = vpop.f32.mrf.mxu0 }
 0x214   : > { %v1433_v27 = vmul.f32 %v10430_v43, %v7473_v24  ;;  %v1586_v31 = vmul.f32 %v10431_v39, %v7493_v45  ;;  %v10432_v63 = vrot.slane %v6679_v30, %v6695_v52  ;;  %v10433_v23 = vrot.slane %v6681_v34, %v6695_v52 }
 0x215   : > { %v10434_v24 = vrot.slane %v6683_v36, %v6695_v52  ;;  %6135 = vpow2.f32 %v3026_v10  ;;  %v10435_v5 = vrot.slane %v6685_v40, %v6695_v52  ;;  %v10436_v29 = vrot.slane %v6687_v42, %v6695_v52  ;;  %v7577_v6 = vpop.f32.mrf.mxu0 }
 0x216   : > { %v1587_v1 = vmul.f32 %v10432_v63, %v7493_v45  ;;  %v1588_v21 = vmul.f32 %v10433_v23, %v7493_v45  ;;  %v10437_v47 = vrot.slane %v6689_v46, %v6695_v52  ;;  %6137 = vpow2.f32 %v3028_v17 }
 0x217   : > { %v1589_v4 = vmul.f32 %v10434_v24, %v7493_v45  ;;  %v1590_v3 = vmul.f32 %v10435_v5, %v7493_v45  ;;  %v1591_v41 = vmul.f32 %v10436_v29, %v7493_v45  ;;  %v10438_v32 = vrot.slane %v6691_v49, %v6695_v52  ;;  %v1093_v63 = vpop.f32.mrf.mxu0 }
 0x218   : > { %v1592_v48 = vmul.f32 %v10437_v47, %v7493_v45  ;;  %v1618_v37 = vadd.f32 %v1586_v31, %v1426_v25  ;;  %v1619_v16 = vadd.f32 %v1587_v1, %v1427_v60  ;;  %6139 = vpow2.f32 %v3030_v2  ;;  %v7613_v47 = vpop.f32.mrf.mxu1 }
 0x219   : > { %v1593_v12 = vmul.f32 %v10438_v32, %v7493_v45  ;;  %v1620_v10 = vadd.f32 %v1588_v21, %v1428_v61  ;;  %v1621_v18 = vadd.f32 %v1589_v4, %v1429_v13  ;;  %v1622_v15 = vadd.f32 %v1590_v3, %v1430_v62  ;;  %10447 = vst [vmem:[#allocation43_spill] sm:$0xff] %v7613_v47 }
 0x21a   : > { %6141 = vpow2.f32 %v3032_v9  ;;  %v1623_v0 = vadd.f32 %v1591_v41, %v1431_v44  ;;  %v1624_v11 = vadd.f32 %v1592_v48, %v1432_v14  ;;  %v10439_v17 = vrot.slane %v6677_v28, %v6697_v53  ;;  %v7611_v41 = vpop.f32.mrf.mxu0 }
 0x21b   : > { %v1625_v26 = vadd.f32 %v1593_v12, %v1433_v27  ;;  %v10440_v45 = vrot.slane %v6679_v30, %v6697_v53  ;;  %v10441_v60 = vrot.slane %v6681_v34, %v6697_v53  ;;  %v10442_v9 = vrot.slane %v6683_v36, %v6697_v53 }
 0x21c   : > { %v1778_v35 = vmul.f32 %v10439_v17, %v7495_v50  ;;  %v10443_v13 = vrot.slane %v6685_v40, %v6697_v53  ;;  %v10444_v44 = vrot.slane %v6687_v42, %v6697_v53  ;;  %v10445_v43 = vrot.slane %v6689_v46, %v6697_v53 }
 0x21d   : > { %v1779_v25 = vmul.f32 %v10440_v45, %v7495_v50  ;;  %v1780_v2 = vmul.f32 %v10441_v60, %v7495_v50  ;;  %v1781_v61 = vmul.f32 %v10442_v9, %v7495_v50  ;;  %v10446_v39 = vrot.slane %v6691_v49, %v6697_v53  ;;  %v1096_v60 = vpop.f32.mrf.mxu0 }
 0x21e   : > { %v1782_v62 = vmul.f32 %v10443_v13, %v7495_v50  ;;  %v1783_v14 = vmul.f32 %v10444_v44, %v7495_v50  ;;  %v1784_v27 = vmul.f32 %v10445_v43, %v7495_v50  ;;  %v1810_v1 = vadd.f32 %v1778_v35, %v1618_v37 }
 0x21f   : > { %v1785_v31 = vmul.f32 %v10446_v39, %v7495_v50  ;;  %v1811_v23 = vadd.f32 %v1779_v25, %v1619_v16  ;;  %v1812_v21 = vadd.f32 %v1780_v2, %v1620_v10  ;;  %v1813_v24 = vadd.f32 %v1781_v61, %v1621_v18  ;;  %v7631_v18 = vpop.eup %6127  ;;  %v1197_v2 = vpop.f32.mrf.mxu1 }
 0x220   : > { %v1814_v4 = vadd.f32 %v1782_v62, %v1622_v15  ;;  %v1815_v5 = vadd.f32 %v1783_v14, %v1623_v0  ;;  %v1816_v3 = vadd.f32 %v1784_v27, %v1624_v11  ;;  %v10448_v48 = vrot.slane %v6677_v28, %v6699_v54  ;;  %10452 = vst [vmem:[#allocation44_spill] sm:$0xff] %v7631_v18  ;;  %v7649_v9 = vpop.eup %6129 }
 0x221   : > { %v1817_v29 = vadd.f32 %v1785_v31, %v1625_v26  ;;  %v10449_v50 = vrot.slane %v6679_v30, %v6699_v54  ;;  %v10450_v37 = vrot.slane %v6681_v34, %v6699_v54  ;;  %v10451_v8 = vrot.slane %v6683_v36, %v6699_v54  ;;  %10457 = vst [vmem:[#allocation45_spill] sm:$0xff] %v7649_v9  ;;  %v7658_v14 = vpop.eup %6131  ;;  %v7667_v31 = vpop.f32.mrf.mxu0 }
 0x222   : > { %v1970_v32 = vmul.f32 %v10448_v48, %v7497_v38  ;;  %v10453_v15 = vrot.slane %v6685_v40, %v6699_v54  ;;  %v10454_v11 = vrot.slane %v6687_v42, %v6699_v54  ;;  %v10455_v17 = vrot.slane %v6689_v46, %v6699_v54  ;;  %10458 = vst [vmem:[#allocation46_spill] sm:$0xff] %v7658_v14  ;;  %v7669_v63 = vpop.eup %6133 }
 0x223   : > { %v1971_v12 = vmul.f32 %v10449_v50, %v7497_v38  ;;  %v1972_v16 = vmul.f32 %v10450_v37, %v7497_v38  ;;  %v1973_v10 = vmul.f32 %v10451_v8, %v7497_v38  ;;  %v10456_v45 = vrot.slane %v6691_v49, %v6699_v54  ;;  %10459 = vst [vmem:[#allocation47_spill] sm:$0xff] %v7669_v63 }
 0x224   : > { %v1974_v0 = vmul.f32 %v10453_v15, %v7497_v38  ;;  %v1975_v26 = vmul.f32 %v10454_v11, %v7497_v38  ;;  %v1976_v35 = vmul.f32 %v10455_v17, %v7497_v38  ;;  %v3082_v61 = vrot.slane %v7631_v18, 4 }
 0x225   : > { %v1977_v25 = vmul.f32 %v10456_v45, %v7497_v38  ;;  %v7652_v13 = vadd.f32 %v1970_v32, %v1810_v1  ;;  %v7654_v62 = vadd.f32 %v1971_v12, %v1811_v23  ;;  %v7656_v44 = vadd.f32 %v1972_v16, %v1812_v21  ;;  %v7677_v32 = vpop.eup %6135 }
 0x226   : > { %v3088_v43 = vrot.slane %v7649_v9, 4  ;;  %v7661_v27 = vadd.f32 %v1973_v10, %v1813_v24  ;;  %v7663_v39 = vadd.f32 %v1974_v0, %v1814_v4  ;;  %v7665_v38 = vadd.f32 %v1975_v26, %v1815_v5  ;;  %10460 = vst [vmem:[#allocation48_spill] sm:$0xff] %v7677_v32  ;;  %v7693_v37 = vpop.eup %6137 }
 0x227   : > { %v3083_v1 = vadd.f32 %v7631_v18, %v3082_v61  ;;  %v3094_v23 = vrot.slane %v7658_v14, 4  ;;  %v7673_v21 = vadd.f32 %v1976_v35, %v1816_v3  ;;  %v7675_v48 = vadd.f32 %v1977_v25, %v1817_v29  ;;  %v1101_v29 = vpop.f32.mrf.mxu0  ;;  %10463 = vst [vmem:[#allocation49_spill] sm:$0xff] %v7693_v37  ;;  %v7703_v11 = vpop.eup %6139 }
 0x228   : > { %v3089_v24 = vadd.f32 %v7649_v9, %v3088_v43  ;;  %v3100_v4 = vrot.slane %v7669_v63, 4  ;;  %v10461_v5 = vrot.slane %v6677_v28, %v6701_v55  ;;  %v10462_v12 = vrot.slane %v6679_v30, %v6701_v55  ;;  %v7713_v2 = vpop.eup %6141 }
 0x229   : > { %v3084_v16 = vrot.slane %v3083_v1, 2  ;;  %v3095_v8 = vadd.f32 %v7658_v14, %v3094_v23  ;;  %v3106_v10 = vrot.slane %v7677_v32, 4  ;;  %v10464_v15 = vrot.slane %v6681_v34, %v6701_v55  ;;  %v7711_v60 = vpop.f32.mrf.mxu0 }
 0x22a   : > { %v7685_v50 = vmul.f32 %v10461_v5, %v7517_v22  ;;  %v7691_v3 = vmul.f32 %v10462_v12, %v7517_v22  ;;  %v3090_v26 = vrot.slane %v3089_v24, 2  ;;  %v3101_v17 = vadd.f32 %v7669_v63, %v3100_v4  ;;  %10466 = vst [vmem:[#allocation50_spill] sm:$0xff] %v7711_v60  ;;  %v7717_v12 = vpop.f32.mrf.mxu1 }
 0x22b   : > { %v7701_v0 = vmul.f32 %v10464_v15, %v7517_v22  ;;  %v3112_v35 = vrot.slane %v7693_v37, 4  ;;  %v10465_v45 = vrot.slane %v6683_v36, %v6701_v55  ;;  %v3085_v61 = vadd.f32 %v3084_v16, %v3083_v1  ;;  %10467 = vst [vmem:[#allocation51_spill] sm:$0xff] %v7717_v12  ;;  %v1104_v47 = vpop.f32.mrf.mxu0 }
 0x22c   : > { %v3096_v43 = vrot.slane %v3095_v8, 2  ;;  %v3107_v23 = vadd.f32 %v7677_v32, %v3106_v10  ;;  %v3118_v5 = vrot.slane %v7703_v11, 4  ;;  %v3091_v4 = vadd.f32 %v3090_v26, %v3089_v24  ;;  %v1200_v1 = vpop.f32.mrf.mxu1 }
 0x22d   : > { %v2165_v25 = vmul.f32 %v10465_v45, %v7517_v22  ;;  %v3102_v29 = vrot.slane %v3101_v17, 2  ;;  %v3113_v15 = vadd.f32 %v7693_v37, %v3112_v35  ;;  %v3124_v20 = vrot.slane %v7713_v2, 4  ;;  %v7723_v63 = vpop.f32.mrf.mxu0 }
 0x22e   : > { %v3086_v45 = vrot.slane %v3085_v61, 1  ;;  %v3097_v54 = vadd.f32 %v3096_v43, %v3095_v8  ;;  %v3108_v53 = vrot.slane %v3107_v23, 2  ;;  %v3119_v52 = vadd.f32 %v7703_v11, %v3118_v5  ;;  %10468 = vst [vmem:[#allocation52_spill] sm:$0xff] %v7723_v63 }
 0x22f   : > { %v3092_v16 = vrot.slane %v3091_v4, 1  ;;  %v3103_v60 = vadd.f32 %v3102_v29, %v3101_v17  ;;  %v3114_v10 = vrot.slane %v3113_v15, 2  ;;  %v3125_v32 = vadd.f32 %v7713_v2, %v3124_v20  ;;  %v1109_v8 = vpop.f32.mrf.mxu0 }
 0x230   : > { %v3087_v24 = vadd.f32 %v3086_v45, %v3085_v61  ;;  %v3098_v26 = vrot.slane %v3097_v54, 1  ;;  %v3109_v12 = vadd.f32 %v3108_v53, %v3107_v23  ;;  %v3120_v35 = vrot.slane %v3119_v52, 2 }
 0x231   : > { %v3093_v37 = vadd.f32 %v3092_v16, %v3091_v4  ;;  %v3104_v14 = vrot.slane %v3103_v60, 1  ;;  %v3115_v47 = vadd.f32 %v3114_v10, %v3113_v15  ;;  %v3126_v9 = vrot.slane %v3125_v32, 2  ;;  %v7725_v20 = vpop.f32.mrf.mxu0 }
 0x232   : > { %v3099_v43 = vadd.f32 %v3098_v26, %v3097_v54  ;;  %v3110_v18 = vrot.slane %v3109_v12, 1  ;;  %v3121_v5 = vadd.f32 %v3120_v35, %v3119_v52  ;;  %6143 = vrcp.f32 %v3087_v24 }
 0x233   : > { %v3105_v1 = vadd.f32 %v3104_v14, %v3103_v60  ;;  %v3116_v17 = vrot.slane %v3115_v47, 1  ;;  %v3127_v29 = vadd.f32 %v3126_v9, %v3125_v32  ;;  %6145 = vrcp.f32 %v3093_v37  ;;  %v1112_v9 = vpop.f32.mrf.mxu0 }
 0x234   : > { %v3111_v63 = vadd.f32 %v3110_v18, %v3109_v12  ;;  %v3122_v61 = vrot.slane %v3121_v5, 1  ;;  %6147 = vrcp.f32 %v3099_v43  ;;  %v10469_v53 = vrot.slane %v6685_v40, %v6701_v55 }
 0x235   : > { %v3117_v4 = vadd.f32 %v3116_v17, %v3115_v47  ;;  %v3128_v15 = vrot.slane %v3127_v29, 1  ;;  %6149 = vrcp.f32 %v3105_v1  ;;  %v10470_v52 = vrot.slane %v6687_v42, %v6701_v55  ;;  %v7747_v10 = vpop.f32.mrf.mxu0 }
 0x236   : > { %v2166_v23 = vmul.f32 %v10469_v53, %v7517_v22  ;;  %v3123_v14 = vadd.f32 %v3122_v61, %v3121_v5  ;;  %6151 = vrcp.f32 %v3111_v63  ;;  %v10471_v18 = vrot.slane %v6689_v46, %v6701_v55 }
 0x237   : > { %v2167_v54 = vmul.f32 %v10470_v52, %v7517_v22  ;;  %v10472_v37 = vrot.slane %v6691_v49, %v6701_v55  ;;  %v3129_v12 = vadd.f32 %v3128_v15, %v3127_v29  ;;  %6153 = vrcp.f32 %v3117_v4 }
 0x238   : > { %v2168_v32 = vmul.f32 %v10471_v18, %v7517_v22  ;;  %v2194_v45 = vadd.f32 %v7685_v50, %v7652_v13  ;;  %v2195_v16 = vadd.f32 %v7691_v3, %v7654_v62  ;;  %6155 = vrcp.f32 %v3123_v14  ;;  %v1117_v50 = vpop.f32.mrf.mxu0 }
 0x239   : > { %v2169_v60 = vmul.f32 %v10472_v37, %v7517_v22  ;;  %v2196_v63 = vadd.f32 %v7701_v0, %v7656_v44  ;;  %v2197_v24 = vadd.f32 %v2165_v25, %v7661_v27  ;;  %v2198_v26 = vadd.f32 %v2166_v23, %v7663_v39 }
 0x23a   : > { %6157 = vrcp.f32 %v3129_v12  ;;  %v2199_v22 = vadd.f32 %v2167_v54, %v7665_v38  ;;  %v2200_v35 = vadd.f32 %v2168_v32, %v7673_v21  ;;  %v10473_v62 = vrot.slane %v6677_v28, %v6703_v56  ;;  %v7788_v29 = vpop.f32.mrf.mxu0 }
 0x23b   : > { %v2201_v13 = vadd.f32 %v2169_v60, %v7675_v48  ;;  %v10474_v44 = vrot.slane %v6679_v30, %v6703_v56  ;;  %v10475_v39 = vrot.slane %v6681_v34, %v6703_v56  ;;  %v10476_v21 = vrot.slane %v6683_v36, %v6703_v56 }
 0x23c   : > { %v2354_v3 = vmul.f32 %v10473_v62, %v7559_v19  ;;  %v10477_v0 = vrot.slane %v6685_v40, %v6703_v56  ;;  %v10478_v47 = vrot.slane %v6687_v42, %v6703_v56  ;;  %v10479_v43 = vrot.slane %v6689_v46, %v6703_v56  ;;  %v1120_v14 = vpop.f32.mrf.mxu0 }
 0x23d   : > { %v2355_v27 = vmul.f32 %v10474_v44, %v7559_v19  ;;  %v2356_v38 = vmul.f32 %v10475_v39, %v7559_v19  ;;  %v2357_v48 = vmul.f32 %v10476_v21, %v7559_v19  ;;  %v10480_v1 = vrot.slane %v6691_v49, %v6703_v56 }
 0x23e   : > { %v2358_v25 = vmul.f32 %v10477_v0, %v7559_v19  ;;  %v2359_v8 = vmul.f32 %v10478_v47, %v7559_v19  ;;  %v2360_v5 = vmul.f32 %v10479_v43, %v7559_v19  ;;  %v2386_v61 = vadd.f32 %v2354_v3, %v2194_v45  ;;  %v7824_v44 = vpop.f32.mrf.mxu0 }
 0x23f   : > { %v2361_v17 = vmul.f32 %v10480_v1, %v7559_v19  ;;  %v2387_v53 = vadd.f32 %v2355_v27, %v2195_v16  ;;  %v2388_v23 = vadd.f32 %v2356_v38, %v2196_v63  ;;  %v2389_v4 = vadd.f32 %v2357_v48, %v2197_v24  ;;  %v7806_v63 = vpop.eup %6143 }
 0x240   : > { %v2390_v15 = vadd.f32 %v2358_v25, %v2198_v26  ;;  %v2391_v52 = vadd.f32 %v2359_v8, %v2199_v22  ;;  %v2392_v54 = vadd.f32 %v2360_v5, %v2200_v35  ;;  %v10481_v18 = vrot.slane %v6677_v28, %v6705_v57  ;;  %v7826_v27 = vpop.eup %6145  ;;  %v1125_v5 = vpop.f32.mrf.mxu0 }
 0x241   : > { %v2393_v9 = vadd.f32 %v2361_v17, %v2201_v13  ;;  %v10482_v19 = vrot.slane %v6679_v30, %v6705_v57  ;;  %v10483_v60 = vrot.slane %v6681_v34, %v6705_v57  ;;  %v10484_v45 = vrot.slane %v6683_v36, %v6705_v57  ;;  %v7828_v0 = vpop.eup %6147 }
 0x242   : > { %v2546_v32 = vmul.f32 %v10481_v18, %v7577_v6  ;;  %v10485_v24 = vrot.slane %v6685_v40, %v6705_v57  ;;  %v10486_v22 = vrot.slane %v6687_v42, %v6705_v57  ;;  %v10487_v13 = vrot.slane %v6689_v46, %v6705_v57  ;;  %v7830_v1 = vpop.eup %6149 }
 0x243   : > { %v2547_v37 = vmul.f32 %v10482_v19, %v7577_v6  ;;  %v2548_v12 = vmul.f32 %v10483_v60, %v7577_v6  ;;  %v2549_v16 = vmul.f32 %v10484_v45, %v7577_v6  ;;  %v10488_v62 = vrot.slane %v6691_v49, %v6705_v57 }
 0x244   : > { %v2550_v26 = vmul.f32 %v10485_v24, %v7577_v6  ;;  %v2551_v35 = vmul.f32 %v10486_v22, %v7577_v6  ;;  %v2552_v50 = vmul.f32 %v10487_v13, %v7577_v6  ;;  %v2578_v39 = vadd.f32 %v2546_v32, %v2386_v61 }
 0x245   : > { %v2553_v3 = vmul.f32 %v10488_v62, %v7577_v6  ;;  %v2579_v38 = vadd.f32 %v2547_v37, %v2387_v53  ;;  %v2580_v21 = vadd.f32 %v2548_v12, %v2388_v23  ;;  %v2581_v48 = vadd.f32 %v2549_v16, %v2389_v4  ;;  %v7868_v37 = vpop.f32.mrf.mxu0 }
 0x246   : > { %v2582_v25 = vadd.f32 %v2550_v26, %v2390_v15  ;;  %v2583_v47 = vadd.f32 %v2551_v35, %v2391_v52  ;;  %v2584_v8 = vadd.f32 %v2552_v50, %v2392_v54  ;;  %v10489_v6 = vrot.slane %v6677_v28, %v6707_v58  ;;  %v7848_v54 = vpop.f32.mrf.mxu1  ;;  %10498 = vst [vmem:[#allocation54_spill] sm:$0xff] %v7868_v37 }
 0x247   : > { %v2585_v43 = vadd.f32 %v2553_v3, %v2393_v9  ;;  %v10490_v61 = vrot.slane %v6679_v30, %v6707_v58  ;;  %v10491_v23 = vrot.slane %v6681_v34, %v6707_v58  ;;  %v10492_v15 = vrot.slane %v6683_v36, %v6707_v58  ;;  %10493 = vst [vmem:[#allocation53_spill] sm:$0xff] %v7848_v54  ;;  %v7850_v9 = vpop.eup %6151  ;;  %v1128_v22 = vpop.f32.mrf.mxu0 }
 0x248   : > { %v2738_v17 = vmul.f32 %v10489_v6, %v7611_v41  ;;  %v10494_v28 = vrot.slane %v6685_v40, %v6707_v58  ;;  %v10495_v14 = vrot.slane %v6687_v42, %v6707_v58  ;;  %v10496_v18 = vrot.slane %v6689_v46, %v6707_v58  ;;  %v7870_v60 = vpop.eup %6153  ;;  %v1205_v16 = vpop.f32.mrf.mxu1 }
 0x249   : > { %v2739_v53 = vmul.f32 %v10490_v61, %v7611_v41  ;;  %v2740_v4 = vmul.f32 %v10491_v23, %v7611_v41  ;;  %v2741_v52 = vmul.f32 %v10492_v15, %v7611_v41  ;;  %v10497_v32 = vrot.slane %v6691_v49, %v6707_v58  ;;  %v7880_v46 = vpop.eup %6155 }
 0x24a   : > { %v2742_v30 = vmul.f32 %v10494_v28, %v7611_v41  ;;  %v2743_v34 = vmul.f32 %v10495_v14, %v7611_v41  ;;  %v2744_v36 = vmul.f32 %v10496_v18, %v7611_v41  ;;  %v7872_v40 = vadd.f32 %v2738_v17, %v2578_v39  ;;  %v7890_v35 = vpop.eup %6157 }
 0x24b   : > { %v2745_v19 = vmul.f32 %v10497_v32, %v7611_v41  ;;  %v7874_v12 = vadd.f32 %v2739_v53, %v2579_v38  ;;  %v7876_v42 = vadd.f32 %v2740_v4, %v2580_v21  ;;  %v7878_v45 = vadd.f32 %v2741_v52, %v2581_v48 }
 0x24c   : > { %v7882_v24 = vadd.f32 %v2742_v30, %v2582_v25  ;;  %v7884_v26 = vadd.f32 %v2743_v34, %v2583_v47  ;;  %v7886_v49 = vadd.f32 %v2744_v36, %v2584_v8  ;;  %v2842_v13 = vrot.slane %v7872_v40, 4  ;;  %v7900_v25 = vpop.f32.mrf.mxu0  ;;  %v7910_v30 = vpop.f32.mrf.mxu1 }
 0x24d   : > { %v7888_v41 = vadd.f32 %v2745_v19, %v2585_v43  ;;  %v2848_v50 = vrot.slane %v7874_v12, 4  ;;  %v2854_v62 = vrot.slane %v7876_v42, 4  ;;  %v2860_v3 = vrot.slane %v7878_v45, 4  ;;  %10499 = vst [vmem:[#allocation55_spill] sm:$0xff] %v7900_v25  ;;  %10500 = vst [vmem:[#allocation56_spill] sm:$0xff] %v7910_v30 }
 0x24e   : > { %v2866_v39 = vrot.slane %v7882_v24, 4  ;;  %v2872_v38 = vrot.slane %v7884_v26, 4  ;;  %v2878_v21 = vrot.slane %v7886_v49, 4  ;;  %v2843_v47 = vmax.f32 %v7872_v40, %v2842_v13  ;;  %v1133_v23 = vpop.f32.mrf.mxu0 }
 0x24f   : > { %v2884_v48 = vrot.slane %v7888_v41, 4  ;;  %v2849_v8 = vmax.f32 %v7874_v12, %v2848_v50  ;;  %v2855_v43 = vmax.f32 %v7876_v42, %v2854_v62  ;;  %v2861_v5 = vmax.f32 %v7878_v45, %v2860_v3  ;;  %v1208_v50 = vpop.f32.mrf.mxu1 }
 0x250   : > { %v2867_v6 = vmax.f32 %v7882_v24, %v2866_v39  ;;  %v2873_v17 = vmax.f32 %v7884_v26, %v2872_v38  ;;  %v2879_v61 = vmax.f32 %v7886_v49, %v2878_v21  ;;  %v2844_v4 = vrot.slane %v2843_v47, 2  ;;  %v7912_v32 = vpop.f32.mrf.mxu0 }
 0x251   : > { %v2885_v53 = vmax.f32 %v7888_v41, %v2884_v48  ;;  %v2850_v15 = vrot.slane %v2849_v8, 2  ;;  %v2856_v52 = vrot.slane %v2855_v43, 2  ;;  %v2862_v28 = vrot.slane %v2861_v5, 2  ;;  %10501 = vst [vmem:[#allocation57_spill] sm:$0xff] %v7912_v32  ;;  %v7914_v25 = vpop.f32.mrf.mxu1 }
 0x252   : > { %v2868_v14 = vrot.slane %v2867_v6, 2  ;;  %v2874_v34 = vrot.slane %v2873_v17, 2  ;;  %v2880_v18 = vrot.slane %v2879_v61, 2  ;;  %v2845_v19 = vmax.f32 %v2843_v47, %v2844_v4  ;;  %v1136_v21 = vpop.f32.mrf.mxu0  ;;  %10502 = vst [vmem:[#allocation58_spill] sm:$0xff] %v7914_v25 }
 0x253   : > { %v2886_v36 = vrot.slane %v2885_v53, 2  ;;  %v2851_v16 = vmax.f32 %v2849_v8, %v2850_v15  ;;  %v2857_v22 = vmax.f32 %v2855_v43, %v2856_v52  ;;  %v2863_v13 = vmax.f32 %v2861_v5, %v2862_v28 }
 0x254   : > { %v2869_v62 = vmax.f32 %v2867_v6, %v2868_v14  ;;  %v2875_v3 = vmax.f32 %v2873_v17, %v2874_v34  ;;  %v2881_v39 = vmax.f32 %v2879_v61, %v2880_v18  ;;  %v2846_v48 = vrot.slane %v2845_v19, 1  ;;  %v7916_v47 = vpop.f32.mrf.mxu0  ;;  %v1213_v17 = vpop.f32.mrf.mxu1 }
 0x255   : > { %v2887_v38 = vmax.f32 %v2885_v53, %v2886_v36  ;;  %v2852_v23 = vrot.slane %v2851_v16, 1  ;;  %v2858_v54 = vrot.slane %v2857_v22, 1  ;;  %v2864_v30 = vrot.slane %v2863_v13, 1  ;;  %10503 = vst [vmem:[#allocation59_spill] sm:$0xff] %v7916_v47 }
 0x256   : > { %v2870_v58 = vrot.slane %v2869_v62, 1  ;;  %v2876_v37 = vrot.slane %v2875_v3, 1  ;;  %v2882_v57 = vrot.slane %v2881_v39, 1  ;;  %v2847_v8 = vmax.f32 %v2845_v19, %v2846_v48  ;;  %v1141_v52 = vpop.f32.mrf.mxu0  ;;  %v7922_v36 = vpop.f32.mrf.mxu1 }
 0x257   : > { %v2888_v32 = vrot.slane %v2887_v38, 1  ;;  %v2853_v43 = vmax.f32 %v2851_v16, %v2852_v23  ;;  %v2859_v5 = vmax.f32 %v2857_v22, %v2858_v54  ;;  %v2865_v6 = vmax.f32 %v2863_v13, %v2864_v30  ;;  %10504 = vst [vmem:[#allocation60_spill] sm:$0xff] %v7922_v36  ;;  %v10512_v23 = vld [vmem:[#allocation23_spill] sm:$0xff]  ;;  %v10519_v52 = vld [vmem:[#allocation26_spill] sm:$0xff] }
 0x258   : > { %v2871_v61 = vmax.f32 %v2869_v62, %v2870_v58  ;;  %v2877_v53 = vmax.f32 %v2875_v3, %v2876_v37  ;;  %v2883_v4 = vmax.f32 %v2881_v39, %v2882_v57  ;;  %v2994_v28 = vsub.f32 %v7872_v40, %v2847_v8  ;;  %v7928_v37 = vpop.f32.mrf.mxu0 }
 0x259   : > { %v2889_v15 = vmax.f32 %v2887_v38, %v2888_v32  ;;  %v2995_v14 = vsub.f32 %v7874_v12, %v2853_v43  ;;  %v2996_v34 = vsub.f32 %v7876_v42, %v2859_v5  ;;  %v2997_v18 = vsub.f32 %v7878_v45, %v2865_v6  ;;  %10505 = vst [vmem:[#allocation61_spill] sm:$0xff] %v7928_v37  ;;  %v1216_v45 = vpop.f32.mrf.mxu1  ;;  %v10510_v38 = vld [vmem:[#allocation22_spill] sm:$0xff]  ;;  %v10514_v5 = vld [vmem:[#allocation24_spill] sm:$0xff] }
 0x25a   : > { %v2998_v19 = vsub.f32 %v7882_v24, %v2871_v61  ;;  %v2999_v54 = vsub.f32 %v7884_v26, %v2877_v53  ;;  %v3000_v58 = vsub.f32 %v7886_v49, %v2883_v4  ;;  %v3034_v30 = vmul.f32 1.442695, %v2994_v28  ;;  %v10517_v53 = vld [vmem:[#allocation25_spill] sm:$0xff] }
 0x25b   : > { %v3001_v57 = vsub.f32 %v7888_v41, %v2889_v15  ;;  %v3036_v40 = vmul.f32 1.442695, %v2995_v14  ;;  %v3038_v32 = vmul.f32 1.442695, %v2996_v34  ;;  %v10506_v12 = vrot.slane %v6709_v59, %v6693_v51  ;;  %v1144_v41 = vpop.f32.mrf.mxu0  ;;  %v7944_v39 = vpop.f32.mrf.mxu1  ;;  %v10521_v34 = vld [vmem:[#allocation44_spill] sm:$0xff]  ;;  %v10531_v45 = vld [vmem:[#allocation49_spill] sm:$0xff] }
 0x25c   : > { %v3040_v16 = vmul.f32 1.442695, %v2997_v18  ;;  %v3042_v24 = vmul.f32 1.442695, %v2998_v19  ;;  %v3044_v22 = vmul.f32 1.442695, %v2999_v54  ;;  %v10507_v26 = vrot.slane %v6727_v7, %v6693_v51 }
 0x25d   : > { %v7934_v42 = vmul.f32 %v10506_v12, %v7667_v31  ;;  %6159 = vpow2.f32 %v3034_v30  ;;  %v3046_v13 = vmul.f32 1.442695, %v3000_v58  ;;  %v3048_v50 = vmul.f32 1.442695, %v3001_v57  ;;  %10509 = vst [vmem:[#allocation62_spill] sm:$0xff] %v7944_v39  ;;  %v7958_v61 = vpop.f32.mrf.mxu0  ;;  %v1221_v19 = vpop.f32.mrf.mxu1  ;;  %v10523_v54 = vld [vmem:[#allocation45_spill] sm:$0xff] }
 0x25e   : > { %v1435_v49 = vmul.f32 %v10507_v26, %v7667_v31  ;;  %v10508_v62 = vrot.slane %v6761_v33, %v6693_v51  ;;  %6161 = vpow2.f32 %v3036_v40  ;;  %v10511_v21 = vrot.slane %v10510_v38, %v6693_v51  ;;  %10516 = vst [vmem:[#allocation22_spill] sm:$0xff] %v7958_v61  ;;  %v10525_v57 = vld [vmem:[#allocation46_spill] sm:$0xff]  ;;  %v10527_v40 = vld [vmem:[#allocation47_spill] sm:$0xff]  ;;  %v10536_v41 = vld [vmem:[#allocation32_spill] sm:$0xff] }
 0x25f   : > { %v10513_v8 = vrot.slane %v10512_v23, %v6693_v51  ;;  %v10515_v6 = vrot.slane %v10514_v5, %v6693_v51  ;;  %6163 = vpow2.f32 %v3038_v32  ;;  %v10518_v4 = vrot.slane %v10517_v53, %v6693_v51  ;;  %v1149_v12 = vpop.f32.mrf.mxu0  ;;  %v10546_v19 = vld [vmem:[#allocation50_spill] sm:$0xff] }
 0x260   : > { %v1436_v3 = vmul.f32 %v10508_v62, %v7667_v31  ;;  %v1437_v48 = vmul.f32 %v10511_v21, %v7667_v31  ;;  %v10520_v28 = vrot.slane %v10519_v52, %v6693_v51  ;;  %v7970_v18 = vmul.f32 %v7806_v63, %v10521_v34 }
 0x261   : > { %v1438_v43 = vmul.f32 %v10513_v8, %v7667_v31  ;;  %v1439_v17 = vmul.f32 %v10515_v6, %v7667_v31  ;;  %v1440_v15 = vmul.f32 %v10518_v4, %v7667_v31  ;;  %6165 = vpow2.f32 %v3040_v16 }
 0x262   : > { %v1441_v14 = vmul.f32 %v10520_v28, %v7667_v31  ;;  %10522 = vst [vmem:[#allocation23_spill] sm:$0xff] %v7970_v18  ;;  %v7974_v58 = vmul.f32 %v7826_v27, %v10523_v54  ;;  %v7978_v30 = vmul.f32 %v7828_v0, %v10525_v57  ;;  %v7982_v32 = vmul.f32 %v7830_v1, %v10527_v40  ;;  %v10529_v31 = vld [vmem:[#allocation48_spill] sm:$0xff]  ;;  %v10547_v54 = vld [vmem:[#allocation17_spill] sm:$0xff] }
 0x263   : > { %6167 = vpow2.f32 %v3042_v24  ;;  %v7986_v63 = vmul.f32 %v7850_v9, %v10529_v31  ;;  %v7990_v16 = vmul.f32 %v7870_v60, %v10531_v45  ;;  %v7994_v27 = vmul.f32 %v7880_v46, %v7703_v11  ;;  %v8004_v24 = vpop.f32.mrf.mxu0 }
 0x264   : > { %10524 = vst [vmem:[#allocation24_spill] sm:$0xff] %v7974_v58  ;;  %10526 = vst [vmem:[#allocation25_spill] sm:$0xff] %v7978_v30  ;;  %6169 = vpow2.f32 %v3044_v22  ;;  %v7998_v0 = vmul.f32 %v7890_v35, %v7713_v2  ;;  %v3341_v1 = vrot.slane %v7970_v18, %v6693_v51  ;;  %v3345_v9 = vrot.slane %v7974_v58, %v6693_v51 }
 0x265   : > { %10528 = vst [vmem:[#allocation26_spill] sm:$0xff] %v7982_v32  ;;  %10530 = vst [vmem:[#allocation44_spill] sm:$0xff] %v7986_v63  ;;  %6171 = vpow2.f32 %v3046_v13  ;;  %v3349_v60 = vrot.slane %v7978_v30, %v6693_v51  ;;  %v3353_v11 = vrot.slane %v7982_v32, %v6693_v51  ;;  %v3357_v46 = vrot.slane %v7986_v63, %v6693_v51  ;;  %v1152_v26 = vpop.f32.mrf.mxu0 }
 0x266   : > { %10532 = vst [vmem:[#allocation45_spill] sm:$0xff] %v7990_v16  ;;  %10533 = vst [vmem:[#allocation46_spill] sm:$0xff] %v7994_v27  ;;  %6173 = vpow2.f32 %v3048_v50  ;;  %v3361_v2 = vrot.slane %v7990_v16, %v6693_v51  ;;  %v3365_v35 = vrot.slane %v7994_v27, %v6693_v51  ;;  %v3369_v22 = vrot.slane %v7998_v0, %v6693_v51 }
 0x267   : > { %10534 = vst [vmem:[#allocation47_spill] sm:$0xff] %v7998_v0  ;;  %10535 = vst [vmem:[#allocation48_spill] sm:$0xff] %v8004_v24  ;;  %v8019_v13 = vmul.f32 %v3341_v1, %v10536_v41  ;;  %v8022_v62 = vmul.f32 %v3345_v9, %v10536_v41  ;;  %v8025_v21 = vmul.f32 %v3349_v60, %v10536_v41  ;;  %v8042_v34 = vpop.f32.mrf.mxu0 }
 0x268   : > { %v8028_v50 = vmul.f32 %v3353_v11, %v10536_v41  ;;  %v8031_v8 = vmul.f32 %v3357_v46, %v10536_v41  ;;  %v8034_v6 = vmul.f32 %v3361_v2, %v10536_v41  ;;  %v8037_v4 = vmul.f32 %v3365_v35, %v10536_v41  ;;  %10545 = vst [vmem:[#allocation69_spill] sm:$0xff] %v8042_v34  ;;  %v8060_v11 = vpop.f32.mrf.mxu1 }
 0x269   : > { %10537 = vst [vmem:[#allocation49_spill] sm:$0xff] %v8019_v13  ;;  %10538 = vst [vmem:[#allocation32_spill] sm:$0xff] %v8022_v62  ;;  %v8040_v28 = vmul.f32 %v3369_v22, %v10536_v41  ;;  %v10548_v57 = vrot.slane %v6709_v59, %v10547_v54  ;;  %v10549_v12 = vrot.slane %v6727_v7, %v10547_v54 }
 0x26a   : > { %10539 = vst [vmem:[#allocation63_spill] sm:$0xff] %v8025_v21  ;;  %10540 = vst [vmem:[#allocation64_spill] sm:$0xff] %v8028_v50  ;;  %v10550_v45 = vrot.slane %v6761_v33, %v10547_v54  ;;  %v10551_v9 = vrot.slane %v10510_v38, %v10547_v54  ;;  %v10553_v46 = vrot.slane %v10512_v23, %v10547_v54  ;;  %v8087_v50 = vpop.eup %6159 }
 0x26b   : > { %10541 = vst [vmem:[#allocation65_spill] sm:$0xff] %v8031_v8  ;;  %10542 = vst [vmem:[#allocation66_spill] sm:$0xff] %v8034_v6  ;;  %v1594_v40 = vmul.f32 %v10548_v57, %v10546_v19  ;;  %v1595_v31 = vmul.f32 %v10549_v12, %v10546_v19  ;;  %v10554_v35 = vrot.slane %v10514_v5, %v10547_v54 }
 0x26c   : > { %10543 = vst [vmem:[#allocation67_spill] sm:$0xff] %v8037_v4  ;;  %10544 = vst [vmem:[#allocation68_spill] sm:$0xff] %v8040_v28  ;;  %v1596_v1 = vmul.f32 %v10550_v45, %v10546_v19  ;;  %v1597_v60 = vmul.f32 %v10551_v9, %v10546_v19  ;;  %v1598_v2 = vmul.f32 %v10553_v46, %v10546_v19  ;;  %v1157_v45 = vpop.f32.mrf.mxu0 }
 0x26d   : > { %10552 = vst [vmem:[#allocation50_spill] sm:$0xff] %v8060_v11  ;;  %v1599_v22 = vmul.f32 %v10554_v35, %v10546_v19  ;;  %v10555_v26 = vrot.slane %v10517_v53, %v10547_v54  ;;  %v10556_v57 = vrot.slane %v10519_v52, %v10547_v54  ;;  %v8079_v9 = vadd.f32 %v1594_v40, %v7934_v42  ;;  %v1224_v35 = vpop.f32.mrf.mxu1  ;;  %v8099_v42 = vpop.eup %6161 }
 0x26e   : > { %v8081_v46 = vadd.f32 %v1595_v31, %v1435_v49  ;;  %v8083_v62 = vadd.f32 %v1596_v1, %v1436_v3  ;;  %v8085_v13 = vadd.f32 %v1597_v60, %v1437_v48  ;;  %10557 = vst [vmem:[#allocation70_spill] sm:$0xff] %v8087_v50  ;;  %v8089_v21 = vadd.f32 %v1598_v2, %v1438_v43 }
 0x26f   : > { %v1600_v41 = vmul.f32 %v10555_v26, %v10546_v19  ;;  %v1601_v12 = vmul.f32 %v10556_v57, %v10546_v19  ;;  %v8091_v26 = vadd.f32 %v1599_v22, %v1439_v17  ;;  %v8097_v57 = vpop.f32.mrf.mxu0  ;;  %10559 = vst [vmem:[#allocation72_spill] sm:$0xff] %v8099_v42  ;;  %v3130_v49 = vrot.slane %v8087_v50, 4  ;;  %v8108_v17 = vpop.f32.mrf.mxu1 }
 0x270   : > { %10558 = vst [vmem:[#allocation71_spill] sm:$0xff] %v8097_v57  ;;  %v3501_v3 = vrot.slane %v7970_v18, %v10547_v54  ;;  %v3505_v48 = vrot.slane %v7974_v58, %v10547_v54  ;;  %v3509_v43 = vrot.slane %v7978_v30, %v10547_v54  ;;  %10560 = vst [vmem:[#allocation73_spill] sm:$0xff] %v8108_v17 }
 0x271   : > { %v8093_v6 = vadd.f32 %v1600_v41, %v1440_v15  ;;  %v8095_v19 = vadd.f32 %v1601_v12, %v1441_v14  ;;  %v8110_v15 = vpop.eup %6163  ;;  %v3136_v14 = vrot.slane %v8099_v42, 4  ;;  %v3513_v40 = vrot.slane %v7982_v32, %v10547_v54  ;;  %v1160_v60 = vpop.f32.mrf.mxu0 }
 0x272   : > { %10561 = vst [vmem:[#allocation74_spill] sm:$0xff] %v8110_v15  ;;  %v8119_v2 = vpop.eup %6165  ;;  %v3131_v22 = vadd.f32 %v8087_v50, %v3130_v49  ;;  %v3142_v41 = vrot.slane %v8110_v15, 4  ;;  %v1229_v35 = vpop.f32.mrf.mxu1  ;;  %v10564_v60 = vld [vmem:[#allocation35_spill] sm:$0xff] }
 0x273   : > { %10562 = vst [vmem:[#allocation75_spill] sm:$0xff] %v8119_v2  ;;  %v8127_v8 = vpop.eup %6167  ;;  %v3137_v31 = vadd.f32 %v8099_v42, %v3136_v14  ;;  %v3148_v1 = vrot.slane %v8119_v2, 4  ;;  %v8132_v28 = vmul.f32 %v3501_v3, %v10564_v60  ;;  %v8135_v49 = vmul.f32 %v3505_v48, %v10564_v60 }
 0x274   : > { %10563 = vst [vmem:[#allocation76_spill] sm:$0xff] %v8127_v8  ;;  %v8137_v4 = vpop.eup %6169  ;;  %v3132_v11 = vrot.slane %v3131_v22, 2  ;;  %v3143_v12 = vadd.f32 %v8110_v15, %v3142_v41  ;;  %v3154_v45 = vrot.slane %v8127_v8, 4  ;;  %v8142_v35 = vmul.f32 %v3509_v43, %v10564_v60  ;;  %v8144_v39 = vpop.f32.mrf.mxu1 }
 0x275   : > { %10565 = vst [vmem:[#allocation35_spill] sm:$0xff] %v8132_v28  ;;  %10566 = vst [vmem:[#allocation77_spill] sm:$0xff] %v8135_v49  ;;  %v8146_v14 = vpop.eup %6171  ;;  %v3138_v36 = vrot.slane %v3137_v31, 2  ;;  %v3149_v3 = vadd.f32 %v8119_v2, %v3148_v1  ;;  %v3160_v48 = vrot.slane %v8137_v4, 4  ;;  %v8151_v49 = vmul.f32 %v3513_v40, %v10564_v60 }
 0x276   : > { %10567 = vst [vmem:[#allocation78_spill] sm:$0xff] %v8137_v4  ;;  %10568 = vst [vmem:[#allocation79_spill] sm:$0xff] %v8142_v35  ;;  %v8153_v28 = vpop.eup %6173  ;;  %v3133_v41 = vadd.f32 %v3132_v11, %v3131_v22  ;;  %v3144_v25 = vrot.slane %v3143_v12, 2  ;;  %v3155_v17 = vadd.f32 %v8127_v8, %v3154_v45  ;;  %v3166_v43 = vrot.slane %v8146_v14, 4  ;;  %v1232_v35 = vpop.f32.mrf.mxu1 }
 0x277   : > { %10569 = vst [vmem:[#allocation80_spill] sm:$0xff] %v8144_v39  ;;  %10570 = vst [vmem:[#allocation81_spill] sm:$0xff] %v8151_v49  ;;  %v3139_v39 = vadd.f32 %v3138_v36, %v3137_v31  ;;  %v3150_v57 = vrot.slane %v3149_v3, 2  ;;  %v3161_v34 = vadd.f32 %v8137_v4, %v3160_v48  ;;  %v3172_v1 = vrot.slane %v8153_v28, 4 }
 0x278   : > { %v3134_v24 = vrot.slane %v3133_v41, 1  ;;  %v3145_v61 = vadd.f32 %v3144_v25, %v3143_v12  ;;  %v3156_v37 = vrot.slane %v3155_v17, 2  ;;  %v3167_v40 = vadd.f32 %v8146_v14, %v3166_v43  ;;  %v8160_v49 = vpop.f32.mrf.mxu1 }
 0x279   : > { %10571 = vst [vmem:[#allocation82_spill] sm:$0xff] %v8160_v49  ;;  %v3140_v11 = vrot.slane %v3139_v39, 1  ;;  %v3151_v22 = vadd.f32 %v3150_v57, %v3149_v3  ;;  %v3162_v47 = vrot.slane %v3161_v34, 2  ;;  %v3173_v45 = vadd.f32 %v8153_v28, %v3172_v1 }
 0x27a   : > { %v3135_v8 = vadd.f32 %v3134_v24, %v3133_v41  ;;  %v3146_v35 = vrot.slane %v3145_v61, 1  ;;  %v3157_v36 = vadd.f32 %v3156_v37, %v3155_v17  ;;  %v3168_v31 = vrot.slane %v3167_v40, 2  ;;  %v1237_v2 = vpop.f32.mrf.mxu1 }
 0x27b   : > { %v3141_v48 = vadd.f32 %v3140_v11, %v3139_v39  ;;  %v3152_v4 = vrot.slane %v3151_v22, 1  ;;  %v3163_v15 = vadd.f32 %v3162_v47, %v3161_v34  ;;  %v3174_v42 = vrot.slane %v3173_v45, 2  ;;  %v10582_v11 = vld [vmem:[#allocation52_spill] sm:$0xff] }
 0x27c   : > { %v3147_v25 = vadd.f32 %v3146_v35, %v3145_v61  ;;  %v3158_v12 = vrot.slane %v3157_v36, 1  ;;  %v3169_v50 = vadd.f32 %v3168_v31, %v3167_v40  ;;  %6175 = vrcp.f32 %v3135_v8  ;;  %v8163_v43 = vpop.f32.mrf.mxu1 }
 0x27d   : > { %10572 = vst [vmem:[#allocation83_spill] sm:$0xff] %v8163_v43  ;;  %v3153_v49 = vadd.f32 %v3152_v4, %v3151_v22  ;;  %v3164_v57 = vrot.slane %v3163_v15, 1  ;;  %v3175_v3 = vadd.f32 %v3174_v42, %v3173_v45  ;;  %6177 = vrcp.f32 %v3141_v48 }
 0x27e   : > { %v3159_v1 = vadd.f32 %v3158_v12, %v3157_v36  ;;  %v3170_v24 = vrot.slane %v3169_v50, 1  ;;  %6179 = vrcp.f32 %v3147_v25  ;;  %v10573_v37 = vrot.slane %v7986_v63, %v10547_v54  ;;  %v1240_v47 = vpop.f32.mrf.mxu1 }
 0x27f   : > { %v3165_v61 = vadd.f32 %v3164_v57, %v3163_v15  ;;  %v3176_v34 = vrot.slane %v3175_v3, 1  ;;  %6181 = vrcp.f32 %v3153_v49  ;;  %v10575_v8 = vrot.slane %v7990_v16, %v10547_v54 }
 0x280   : > { %v8169_v39 = vmul.f32 %v10573_v37, %v10564_v60  ;;  %v3171_v42 = vadd.f32 %v3170_v24, %v3169_v50  ;;  %6183 = vrcp.f32 %v3159_v1  ;;  %v10577_v17 = vrot.slane %v7994_v27, %v10547_v54  ;;  %v8189_v49 = vpop.f32.mrf.mxu1  ;;  %v10583_v50 = vld [vmem:[#allocation18_spill] sm:$0xff] }
 0x281   : > { %v8175_v4 = vmul.f32 %v10575_v8, %v10564_v60  ;;  %v10579_v15 = vrot.slane %v7998_v0, %v10547_v54  ;;  %10581 = vst [vmem:[#allocation88_spill] sm:$0xff] %v8189_v49  ;;  %v3177_v40 = vadd.f32 %v3176_v34, %v3175_v3  ;;  %6185 = vrcp.f32 %v3165_v61 }
 0x282   : > { %10574 = vst [vmem:[#allocation84_spill] sm:$0xff] %v8169_v39  ;;  %v8181_v2 = vmul.f32 %v10577_v17, %v10564_v60  ;;  %v10584_v22 = vrot.slane %v6709_v59, %v10583_v50  ;;  %v10585_v35 = vrot.slane %v6727_v7, %v10583_v50  ;;  %6187 = vrcp.f32 %v3171_v42  ;;  %v1245_v3 = vpop.f32.mrf.mxu1 }
 0x283   : > { %10576 = vst [vmem:[#allocation85_spill] sm:$0xff] %v8175_v4  ;;  %v8187_v41 = vmul.f32 %v10579_v15, %v10564_v60  ;;  %v10586_v60 = vrot.slane %v6761_v33, %v10583_v50  ;;  %v10587_v48 = vrot.slane %v10510_v38, %v10583_v50  ;;  %v10588_v12 = vrot.slane %v10512_v23, %v10583_v50 }
 0x284   : > { %10578 = vst [vmem:[#allocation86_spill] sm:$0xff] %v8181_v2  ;;  %v1786_v45 = vmul.f32 %v10584_v22, %v10582_v11  ;;  %v1787_v36 = vmul.f32 %v10585_v35, %v10582_v11  ;;  %6189 = vrcp.f32 %v3177_v40  ;;  %v10589_v1 = vrot.slane %v10514_v5, %v10583_v50  ;;  %v8227_v40 = vpop.f32.mrf.mxu1 }
 0x285   : > { %10580 = vst [vmem:[#allocation87_spill] sm:$0xff] %v8187_v41  ;;  %v1788_v31 = vmul.f32 %v10586_v60, %v10582_v11  ;;  %v1789_v25 = vmul.f32 %v10587_v48, %v10582_v11  ;;  %v1790_v57 = vmul.f32 %v10588_v12, %v10582_v11  ;;  %v10590_v37 = vrot.slane %v10517_v53, %v10583_v50 }
 0x286   : > { %v1791_v24 = vmul.f32 %v10589_v1, %v10582_v11  ;;  %v10591_v61 = vrot.slane %v10519_v52, %v10583_v50  ;;  %v1818_v8 = vadd.f32 %v1786_v45, %v8079_v9  ;;  %v1819_v42 = vadd.f32 %v1787_v36, %v8081_v46  ;;  %10592 = vst [vmem:[#allocation52_spill] sm:$0xff] %v8227_v40  ;;  %v1248_v46 = vpop.f32.mrf.mxu1  ;;  %v10593_v45 = vld [vmem:[#allocation37_spill] sm:$0xff] }
 0x287   : > { %v1792_v47 = vmul.f32 %v10590_v37, %v10582_v11  ;;  %v1820_v17 = vadd.f32 %v1788_v31, %v8083_v62  ;;  %v1821_v15 = vadd.f32 %v1789_v25, %v8085_v13  ;;  %v1822_v22 = vadd.f32 %v1790_v57, %v8089_v21 }
 0x288   : > { %v1793_v34 = vmul.f32 %v10591_v61, %v10582_v11  ;;  %v1823_v35 = vadd.f32 %v1791_v24, %v8091_v26  ;;  %v3693_v11 = vrot.slane %v7970_v18, %v10583_v50  ;;  %v3697_v9 = vrot.slane %v7974_v58, %v10583_v50  ;;  %v8261_v57 = vpop.f32.mrf.mxu1 }
 0x289   : > { %v1824_v60 = vadd.f32 %v1792_v47, %v8093_v6  ;;  %v3701_v62 = vrot.slane %v7978_v30, %v10583_v50  ;;  %v3705_v13 = vrot.slane %v7982_v32, %v10583_v50  ;;  %v3709_v21 = vrot.slane %v7986_v63, %v10583_v50  ;;  %10598 = vst [vmem:[#allocation92_spill] sm:$0xff] %v8261_v57  ;;  %v8263_v3 = vpop.eup %6175 }
 0x28a   : > { %v1825_v48 = vadd.f32 %v1793_v34, %v8095_v19  ;;  %v3713_v6 = vrot.slane %v7990_v16, %v10583_v50  ;;  %v3717_v26 = vrot.slane %v7994_v27, %v10583_v50  ;;  %v3721_v19 = vrot.slane %v7998_v0, %v10583_v50  ;;  %v8277_v61 = vpop.eup %6177  ;;  %v10603_v34 = vld [vmem:[#allocation19_spill] sm:$0xff] }
 0x28b   : > { %v8250_v36 = vmul.f32 %v3693_v11, %v10593_v45  ;;  %v8253_v31 = vmul.f32 %v3697_v9, %v10593_v45  ;;  %v8256_v25 = vmul.f32 %v3701_v62, %v10593_v45  ;;  %v8259_v12 = vmul.f32 %v3705_v13, %v10593_v45 }
 0x28c   : > { %v8266_v1 = vmul.f32 %v3709_v21, %v10593_v45  ;;  %v8269_v24 = vmul.f32 %v3713_v6, %v10593_v45  ;;  %v8272_v37 = vmul.f32 %v3717_v26, %v10593_v45  ;;  %v8275_v47 = vmul.f32 %v3721_v19, %v10593_v45  ;;  %v1253_v19 = vpop.f32.mrf.mxu1  ;;  %v8295_v45 = vpop.eup %6179 }
 0x28d   : > { %10594 = vst [vmem:[#allocation37_spill] sm:$0xff] %v8250_v36  ;;  %10595 = vst [vmem:[#allocation89_spill] sm:$0xff] %v8253_v31  ;;  %v10604_v11 = vrot.slane %v6709_v59, %v10603_v34  ;;  %v10605_v62 = vrot.slane %v6727_v7, %v10603_v34  ;;  %v10606_v46 = vrot.slane %v6761_v33, %v10603_v34  ;;  %v8313_v18 = vpop.eup %6181 }
 0x28e   : > { %10596 = vst [vmem:[#allocation90_spill] sm:$0xff] %v8256_v25  ;;  %10597 = vst [vmem:[#allocation91_spill] sm:$0xff] %v8259_v12  ;;  %v10607_v6 = vrot.slane %v10510_v38, %v10603_v34  ;;  %v8315_v30 = vpop.f32.mrf.mxu1 }
 0x28f   : > { %10599 = vst [vmem:[#allocation93_spill] sm:$0xff] %v8266_v1  ;;  %10600 = vst [vmem:[#allocation94_spill] sm:$0xff] %v8269_v24  ;;  %v1978_v9 = vmul.f32 %v10604_v11, %v7725_v20  ;;  %v1979_v13 = vmul.f32 %v10605_v62, %v7725_v20  ;;  %v1980_v21 = vmul.f32 %v10606_v46, %v7725_v20  ;;  %v8317_v24 = vpop.eup %6183 }
 0x290   : > { %10601 = vst [vmem:[#allocation95_spill] sm:$0xff] %v8272_v37  ;;  %10602 = vst [vmem:[#allocation96_spill] sm:$0xff] %v8275_v47  ;;  %v1981_v26 = vmul.f32 %v10607_v6, %v7725_v20  ;;  %v10608_v11 = vrot.slane %v10512_v23, %v10603_v34  ;;  %v10609_v62 = vrot.slane %v10514_v5, %v10603_v34 }
 0x291   : > { %v10610_v46 = vrot.slane %v10517_v53, %v10603_v34  ;;  %v10611_v6 = vrot.slane %v10519_v52, %v10603_v34  ;;  %v2010_v12 = vadd.f32 %v1978_v9, %v1818_v8  ;;  %v2011_v25 = vadd.f32 %v1979_v13, %v1819_v42  ;;  %10612 = vst [vmem:[#allocation19_spill] sm:$0xff] %v8315_v30 }
 0x292   : > { %v1982_v31 = vmul.f32 %v10608_v11, %v7725_v20  ;;  %v1983_v36 = vmul.f32 %v10609_v62, %v7725_v20  ;;  %v2012_v11 = vadd.f32 %v1980_v21, %v1820_v17  ;;  %v2013_v32 = vadd.f32 %v1981_v26, %v1821_v15 }
 0x293   : > { %v1984_v58 = vmul.f32 %v10610_v46, %v7725_v20  ;;  %v1985_v19 = vmul.f32 %v10611_v6, %v7725_v20  ;;  %v8319_v46 = vpop.eup %6185  ;;  %v10613_v20 = vrot.slane %v6709_v59, %v6701_v55  ;;  %v10614_v8 = vrot.slane %v6727_v7, %v6701_v55 }
 0x294   : > { %v2014_v62 = vadd.f32 %v1982_v31, %v1822_v22  ;;  %v2015_v1 = vadd.f32 %v1983_v36, %v1823_v35  ;;  %v10615_v17 = vrot.slane %v6761_v33, %v6701_v55  ;;  %v1256_v35 = vpop.f32.mrf.mxu1  ;;  %v10618_v31 = vrot.slane %v10514_v5, %v6701_v55 }
 0x295   : > { %v2016_v16 = vadd.f32 %v1984_v58, %v1824_v60  ;;  %v2017_v63 = vadd.f32 %v1985_v19, %v1825_v48  ;;  %v2170_v6 = vmul.f32 %v10613_v20, %v7747_v10  ;;  %v2171_v42 = vmul.f32 %v10614_v8, %v7747_v10  ;;  %v8337_v60 = vpop.eup %6187 }
 0x296   : > { %v2172_v15 = vmul.f32 %v10615_v17, %v7747_v10  ;;  %v10616_v58 = vrot.slane %v10510_v38, %v6701_v55  ;;  %v10617_v48 = vrot.slane %v10512_v23, %v6701_v55  ;;  %v2175_v9 = vmul.f32 %v10618_v31, %v7747_v10  ;;  %v8355_v20 = vpop.eup %6189 }
 0x297   : > { %v10619_v13 = vrot.slane %v10517_v53, %v6701_v55  ;;  %v10620_v26 = vrot.slane %v10519_v52, %v6701_v55  ;;  %v2202_v8 = vadd.f32 %v2170_v6, %v2010_v12  ;;  %v2203_v17 = vadd.f32 %v2171_v42, %v2011_v25 }
 0x298   : > { %v2173_v22 = vmul.f32 %v10616_v58, %v7747_v10  ;;  %v2174_v36 = vmul.f32 %v10617_v48, %v7747_v10  ;;  %v2204_v58 = vadd.f32 %v2172_v15, %v2012_v11  ;;  %v8357_v48 = vpop.f32.mrf.mxu1  ;;  %v2207_v31 = vadd.f32 %v2175_v9, %v2015_v1 }
 0x299   : > { %v2176_v21 = vmul.f32 %v10619_v13, %v7747_v10  ;;  %v2177_v19 = vmul.f32 %v10620_v26, %v7747_v10  ;;  %10621 = vst [vmem:[#allocation97_spill] sm:$0xff] %v8357_v48  ;;  %v10622_v13 = vrot.slane %v6709_v59, %v6703_v56  ;;  %v10623_v10 = vrot.slane %v6727_v7, %v6703_v56 }
 0x29a   : > { %v2205_v35 = vadd.f32 %v2173_v22, %v2013_v32  ;;  %v2206_v4 = vadd.f32 %v2174_v36, %v2014_v62  ;;  %v10624_v32 = vrot.slane %v6761_v33, %v6703_v56  ;;  %v1261_v12 = vpop.f32.mrf.mxu1  ;;  %v10626_v1 = vrot.slane %v10512_v23, %v6703_v56 }
 0x29b   : > { %v2208_v39 = vadd.f32 %v2176_v21, %v2016_v16  ;;  %v2209_v47 = vadd.f32 %v2177_v19, %v2017_v63  ;;  %v2362_v37 = vmul.f32 %v10622_v13, %v7788_v29  ;;  %v2363_v26 = vmul.f32 %v10623_v10, %v7788_v29 }
 0x29c   : > { %v2364_v25 = vmul.f32 %v10624_v32, %v7788_v29  ;;  %v10625_v16 = vrot.slane %v10510_v38, %v6703_v56  ;;  %v2366_v11 = vmul.f32 %v10626_v1, %v7788_v29  ;;  %v10627_v62 = vrot.slane %v10514_v5, %v6703_v56  ;;  %v8391_v10 = vpop.f32.mrf.mxu1 }
 0x29d   : > { %v10628_v42 = vrot.slane %v10517_v53, %v6703_v56  ;;  %v10629_v22 = vrot.slane %v10519_v52, %v6703_v56  ;;  %v2394_v9 = vadd.f32 %v2362_v37, %v2202_v8  ;;  %v2395_v21 = vadd.f32 %v2363_v26, %v2203_v17  ;;  %10630 = vst [vmem:[#allocation98_spill] sm:$0xff] %v8391_v10 }
 0x29e   : > { %v2365_v63 = vmul.f32 %v10625_v16, %v7788_v29  ;;  %v2367_v6 = vmul.f32 %v10627_v62, %v7788_v29  ;;  %v2396_v19 = vadd.f32 %v2364_v25, %v2204_v58  ;;  %v2398_v32 = vadd.f32 %v2366_v11, %v2206_v4  ;;  %v10631_v62 = vld [vmem:[#allocation20_spill] sm:$0xff] }
 0x29f   : > { %v2368_v15 = vmul.f32 %v10628_v42, %v7788_v29  ;;  %v2369_v36 = vmul.f32 %v10629_v22, %v7788_v29  ;;  %v10632_v0 = vrot.slane %v6709_v59, %v10631_v62  ;;  %v10633_v27 = vrot.slane %v6727_v7, %v10631_v62 }
 0x2a0   : > { %v2397_v13 = vadd.f32 %v2365_v63, %v2205_v35  ;;  %v2399_v16 = vadd.f32 %v2367_v6, %v2207_v31  ;;  %v10634_v37 = vrot.slane %v6761_v33, %v10631_v62  ;;  %v10638_v35 = vrot.slane %v10517_v53, %v10631_v62 }
 0x2a1   : > { %v2400_v12 = vadd.f32 %v2368_v15, %v2208_v39  ;;  %v2401_v1 = vadd.f32 %v2369_v36, %v2209_v47  ;;  %v2554_v42 = vmul.f32 %v10632_v0, %v7824_v44  ;;  %v2555_v29 = vmul.f32 %v10633_v27, %v7824_v44  ;;  %v1264_v47 = vpop.f32.mrf.mxu1 }
 0x2a2   : > { %v2556_v8 = vmul.f32 %v10634_v37, %v7824_v44  ;;  %v10635_v39 = vrot.slane %v10510_v38, %v10631_v62  ;;  %v10636_v0 = vrot.slane %v10512_v23, %v10631_v62  ;;  %v10637_v27 = vrot.slane %v10514_v5, %v10631_v62 }
 0x2a3   : > { %v2560_v31 = vmul.f32 %v10638_v35, %v7824_v44  ;;  %v10639_v26 = vrot.slane %v10519_v52, %v10631_v62  ;;  %v2586_v63 = vadd.f32 %v2554_v42, %v2394_v9  ;;  %v2587_v11 = vadd.f32 %v2555_v29, %v2395_v21  ;;  %v8425_v22 = vpop.f32.mrf.mxu1 }
 0x2a4   : > { %v2557_v4 = vmul.f32 %v10635_v39, %v7824_v44  ;;  %v2558_v17 = vmul.f32 %v10636_v0, %v7824_v44  ;;  %v2559_v58 = vmul.f32 %v10637_v27, %v7824_v44  ;;  %v2588_v6 = vadd.f32 %v2556_v8, %v2396_v19  ;;  %10640 = vst [vmem:[#allocation99_spill] sm:$0xff] %v8425_v22  ;;  %v10641_v0 = vld [vmem:[#allocation54_spill] sm:$0xff]  ;;  %v10642_v27 = vld [vmem:[#allocation21_spill] sm:$0xff] }
 0x2a5   : > { %v2561_v25 = vmul.f32 %v10639_v26, %v7824_v44  ;;  %v2592_v39 = vadd.f32 %v2560_v31, %v2400_v12  ;;  %v10643_v41 = vrot.slane %v6709_v59, %v10642_v27  ;;  %v10644_v2 = vrot.slane %v6727_v7, %v10642_v27 }
 0x2a6   : > { %v2589_v15 = vadd.f32 %v2557_v4, %v2397_v13  ;;  %v2590_v36 = vadd.f32 %v2558_v17, %v2398_v32  ;;  %v2591_v37 = vadd.f32 %v2559_v58, %v2399_v16  ;;  %v10645_v9 = vrot.slane %v6761_v33, %v10642_v27  ;;  %v1269_v32 = vpop.f32.mrf.mxu1 }
 0x2a7   : > { %v2593_v47 = vadd.f32 %v2561_v25, %v2401_v1  ;;  %v2746_v35 = vmul.f32 %v10643_v41, %v10641_v0  ;;  %v2747_v44 = vmul.f32 %v10644_v2, %v10641_v0  ;;  %v10646_v19 = vrot.slane %v10510_v38, %v10642_v27 }
 0x2a8   : > { %v2748_v21 = vmul.f32 %v10645_v9, %v10641_v0  ;;  %v10647_v59 = vrot.slane %v10512_v23, %v10642_v27  ;;  %v10648_v7 = vrot.slane %v10514_v5, %v10642_v27  ;;  %v10649_v33 = vrot.slane %v10517_v53, %v10642_v27  ;;  %v8467_v5 = vpop.f32.mrf.mxu1 }
 0x2a9   : > { %v2749_v13 = vmul.f32 %v10646_v19, %v10641_v0  ;;  %v10650_v38 = vrot.slane %v10519_v52, %v10642_v27  ;;  %v8459_v1 = vadd.f32 %v2746_v35, %v2586_v63  ;;  %v8461_v42 = vadd.f32 %v2747_v44, %v2587_v11  ;;  %10651 = vst [vmem:[#allocation54_spill] sm:$0xff] %v8467_v5 }
 0x2aa   : > { %v2750_v41 = vmul.f32 %v10647_v59, %v10641_v0  ;;  %v2751_v2 = vmul.f32 %v10648_v7, %v10641_v0  ;;  %v2752_v16 = vmul.f32 %v10649_v33, %v10641_v0  ;;  %v8463_v23 = vadd.f32 %v2748_v21, %v2588_v6  ;;  %v1272_v25 = vpop.f32.mrf.mxu1 }
 0x2ab   : > { %v2753_v12 = vmul.f32 %v10650_v38, %v10641_v0  ;;  %v8465_v29 = vadd.f32 %v2749_v13, %v2589_v15  ;;  %v2890_v52 = vrot.slane %v8459_v1, 4  ;;  %v2896_v58 = vrot.slane %v8461_v42, 4 }
 0x2ac   : > { %v8469_v8 = vadd.f32 %v2750_v41, %v2590_v36  ;;  %v8471_v4 = vadd.f32 %v2751_v2, %v2591_v37  ;;  %v8473_v53 = vadd.f32 %v2752_v16, %v2592_v39  ;;  %v2902_v31 = vrot.slane %v8463_v23, 4  ;;  %v8489_v0 = vpop.f32.mrf.mxu1 }
 0x2ad   : > { %v8475_v17 = vadd.f32 %v2753_v12, %v2593_v47  ;;  %v2908_v26 = vrot.slane %v8465_v29, 4  ;;  %v2891_v36 = vmax.f32 %v8459_v1, %v2890_v52  ;;  %v2897_v37 = vmax.f32 %v8461_v42, %v2896_v58  ;;  %10652 = vst [vmem:[#allocation100_spill] sm:$0xff] %v8489_v0 }
 0x2ae   : > { %v2914_v63 = vrot.slane %v8469_v8, 4  ;;  %v2920_v11 = vrot.slane %v8471_v4, 4  ;;  %v2926_v6 = vrot.slane %v8473_v53, 4  ;;  %v2903_v39 = vmax.f32 %v8463_v23, %v2902_v31  ;;  %v1277_v41 = vpop.f32.mrf.mxu1 }
 0x2af   : > { %v2932_v15 = vrot.slane %v8475_v17, 4  ;;  %v2909_v47 = vmax.f32 %v8465_v29, %v2908_v26  ;;  %v2892_v19 = vrot.slane %v2891_v36, 2  ;;  %v2898_v13 = vrot.slane %v2897_v37, 2 }
 0x2b0   : > { %v2915_v35 = vmax.f32 %v8469_v8, %v2914_v63  ;;  %v2921_v44 = vmax.f32 %v8471_v4, %v2920_v11  ;;  %v2927_v9 = vmax.f32 %v8473_v53, %v2926_v6  ;;  %v2904_v32 = vrot.slane %v2903_v39, 2  ;;  %v8495_v31 = vpop.f32.mrf.mxu1 }
 0x2b1   : > { %v2933_v21 = vmax.f32 %v8475_v17, %v2932_v15  ;;  %v2910_v59 = vrot.slane %v2909_v47, 2  ;;  %v2893_v38 = vmax.f32 %v2891_v36, %v2892_v19  ;;  %v2899_v12 = vmax.f32 %v2897_v37, %v2898_v13  ;;  %10653 = vst [vmem:[#allocation101_spill] sm:$0xff] %v8495_v31 }
 0x2b2   : > { %v2916_v7 = vrot.slane %v2915_v35, 2  ;;  %v2922_v2 = vrot.slane %v2921_v44, 2  ;;  %v2928_v33 = vrot.slane %v2927_v9, 2  ;;  %v2905_v52 = vmax.f32 %v2903_v39, %v2904_v32  ;;  %v1280_v40 = vpop.f32.mrf.mxu1 }
 0x2b3   : > { %v2934_v16 = vrot.slane %v2933_v21, 2  ;;  %v2911_v58 = vmax.f32 %v2909_v47, %v2910_v59  ;;  %v2894_v6 = vrot.slane %v2893_v38, 1  ;;  %v2900_v15 = vrot.slane %v2899_v12, 1 }
 0x2b4   : > { %v2917_v26 = vmax.f32 %v2915_v35, %v2916_v7  ;;  %v2923_v25 = vmax.f32 %v2921_v44, %v2922_v2  ;;  %v2929_v63 = vmax.f32 %v2927_v9, %v2928_v33  ;;  %v2906_v30 = vrot.slane %v2905_v52, 1  ;;  %v8497_v47 = vpop.f32.mrf.mxu1  ;;  %v10655_v33 = vld [vmem:[#allocation55_spill] sm:$0xff] }
 0x2b5   : > { %v2935_v11 = vmax.f32 %v2933_v21, %v2934_v16  ;;  %v2912_v57 = vrot.slane %v2911_v58, 1  ;;  %v2895_v5 = vmax.f32 %v2893_v38, %v2894_v6  ;;  %v2901_v36 = vmax.f32 %v2899_v12, %v2900_v15  ;;  %10654 = vst [vmem:[#allocation102_spill] sm:$0xff] %v8497_v47  ;;  %v10665_v15 = vld [vmem:[#allocation31_spill] sm:$0xff] }
 0x2b6   : > { %v2918_v41 = vrot.slane %v2917_v26, 1  ;;  %v2924_v49 = vrot.slane %v2923_v25, 1  ;;  %v2930_v43 = vrot.slane %v2929_v63, 1  ;;  %v2907_v37 = vmax.f32 %v2905_v52, %v2906_v30  ;;  %v1285_v59 = vpop.f32.mrf.mxu1  ;;  %v10661_v52 = vld [vmem:[#allocation29_spill] sm:$0xff] }
 0x2b7   : > { %v2936_v0 = vrot.slane %v2935_v11, 1  ;;  %v2913_v39 = vmax.f32 %v2911_v58, %v2912_v57  ;;  %v3002_v21 = vsub.f32 %v8459_v1, %v2895_v5  ;;  %v3003_v13 = vsub.f32 %v8461_v42, %v2901_v36  ;;  %v10656_v1 = vld [vmem:[#allocation27_spill] sm:$0xff] }
 0x2b8   : > { %v2919_v19 = vmax.f32 %v2917_v26, %v2918_v41  ;;  %v2925_v35 = vmax.f32 %v2923_v25, %v2924_v49  ;;  %v2931_v44 = vmax.f32 %v2929_v63, %v2930_v43  ;;  %v3004_v40 = vsub.f32 %v8463_v23, %v2907_v37  ;;  %v8511_v23 = vpop.f32.mrf.mxu1  ;;  %v10663_v63 = vld [vmem:[#allocation30_spill] sm:$0xff]  ;;  %v10667_v37 = vld [vmem:[#allocation33_spill] sm:$0xff] }
 0x2b9   : > { %v2937_v9 = vmax.f32 %v2935_v11, %v2936_v0  ;;  %v3005_v32 = vsub.f32 %v8465_v29, %v2913_v39  ;;  %v3050_v49 = vmul.f32 1.442695, %v3002_v21  ;;  %v3052_v43 = vmul.f32 1.442695, %v3003_v13  ;;  %10658 = vst [vmem:[#allocation55_spill] sm:$0xff] %v8511_v23  ;;  %v10671_v21 = vld [vmem:[#allocation36_spill] sm:$0xff] }
 0x2ba   : > { %v3006_v7 = vsub.f32 %v8469_v8, %v2919_v19  ;;  %v3007_v30 = vsub.f32 %v8471_v4, %v2925_v35  ;;  %v3008_v57 = vsub.f32 %v8473_v53, %v2931_v44  ;;  %v3054_v0 = vmul.f32 1.442695, %v3004_v40  ;;  %v10659_v8 = vld [vmem:[#allocation28_spill] sm:$0xff]  ;;  %v1288_v25 = vpop.f32.mrf.mxu1  ;;  %v10669_v35 = vld [vmem:[#allocation34_spill] sm:$0xff] }
 0x2bb   : > { %v3009_v2 = vsub.f32 %v8475_v17, %v2937_v9  ;;  %v10657_v42 = vrot.slane %v10656_v1, %v6693_v51  ;;  %v3056_v29 = vmul.f32 1.442695, %v3005_v32  ;;  %v10660_v4 = vrot.slane %v10659_v8, %v6693_v51  ;;  %v10673_v32 = vld [vmem:[#allocation70_spill] sm:$0xff] }
 0x2bc   : > { %v3058_v16 = vmul.f32 1.442695, %v3006_v7  ;;  %v3060_v38 = vmul.f32 1.442695, %v3007_v30  ;;  %6191 = vpow2.f32 %v3050_v49  ;;  %v3062_v17 = vmul.f32 1.442695, %v3008_v57 }
 0x2bd   : > { %v1442_v5 = vmul.f32 %v10657_v42, %v10655_v33  ;;  %v1443_v53 = vmul.f32 %v10660_v4, %v10655_v33  ;;  %v3064_v12 = vmul.f32 1.442695, %v3009_v2  ;;  %v10662_v58 = vrot.slane %v10661_v52, %v6693_v51  ;;  %v10675_v7 = vld [vmem:[#allocation72_spill] sm:$0xff]  ;;  %v10677_v57 = vld [vmem:[#allocation74_spill] sm:$0xff]  ;;  %v10679_v49 = vld [vmem:[#allocation75_spill] sm:$0xff] }
 0x2be   : > { %6193 = vpow2.f32 %v3052_v43  ;;  %v10664_v11 = vrot.slane %v10663_v63, %v6693_v51  ;;  %v10666_v41 = vrot.slane %v10665_v15, %v6693_v51  ;;  %v10668_v39 = vrot.slane %v10667_v37, %v6693_v51 }
 0x2bf   : > { %v1444_v26 = vmul.f32 %v10662_v58, %v10655_v33  ;;  %6195 = vpow2.f32 %v3054_v0  ;;  %v10670_v44 = vrot.slane %v10669_v35, %v6693_v51  ;;  %v10672_v13 = vrot.slane %v10671_v21, %v6693_v51  ;;  %v10681_v0 = vld [vmem:[#allocation76_spill] sm:$0xff] }
 0x2c0   : > { %v1445_v6 = vmul.f32 %v10664_v11, %v10655_v33  ;;  %v1446_v36 = vmul.f32 %v10666_v41, %v10655_v33  ;;  %v1447_v19 = vmul.f32 %v10668_v39, %v10655_v33  ;;  %v8543_v59 = vmul.f32 %v8263_v3, %v10673_v32  ;;  %v10683_v3 = vld [vmem:[#allocation78_spill] sm:$0xff]  ;;  %v10694_v39 = vld [vmem:[#allocation57_spill] sm:$0xff] }
 0x2c1   : > { %v1448_v9 = vmul.f32 %v10670_v44, %v10655_v33  ;;  %v1449_v40 = vmul.f32 %v10672_v13, %v10655_v33  ;;  %6197 = vpow2.f32 %v3056_v29  ;;  %v8547_v30 = vmul.f32 %v8277_v61, %v10675_v7 }
 0x2c2   : > { %10674 = vst [vmem:[#allocation27_spill] sm:$0xff] %v8543_v59  ;;  %v8551_v2 = vmul.f32 %v8295_v45, %v10677_v57  ;;  %v8555_v43 = vmul.f32 %v8313_v18, %v10679_v49  ;;  %6199 = vpow2.f32 %v3058_v16  ;;  %v8559_v33 = vmul.f32 %v8317_v24, %v10681_v0  ;;  %v10685_v16 = vld [vmem:[#allocation43_spill] sm:$0xff] }
 0x2c3   : > { %10676 = vst [vmem:[#allocation28_spill] sm:$0xff] %v8547_v30  ;;  %v8563_v42 = vmul.f32 %v8319_v46, %v10683_v3  ;;  %v8567_v61 = vmul.f32 %v8337_v60, %v8146_v14  ;;  %6201 = vpow2.f32 %v3060_v38  ;;  %v8571_v45 = vmul.f32 %v8355_v20, %v8153_v28 }
 0x2c4   : > { %10678 = vst [vmem:[#allocation29_spill] sm:$0xff] %v8551_v2  ;;  %10680 = vst [vmem:[#allocation30_spill] sm:$0xff] %v8555_v43  ;;  %v3373_v18 = vrot.slane %v8543_v59, %v6693_v51  ;;  %v3377_v24 = vrot.slane %v8547_v30, %v6693_v51  ;;  %6203 = vpow2.f32 %v3062_v17  ;;  %v3381_v46 = vrot.slane %v8551_v2, %v6693_v51 }
 0x2c5   : > { %10682 = vst [vmem:[#allocation31_spill] sm:$0xff] %v8559_v33  ;;  %10684 = vst [vmem:[#allocation33_spill] sm:$0xff] %v8563_v42  ;;  %v3385_v29 = vrot.slane %v8555_v43, %v6693_v51  ;;  %v3389_v14 = vrot.slane %v8559_v33, %v6693_v51  ;;  %6205 = vpow2.f32 %v3064_v12  ;;  %v3393_v28 = vrot.slane %v8563_v42, %v6693_v51 }
 0x2c6   : > { %v3397_v60 = vrot.slane %v8567_v61, %v6693_v51  ;;  %v3401_v20 = vrot.slane %v8571_v45, %v6693_v51  ;;  %v8590_v38 = vmul.f32 %v3373_v18, %v10685_v16  ;;  %v8593_v4 = vmul.f32 %v3377_v24, %v10685_v16 }
 0x2c7   : > { %v8596_v17 = vmul.f32 %v3381_v46, %v10685_v16  ;;  %v8599_v12 = vmul.f32 %v3385_v29, %v10685_v16  ;;  %v8602_v58 = vmul.f32 %v3389_v14, %v10685_v16  ;;  %v8605_v25 = vmul.f32 %v3393_v28, %v10685_v16 }
 0x2c8   : > { %10686 = vst [vmem:[#allocation34_spill] sm:$0xff] %v8590_v38  ;;  %10687 = vst [vmem:[#allocation36_spill] sm:$0xff] %v8593_v4  ;;  %v8608_v11 = vmul.f32 %v3397_v60, %v10685_v16  ;;  %v8611_v41 = vmul.f32 %v3401_v20, %v10685_v16  ;;  %v10695_v44 = vrot.slane %v10656_v1, %v10547_v54 }
 0x2c9   : > { %10688 = vst [vmem:[#allocation70_spill] sm:$0xff] %v8596_v17  ;;  %10689 = vst [vmem:[#allocation72_spill] sm:$0xff] %v8599_v12  ;;  %v10696_v32 = vrot.slane %v10659_v8, %v10547_v54  ;;  %v10697_v57 = vrot.slane %v10661_v52, %v10547_v54  ;;  %v10698_v0 = vrot.slane %v10663_v63, %v10547_v54 }
 0x2ca   : > { %10690 = vst [vmem:[#allocation74_spill] sm:$0xff] %v8602_v58  ;;  %10691 = vst [vmem:[#allocation75_spill] sm:$0xff] %v8605_v25  ;;  %v1602_v13 = vmul.f32 %v10695_v44, %v10694_v39  ;;  %v10699_v18 = vrot.slane %v10665_v15, %v10547_v54  ;;  %v10700_v46 = vrot.slane %v10667_v37, %v10547_v54 }
 0x2cb   : > { %10692 = vst [vmem:[#allocation76_spill] sm:$0xff] %v8608_v11  ;;  %10693 = vst [vmem:[#allocation78_spill] sm:$0xff] %v8611_v41  ;;  %v1603_v7 = vmul.f32 %v10696_v32, %v10694_v39  ;;  %v1604_v49 = vmul.f32 %v10697_v57, %v10694_v39  ;;  %v1605_v3 = vmul.f32 %v10698_v0, %v10694_v39  ;;  %v8653_v0 = vpop.eup %6191 }
 0x2cc   : > { %v1606_v24 = vmul.f32 %v10699_v18, %v10694_v39  ;;  %v1607_v29 = vmul.f32 %v10700_v46, %v10694_v39  ;;  %v10701_v14 = vrot.slane %v10669_v35, %v10547_v54  ;;  %v10702_v60 = vrot.slane %v10671_v21, %v10547_v54  ;;  %10703 = vst [vmem:[#allocation43_spill] sm:$0xff] %v8653_v0  ;;  %v8663_v38 = vpop.eup %6193 }
 0x2cd   : > { %v8645_v16 = vadd.f32 %v1602_v13, %v1442_v5  ;;  %v8647_v44 = vadd.f32 %v1603_v7, %v1443_v53  ;;  %v8649_v32 = vadd.f32 %v1604_v49, %v1444_v26  ;;  %v8651_v57 = vadd.f32 %v1605_v3, %v1445_v6  ;;  %10704 = vst [vmem:[#allocation57_spill] sm:$0xff] %v8663_v38 }
 0x2ce   : > { %v1608_v28 = vmul.f32 %v10701_v14, %v10694_v39  ;;  %v1609_v20 = vmul.f32 %v10702_v60, %v10694_v39  ;;  %v8655_v18 = vadd.f32 %v1606_v24, %v1446_v36  ;;  %v8657_v46 = vadd.f32 %v1607_v29, %v1447_v19  ;;  %v8672_v36 = vpop.eup %6195 }
 0x2cf   : > { %v3178_v5 = vrot.slane %v8653_v0, 4  ;;  %v3533_v53 = vrot.slane %v8543_v59, %v10547_v54  ;;  %v3537_v26 = vrot.slane %v8547_v30, %v10547_v54  ;;  %v3541_v6 = vrot.slane %v8551_v2, %v10547_v54  ;;  %10705 = vst [vmem:[#allocation103_spill] sm:$0xff] %v8672_v36  ;;  %v8681_v13 = vpop.eup %6197 }
 0x2d0   : > { %v8659_v14 = vadd.f32 %v1608_v28, %v1448_v9  ;;  %v8661_v4 = vadd.f32 %v1609_v20, %v1449_v40  ;;  %v3184_v19 = vrot.slane %v8663_v38, 4  ;;  %v3545_v9 = vrot.slane %v8555_v43, %v10547_v54  ;;  %10706 = vst [vmem:[#allocation104_spill] sm:$0xff] %v8681_v13  ;;  %v8689_v29 = vpop.eup %6199  ;;  %v10708_v20 = vld [vmem:[#allocation51_spill] sm:$0xff] }
 0x2d1   : > { %v3549_v40 = vrot.slane %v8559_v33, %v10547_v54  ;;  %v3553_v39 = vrot.slane %v8563_v42, %v10547_v54  ;;  %v3179_v7 = vadd.f32 %v8653_v0, %v3178_v5  ;;  %v3190_v49 = vrot.slane %v8672_v36, 4  ;;  %10707 = vst [vmem:[#allocation105_spill] sm:$0xff] %v8689_v29  ;;  %v8699_v5 = vpop.eup %6201 }
 0x2d2   : > { %v3557_v3 = vrot.slane %v8567_v61, %v10547_v54  ;;  %v3561_v24 = vrot.slane %v8571_v45, %v10547_v54  ;;  %v3185_v28 = vadd.f32 %v8663_v38, %v3184_v19  ;;  %v3196_v60 = vrot.slane %v8681_v13, 4  ;;  %10711 = vst [vmem:[#allocation107_spill] sm:$0xff] %v8699_v5  ;;  %v8706_v10 = vpop.eup %6203 }
 0x2d3   : > { %v8694_v12 = vmul.f32 %v3533_v53, %v10708_v20  ;;  %v8697_v17 = vmul.f32 %v3537_v26, %v10708_v20  ;;  %v3180_v23 = vrot.slane %v3179_v7, 2  ;;  %v3191_v47 = vadd.f32 %v8672_v36, %v3190_v49 }
 0x2d4   : > { %v3202_v31 = vrot.slane %v8689_v29, 4  ;;  %v8704_v22 = vmul.f32 %v3541_v6, %v10708_v20  ;;  %v3186_v19 = vrot.slane %v3185_v28, 2  ;;  %v3197_v48 = vadd.f32 %v8681_v13, %v3196_v60 }
 0x2d5   : > { %10709 = vst [vmem:[#allocation51_spill] sm:$0xff] %v8694_v12  ;;  %10710 = vst [vmem:[#allocation106_spill] sm:$0xff] %v8697_v17  ;;  %v3208_v53 = vrot.slane %v8699_v5, 4  ;;  %v8711_v26 = vmul.f32 %v3545_v9, %v10708_v20  ;;  %v8713_v17 = vpop.eup %6205  ;;  %v3181_v12 = vadd.f32 %v3180_v23, %v3179_v7  ;;  %v3192_v25 = vrot.slane %v3191_v47, 2 }
 0x2d6   : > { %10712 = vst [vmem:[#allocation108_spill] sm:$0xff] %v8704_v22  ;;  %v3203_v49 = vadd.f32 %v8689_v29, %v3202_v31  ;;  %v3214_v58 = vrot.slane %v8706_v10, 4  ;;  %v3187_v6 = vadd.f32 %v3186_v19, %v3185_v28  ;;  %v3198_v22 = vrot.slane %v3197_v48, 2 }
 0x2d7   : > { %10713 = vst [vmem:[#allocation109_spill] sm:$0xff] %v8711_v26  ;;  %v3209_v41 = vadd.f32 %v8699_v5, %v3208_v53  ;;  %v3220_v11 = vrot.slane %v8713_v17, 4  ;;  %v3182_v60 = vrot.slane %v3181_v12, 1  ;;  %v3193_v54 = vadd.f32 %v3192_v25, %v3191_v47 }
 0x2d8   : > { %v3204_v51 = vrot.slane %v3203_v49, 2  ;;  %v3215_v9 = vadd.f32 %v8706_v10, %v3214_v58  ;;  %v3188_v26 = vrot.slane %v3187_v6, 1  ;;  %v3199_v13 = vadd.f32 %v3198_v22, %v3197_v48 }
 0x2d9   : > { %v3210_v36 = vrot.slane %v3209_v41, 2  ;;  %v3221_v23 = vadd.f32 %v8713_v17, %v3220_v11  ;;  %v3183_v7 = vadd.f32 %v3182_v60, %v3181_v12  ;;  %v3194_v31 = vrot.slane %v3193_v54, 1 }
 0x2da   : > { %v3205_v29 = vadd.f32 %v3204_v51, %v3203_v49  ;;  %v3216_v38 = vrot.slane %v3215_v9, 2  ;;  %v3189_v28 = vadd.f32 %v3188_v26, %v3187_v6  ;;  %v3200_v19 = vrot.slane %v3199_v13, 1 }
 0x2db   : > { %v3211_v0 = vadd.f32 %v3210_v36, %v3209_v41  ;;  %v3222_v53 = vrot.slane %v3221_v23, 2  ;;  %v3195_v5 = vadd.f32 %v3194_v31, %v3193_v54  ;;  %6207 = vrcp.f32 %v3183_v7 }
 0x2dc   : > { %v3206_v27 = vrot.slane %v3205_v29, 1  ;;  %v3217_v62 = vadd.f32 %v3216_v38, %v3215_v9  ;;  %v3201_v47 = vadd.f32 %v3200_v19, %v3199_v13  ;;  %6209 = vrcp.f32 %v3189_v28  ;;  %v10716_v13 = vld [vmem:[#allocation59_spill] sm:$0xff] }
 0x2dd   : > { %v3212_v25 = vrot.slane %v3211_v0, 1  ;;  %v3223_v58 = vadd.f32 %v3222_v53, %v3221_v23  ;;  %6211 = vrcp.f32 %v3195_v5  ;;  %v8722_v12 = vmul.f32 %v3549_v40, %v10708_v20 }
 0x2de   : > { %v3207_v48 = vadd.f32 %v3206_v27, %v3205_v29  ;;  %v3218_v22 = vrot.slane %v3217_v62, 1  ;;  %6213 = vrcp.f32 %v3201_v47  ;;  %v8725_v41 = vmul.f32 %v3553_v39, %v10708_v20 }
 0x2df   : > { %10714 = vst [vmem:[#allocation110_spill] sm:$0xff] %v8722_v12  ;;  %v3213_v51 = vadd.f32 %v3212_v25, %v3211_v0  ;;  %v3224_v11 = vrot.slane %v3223_v58, 1  ;;  %v8728_v38 = vmul.f32 %v3557_v3, %v10708_v20  ;;  %v8731_v36 = vmul.f32 %v3561_v24, %v10708_v20 }
 0x2e0   : > { %10715 = vst [vmem:[#allocation111_spill] sm:$0xff] %v8725_v41  ;;  %v3219_v54 = vadd.f32 %v3218_v22, %v3217_v62  ;;  %6215 = vrcp.f32 %v3207_v48  ;;  %v10717_v40 = vrot.slane %v10656_v1, %v10583_v50  ;;  %v10718_v39 = vrot.slane %v10659_v8, %v10583_v50 }
 0x2e1   : > { %v3225_v27 = vadd.f32 %v3224_v11, %v3223_v58  ;;  %6217 = vrcp.f32 %v3213_v51  ;;  %v10719_v62 = vrot.slane %v10661_v52, %v10583_v50  ;;  %v10720_v24 = vrot.slane %v10663_v63, %v10583_v50 }
 0x2e2   : > { %v1794_v0 = vmul.f32 %v10717_v40, %v10716_v13  ;;  %v1795_v29 = vmul.f32 %v10718_v39, %v10716_v13  ;;  %6219 = vrcp.f32 %v3219_v54  ;;  %v10721_v5 = vrot.slane %v10665_v15, %v10583_v50 }
 0x2e3   : > { %v1796_v3 = vmul.f32 %v10719_v62, %v10716_v13  ;;  %v1797_v20 = vmul.f32 %v10720_v24, %v10716_v13  ;;  %6221 = vrcp.f32 %v3225_v27  ;;  %v10722_v49 = vrot.slane %v10667_v37, %v10583_v50 }
 0x2e4   : > { %v1798_v26 = vmul.f32 %v10721_v5, %v10716_v13  ;;  %v10723_v60 = vrot.slane %v10669_v35, %v10583_v50  ;;  %v10724_v23 = vrot.slane %v10671_v21, %v10583_v50  ;;  %v1826_v31 = vadd.f32 %v1794_v0, %v8645_v16 }
 0x2e5   : > { %v1799_v6 = vmul.f32 %v10722_v49, %v10716_v13  ;;  %v1827_v28 = vadd.f32 %v1795_v29, %v8647_v44  ;;  %v1828_v19 = vadd.f32 %v1796_v3, %v8649_v32  ;;  %v1829_v53 = vadd.f32 %v1797_v20, %v8651_v57  ;;  %v10732_v3 = vld [vmem:[#allocation61_spill] sm:$0xff] }
 0x2e6   : > { %v1800_v9 = vmul.f32 %v10723_v60, %v10716_v13  ;;  %v1801_v7 = vmul.f32 %v10724_v23, %v10716_v13  ;;  %v1830_v47 = vadd.f32 %v1798_v26, %v8655_v18  ;;  %v3725_v22 = vrot.slane %v8543_v59, %v10583_v50 }
 0x2e7   : > { %v1831_v25 = vadd.f32 %v1799_v6, %v8657_v46  ;;  %v3729_v16 = vrot.slane %v8547_v30, %v10583_v50  ;;  %v3733_v44 = vrot.slane %v8551_v2, %v10583_v50  ;;  %v3737_v32 = vrot.slane %v8555_v43, %v10583_v50 }
 0x2e8   : > { %v1832_v58 = vadd.f32 %v1800_v9, %v8659_v14  ;;  %v1833_v48 = vadd.f32 %v1801_v7, %v8661_v4  ;;  %v3741_v57 = vrot.slane %v8559_v33, %v10583_v50  ;;  %v3745_v18 = vrot.slane %v8563_v42, %v10583_v50  ;;  %v10725_v14 = vld [vmem:[#allocation53_spill] sm:$0xff]  ;;  %v8801_v13 = vpop.eup %6207 }
 0x2e9   : > { %v3749_v4 = vrot.slane %v8567_v61, %v10583_v50  ;;  %v3753_v46 = vrot.slane %v8571_v45, %v10583_v50  ;;  %v8790_v51 = vmul.f32 %v3725_v22, %v10725_v14  ;;  %v8793_v11 = vmul.f32 %v3729_v16, %v10725_v14  ;;  %v8815_v62 = vpop.eup %6209 }
 0x2ea   : > { %v8796_v54 = vmul.f32 %v3733_v44, %v10725_v14  ;;  %v8799_v27 = vmul.f32 %v3737_v32, %v10725_v14  ;;  %v8804_v40 = vmul.f32 %v3741_v57, %v10725_v14  ;;  %v8807_v0 = vmul.f32 %v3745_v18, %v10725_v14  ;;  %v8833_v23 = vpop.eup %6211 }
 0x2eb   : > { %10726 = vst [vmem:[#allocation59_spill] sm:$0xff] %v8790_v51  ;;  %10727 = vst [vmem:[#allocation53_spill] sm:$0xff] %v8793_v11  ;;  %v8810_v39 = vmul.f32 %v3749_v4, %v10725_v14  ;;  %v8813_v29 = vmul.f32 %v3753_v46, %v10725_v14  ;;  %v10733_v24 = vrot.slane %v10656_v1, %v10603_v34  ;;  %v8851_v46 = vpop.eup %6213 }
 0x2ec   : > { %10728 = vst [vmem:[#allocation112_spill] sm:$0xff] %v8796_v54  ;;  %10729 = vst [vmem:[#allocation113_spill] sm:$0xff] %v8799_v27  ;;  %v10734_v5 = vrot.slane %v10659_v8, %v10603_v34  ;;  %v10735_v49 = vrot.slane %v10661_v52, %v10603_v34  ;;  %v10736_v60 = vrot.slane %v10663_v63, %v10603_v34  ;;  %v10750_v54 = vld [vmem:[#allocation48_spill] sm:$0xff] }
 0x2ed   : > { %10730 = vst [vmem:[#allocation114_spill] sm:$0xff] %v8804_v40  ;;  %10731 = vst [vmem:[#allocation115_spill] sm:$0xff] %v8807_v0  ;;  %v1986_v20 = vmul.f32 %v10733_v24, %v10732_v3  ;;  %v10737_v7 = vrot.slane %v10665_v15, %v10603_v34  ;;  %v10738_v16 = vrot.slane %v10667_v37, %v10603_v34 }
 0x2ee   : > { %v1987_v26 = vmul.f32 %v10734_v5, %v10732_v3  ;;  %v1988_v6 = vmul.f32 %v10735_v49, %v10732_v3  ;;  %v1989_v9 = vmul.f32 %v10736_v60, %v10732_v3  ;;  %v10739_v32 = vrot.slane %v10669_v35, %v10603_v34  ;;  %v8853_v60 = vpop.eup %6215 }
 0x2ef   : > { %v1990_v22 = vmul.f32 %v10737_v7, %v10732_v3  ;;  %v1991_v44 = vmul.f32 %v10738_v16, %v10732_v3  ;;  %v10740_v18 = vrot.slane %v10671_v21, %v10603_v34  ;;  %v2018_v14 = vadd.f32 %v1986_v20, %v1826_v31  ;;  %v8855_v30 = vpop.eup %6217 }
 0x2f0   : > { %v1992_v57 = vmul.f32 %v10739_v32, %v10732_v3  ;;  %v2019_v24 = vadd.f32 %v1987_v26, %v1827_v28  ;;  %v2020_v5 = vadd.f32 %v1988_v6, %v1828_v19  ;;  %v2021_v49 = vadd.f32 %v1989_v9, %v1829_v53  ;;  %v10741_v32 = vld [vmem:[#allocation22_spill] sm:$0xff] }
 0x2f1   : > { %v1993_v4 = vmul.f32 %v10740_v18, %v10732_v3  ;;  %v2022_v7 = vadd.f32 %v1990_v22, %v1830_v47  ;;  %v2023_v16 = vadd.f32 %v1991_v44, %v1831_v25  ;;  %v10742_v59 = vrot.slane %v10656_v1, %v6701_v55 }
 0x2f2   : > { %v2024_v11 = vadd.f32 %v1992_v57, %v1832_v58  ;;  %v10743_v31 = vrot.slane %v10659_v8, %v6701_v55  ;;  %v10744_v19 = vrot.slane %v10661_v52, %v6701_v55  ;;  %v10745_v47 = vrot.slane %v10663_v63, %v6701_v55  ;;  %v8873_v58 = vpop.eup %6219 }
 0x2f3   : > { %v2025_v51 = vadd.f32 %v1993_v4, %v1833_v48  ;;  %v2178_v27 = vmul.f32 %v10742_v59, %v10741_v32  ;;  %v10746_v59 = vrot.slane %v10665_v15, %v6701_v55  ;;  %v10747_v3 = vrot.slane %v10667_v37, %v6701_v55  ;;  %v8891_v44 = vpop.eup %6221 }
 0x2f4   : > { %v2179_v28 = vmul.f32 %v10743_v31, %v10741_v32  ;;  %v2180_v53 = vmul.f32 %v10744_v19, %v10741_v32  ;;  %v2181_v25 = vmul.f32 %v10745_v47, %v10741_v32  ;;  %v10748_v26 = vrot.slane %v10669_v35, %v6701_v55 }
 0x2f5   : > { %v2182_v48 = vmul.f32 %v10746_v59, %v10741_v32  ;;  %v2183_v20 = vmul.f32 %v10747_v3, %v10741_v32  ;;  %v10749_v9 = vrot.slane %v10671_v21, %v6701_v55  ;;  %v2210_v57 = vadd.f32 %v2178_v27, %v2018_v14 }
 0x2f6   : > { %v2184_v6 = vmul.f32 %v10748_v26, %v10741_v32  ;;  %v2211_v18 = vadd.f32 %v2179_v28, %v2019_v24  ;;  %v2212_v4 = vadd.f32 %v2180_v53, %v2020_v5  ;;  %v2213_v31 = vadd.f32 %v2181_v25, %v2021_v49 }
 0x2f7   : > { %v2185_v22 = vmul.f32 %v10749_v9, %v10741_v32  ;;  %v2214_v19 = vadd.f32 %v2182_v48, %v2022_v7  ;;  %v2215_v47 = vadd.f32 %v2183_v20, %v2023_v16  ;;  %v10751_v43 = vrot.slane %v10656_v1, %v6703_v56 }
 0x2f8   : > { %v2216_v59 = vadd.f32 %v2184_v6, %v2024_v11  ;;  %v10752_v2 = vrot.slane %v10659_v8, %v6703_v56  ;;  %v10753_v27 = vrot.slane %v10661_v52, %v6703_v56  ;;  %v10754_v11 = vrot.slane %v10663_v63, %v6703_v56 }
 0x2f9   : > { %v2217_v3 = vadd.f32 %v2185_v22, %v2025_v51  ;;  %v2370_v26 = vmul.f32 %v10751_v43, %v10750_v54  ;;  %v10755_v24 = vrot.slane %v10665_v15, %v6703_v56  ;;  %v10756_v5 = vrot.slane %v10667_v37, %v6703_v56 }
 0x2fa   : > { %v2371_v32 = vmul.f32 %v10752_v2, %v10750_v54  ;;  %v2372_v14 = vmul.f32 %v10753_v27, %v10750_v54  ;;  %v2373_v51 = vmul.f32 %v10754_v11, %v10750_v54  ;;  %v10757_v49 = vrot.slane %v10669_v35, %v6703_v56  ;;  %v10759_v11 = vld [vmem:[#allocation69_spill] sm:$0xff] }
 0x2fb   : > { %v2374_v43 = vmul.f32 %v10755_v24, %v10750_v54  ;;  %v2375_v2 = vmul.f32 %v10756_v5, %v10750_v54  ;;  %v10758_v16 = vrot.slane %v10671_v21, %v6703_v56  ;;  %v2402_v53 = vadd.f32 %v2370_v26, %v2210_v57  ;;  %v10760_v24 = vld [vmem:[#allocation20_spill] sm:$0xff] }
 0x2fc   : > { %v2376_v7 = vmul.f32 %v10757_v49, %v10750_v54  ;;  %v2403_v25 = vadd.f32 %v2371_v32, %v2211_v18  ;;  %v2404_v48 = vadd.f32 %v2372_v14, %v2212_v4  ;;  %v2405_v20 = vadd.f32 %v2373_v51, %v2213_v31 }
 0x2fd   : > { %v2377_v28 = vmul.f32 %v10758_v16, %v10750_v54  ;;  %v2406_v6 = vadd.f32 %v2374_v43, %v2214_v19  ;;  %v2407_v9 = vadd.f32 %v2375_v2, %v2215_v47  ;;  %v10761_v5 = vrot.slane %v10656_v1, %v10760_v24 }
 0x2fe   : > { %v2408_v22 = vadd.f32 %v2376_v7, %v2216_v59  ;;  %v10762_v49 = vrot.slane %v10659_v8, %v10760_v24  ;;  %v10763_v54 = vrot.slane %v10661_v52, %v10760_v24  ;;  %v10764_v18 = vrot.slane %v10663_v63, %v10760_v24 }
 0x2ff   : > { %v2409_v27 = vadd.f32 %v2377_v28, %v2217_v3  ;;  %v2562_v50 = vmul.f32 %v10761_v5, %v10759_v11  ;;  %v10765_v31 = vrot.slane %v10665_v15, %v10760_v24  ;;  %v10766_v47 = vrot.slane %v10667_v37, %v10760_v24 }
 0x300   : > { %v2563_v42 = vmul.f32 %v10762_v49, %v10759_v11  ;;  %v2564_v57 = vmul.f32 %v10763_v54, %v10759_v11  ;;  %v2565_v4 = vmul.f32 %v10764_v18, %v10759_v11  ;;  %v10767_v3 = vrot.slane %v10669_v35, %v10760_v24  ;;  %v10769_v54 = vld [vmem:[#allocation71_spill] sm:$0xff]  ;;  %v10770_v18 = vld [vmem:[#allocation21_spill] sm:$0xff] }
 0x301   : > { %v2566_v19 = vmul.f32 %v10765_v31, %v10759_v11  ;;  %v2567_v59 = vmul.f32 %v10766_v47, %v10759_v11  ;;  %v10768_v32 = vrot.slane %v10671_v21, %v10760_v24  ;;  %v2594_v51 = vadd.f32 %v2562_v50, %v2402_v53 }
 0x302   : > { %v2568_v26 = vmul.f32 %v10767_v3, %v10759_v11  ;;  %v2595_v43 = vadd.f32 %v2563_v42, %v2403_v25  ;;  %v2596_v2 = vadd.f32 %v2564_v57, %v2404_v48  ;;  %v2597_v7 = vadd.f32 %v2565_v4, %v2405_v20 }
 0x303   : > { %v2569_v14 = vmul.f32 %v10768_v32, %v10759_v11  ;;  %v2598_v16 = vadd.f32 %v2566_v19, %v2406_v6  ;;  %v2599_v28 = vadd.f32 %v2567_v59, %v2407_v9  ;;  %v10771_v31 = vrot.slane %v10656_v1, %v10770_v18 }
 0x304   : > { %v2600_v5 = vadd.f32 %v2568_v26, %v2408_v22  ;;  %v10772_v3 = vrot.slane %v10659_v8, %v10770_v18  ;;  %v10773_v50 = vrot.slane %v10661_v52, %v10770_v18  ;;  %v10774_v53 = vrot.slane %v10663_v63, %v10770_v18 }
 0x305   : > { %v2601_v49 = vadd.f32 %v2569_v14, %v2409_v27  ;;  %v2754_v47 = vmul.f32 %v10771_v31, %v10769_v54  ;;  %v10775_v1 = vrot.slane %v10665_v15, %v10770_v18  ;;  %v10776_v8 = vrot.slane %v10667_v37, %v10770_v18 }
 0x306   : > { %v2755_v0 = vmul.f32 %v10772_v3, %v10769_v54  ;;  %v2756_v42 = vmul.f32 %v10773_v50, %v10769_v54  ;;  %v2757_v25 = vmul.f32 %v10774_v53, %v10769_v54  ;;  %v10777_v52 = vrot.slane %v10669_v35, %v10770_v18 }
 0x307   : > { %v2758_v48 = vmul.f32 %v10775_v1, %v10769_v54  ;;  %v2759_v20 = vmul.f32 %v10776_v8, %v10769_v54  ;;  %v10778_v63 = vrot.slane %v10671_v21, %v10770_v18  ;;  %v8989_v22 = vadd.f32 %v2754_v47, %v2594_v51 }
 0x308   : > { %v2760_v6 = vmul.f32 %v10777_v52, %v10769_v54  ;;  %v8991_v27 = vadd.f32 %v2755_v0, %v2595_v43  ;;  %v8993_v15 = vadd.f32 %v2756_v42, %v2596_v2  ;;  %v8995_v11 = vadd.f32 %v2757_v25, %v2597_v7 }
 0x309   : > { %v2761_v9 = vmul.f32 %v10778_v63, %v10769_v54  ;;  %v8997_v37 = vadd.f32 %v2758_v48, %v2598_v16  ;;  %v8999_v57 = vadd.f32 %v2759_v20, %v2599_v28  ;;  %v2938_v19 = vrot.slane %v8989_v22, 4 }
 0x30a   : > { %v9001_v4 = vadd.f32 %v2760_v6, %v2600_v5  ;;  %v2944_v21 = vrot.slane %v8991_v27, 4  ;;  %v2950_v59 = vrot.slane %v8993_v15, 4  ;;  %v2956_v0 = vrot.slane %v8995_v11, 4 }
 0x30b   : > { %v9003_v35 = vadd.f32 %v2761_v9, %v2601_v49  ;;  %v2962_v26 = vrot.slane %v8997_v37, 4  ;;  %v2968_v32 = vrot.slane %v8999_v57, 4  ;;  %v2939_v43 = vmax.f32 %v8989_v22, %v2938_v19 }
 0x30c   : > { %v2974_v14 = vrot.slane %v9001_v4, 4  ;;  %v2945_v2 = vmax.f32 %v8991_v27, %v2944_v21  ;;  %v2951_v7 = vmax.f32 %v8993_v15, %v2950_v59  ;;  %v2957_v16 = vmax.f32 %v8995_v11, %v2956_v0 }
 0x30d   : > { %v2980_v51 = vrot.slane %v9003_v35, 4  ;;  %v2963_v28 = vmax.f32 %v8997_v37, %v2962_v26  ;;  %v2969_v5 = vmax.f32 %v8999_v57, %v2968_v32  ;;  %v2940_v31 = vrot.slane %v2939_v43, 2 }
 0x30e   : > { %v2975_v49 = vmax.f32 %v9001_v4, %v2974_v14  ;;  %v2946_v47 = vrot.slane %v2945_v2, 2  ;;  %v2952_v3 = vrot.slane %v2951_v7, 2  ;;  %v2958_v50 = vrot.slane %v2957_v16, 2 }
 0x30f   : > { %v2981_v54 = vmax.f32 %v9003_v35, %v2980_v51  ;;  %v2964_v42 = vrot.slane %v2963_v28, 2  ;;  %v2970_v53 = vrot.slane %v2969_v5, 2  ;;  %v2941_v48 = vmax.f32 %v2939_v43, %v2940_v31 }
 0x310   : > { %v2976_v25 = vrot.slane %v2975_v49, 2  ;;  %v2947_v8 = vmax.f32 %v2945_v2, %v2946_v47  ;;  %v2953_v20 = vmax.f32 %v2951_v7, %v2952_v3  ;;  %v2959_v52 = vmax.f32 %v2957_v16, %v2958_v50 }
 0x311   : > { %v2982_v1 = vrot.slane %v2981_v54, 2  ;;  %v2965_v6 = vmax.f32 %v2963_v28, %v2964_v42  ;;  %v2971_v63 = vmax.f32 %v2969_v5, %v2970_v53  ;;  %v2942_v21 = vrot.slane %v2941_v48, 1 }
 0x312   : > { %v2977_v9 = vmax.f32 %v2975_v49, %v2976_v25  ;;  %v2948_v59 = vrot.slane %v2947_v8, 1  ;;  %v2954_v0 = vrot.slane %v2953_v20, 1  ;;  %v2960_v26 = vrot.slane %v2959_v52, 1 }
 0x313   : > { %v2983_v19 = vmax.f32 %v2981_v54, %v2982_v1  ;;  %v2966_v32 = vrot.slane %v2965_v6, 1  ;;  %v2972_v14 = vrot.slane %v2971_v63, 1  ;;  %v2943_v40 = vmax.f32 %v2941_v48, %v2942_v21  ;;  %v10789_v48 = vld [vmem:[#allocation107_spill] sm:$0xff] }
 0x314   : > { %v2978_v51 = vrot.slane %v2977_v9, 1  ;;  %v2949_v41 = vmax.f32 %v2947_v8, %v2948_v59  ;;  %v2955_v12 = vmax.f32 %v2953_v20, %v2954_v0  ;;  %v2961_v18 = vmax.f32 %v2959_v52, %v2960_v26  ;;  %v10793_v20 = vld [vmem:[#allocation16_spill] sm:$0xff] }
 0x315   : > { %v2984_v33 = vrot.slane %v2983_v19, 1  ;;  %v2967_v43 = vmax.f32 %v2965_v6, %v2966_v32  ;;  %v2973_v2 = vmax.f32 %v2971_v63, %v2972_v14  ;;  %v3010_v28 = vsub.f32 %v8989_v22, %v2943_v40  ;;  %v10794_v6 = vld [vmem:[#allocation73_spill] sm:$0xff] }
 0x316   : > { %v2979_v7 = vmax.f32 %v2977_v9, %v2978_v51  ;;  %v3011_v5 = vsub.f32 %v8991_v27, %v2949_v41  ;;  %v3012_v49 = vsub.f32 %v8993_v15, %v2955_v12  ;;  %v3013_v54 = vsub.f32 %v8995_v11, %v2961_v18  ;;  %v10781_v27 = vld [vmem:[#allocation57_spill] sm:$0xff] }
 0x317   : > { %v2985_v16 = vmax.f32 %v2983_v19, %v2984_v33  ;;  %v3014_v31 = vsub.f32 %v8997_v37, %v2967_v43  ;;  %v3015_v47 = vsub.f32 %v8999_v57, %v2973_v2  ;;  %v3066_v42 = vmul.f32 1.442695, %v3010_v28  ;;  %v10779_v33 = vld [vmem:[#allocation43_spill] sm:$0xff]  ;;  %v10803_v14 = vld [vmem:[#allocation17_spill] sm:$0xff] }
 0x318   : > { %v3016_v3 = vsub.f32 %v9001_v4, %v2979_v7  ;;  %v3068_v53 = vmul.f32 1.442695, %v3011_v5  ;;  %v3070_v25 = vmul.f32 1.442695, %v3012_v49  ;;  %v9031_v40 = vmul.f32 %v8801_v13, %v10779_v33  ;;  %v10783_v37 = vld [vmem:[#allocation103_spill] sm:$0xff]  ;;  %v10785_v4 = vld [vmem:[#allocation104_spill] sm:$0xff] }
 0x319   : > { %v3017_v50 = vsub.f32 %v9003_v35, %v2985_v16  ;;  %v3072_v41 = vmul.f32 1.442695, %v3013_v54  ;;  %v3074_v22 = vmul.f32 1.442695, %v3014_v31  ;;  %v3076_v12 = vmul.f32 1.442695, %v3015_v47 }
 0x31a   : > { %10780 = vst [vmem:[#allocation61_spill] sm:$0xff] %v9031_v40  ;;  %v9035_v18 = vmul.f32 %v8815_v62, %v10781_v27  ;;  %6223 = vpow2.f32 %v3066_v42  ;;  %v3078_v15 = vmul.f32 1.442695, %v3016_v3  ;;  %v9039_v57 = vmul.f32 %v8833_v23, %v10783_v37  ;;  %v10787_v13 = vld [vmem:[#allocation105_spill] sm:$0xff]  ;;  %v10804_v54 = vld [vmem:[#allocation80_spill] sm:$0xff] }
 0x31b   : > { %v3080_v11 = vmul.f32 1.442695, %v3017_v50  ;;  %6225 = vpow2.f32 %v3068_v53  ;;  %v9043_v35 = vmul.f32 %v8851_v46, %v10785_v4  ;;  %v9047_v1 = vmul.f32 %v8853_v60, %v10787_v13 }
 0x31c   : > { %10782 = vst [vmem:[#allocation22_spill] sm:$0xff] %v9035_v18  ;;  %10784 = vst [vmem:[#allocation48_spill] sm:$0xff] %v9039_v57  ;;  %v9051_v62 = vmul.f32 %v8855_v30, %v10789_v48  ;;  %6227 = vpow2.f32 %v3070_v25  ;;  %v9055_v8 = vmul.f32 %v8873_v58, %v8706_v10  ;;  %v9059_v23 = vmul.f32 %v8891_v44, %v8713_v17 }
 0x31d   : > { %10786 = vst [vmem:[#allocation69_spill] sm:$0xff] %v9043_v35  ;;  %10788 = vst [vmem:[#allocation20_spill] sm:$0xff] %v9047_v1  ;;  %v3405_v46 = vrot.slane %v9031_v40, %v10793_v20  ;;  %6229 = vpow2.f32 %v3072_v41  ;;  %v3409_v60 = vrot.slane %v9035_v18, %v10793_v20  ;;  %v3413_v30 = vrot.slane %v9039_v57, %v10793_v20  ;;  %v10813_v41 = vld [vmem:[#allocation76_spill] sm:$0xff] }
 0x31e   : > { %10790 = vst [vmem:[#allocation71_spill] sm:$0xff] %v9051_v62  ;;  %10791 = vst [vmem:[#allocation43_spill] sm:$0xff] %v9055_v8  ;;  %v3417_v52 = vrot.slane %v9043_v35, %v10793_v20  ;;  %6231 = vpow2.f32 %v3074_v22  ;;  %v3421_v10 = vrot.slane %v9047_v1, %v10793_v20  ;;  %v3425_v17 = vrot.slane %v9051_v62, %v10793_v20 }
 0x31f   : > { %10792 = vst [vmem:[#allocation57_spill] sm:$0xff] %v9059_v23  ;;  %v3429_v58 = vrot.slane %v9055_v8, %v10793_v20  ;;  %6233 = vpow2.f32 %v3076_v12  ;;  %v3433_v44 = vrot.slane %v9059_v23, %v10793_v20  ;;  %v9078_v63 = vmul.f32 %v3405_v46, %v10794_v6  ;;  %v10814_v12 = vld [vmem:[#allocation78_spill] sm:$0xff] }
 0x320   : > { %v9081_v9 = vmul.f32 %v3409_v60, %v10794_v6  ;;  %6235 = vpow2.f32 %v3078_v15  ;;  %v9084_v19 = vmul.f32 %v3413_v30, %v10794_v6  ;;  %v9087_v21 = vmul.f32 %v3417_v52, %v10794_v6  ;;  %v10815_v52 = vld [vmem:[#allocation56_spill] sm:$0xff] }
 0x321   : > { %10795 = vst [vmem:[#allocation103_spill] sm:$0xff] %v9078_v63  ;;  %v9090_v59 = vmul.f32 %v3421_v10, %v10794_v6  ;;  %6237 = vpow2.f32 %v3080_v11  ;;  %v9093_v0 = vmul.f32 %v3425_v17, %v10794_v6  ;;  %v9096_v26 = vmul.f32 %v3429_v58, %v10794_v6 }
 0x322   : > { %10796 = vst [vmem:[#allocation104_spill] sm:$0xff] %v9081_v9  ;;  %10797 = vst [vmem:[#allocation105_spill] sm:$0xff] %v9084_v19  ;;  %v9099_v32 = vmul.f32 %v3433_v44, %v10794_v6  ;;  %v3565_v51 = vrot.slane %v9031_v40, %v10803_v14  ;;  %v3569_v43 = vrot.slane %v9035_v18, %v10803_v14  ;;  %v10816_v6 = vld [vmem:[#allocation58_spill] sm:$0xff] }
 0x323   : > { %10798 = vst [vmem:[#allocation107_spill] sm:$0xff] %v9087_v21  ;;  %10799 = vst [vmem:[#allocation16_spill] sm:$0xff] %v9090_v59  ;;  %v3573_v2 = vrot.slane %v9039_v57, %v10803_v14  ;;  %v3577_v7 = vrot.slane %v9043_v35, %v10803_v14  ;;  %v3581_v16 = vrot.slane %v9047_v1, %v10803_v14  ;;  %v10838_v59 = vld [vmem:[#allocation100_spill] sm:$0xff] }
 0x324   : > { %10800 = vst [vmem:[#allocation73_spill] sm:$0xff] %v9093_v0  ;;  %10801 = vst [vmem:[#allocation116_spill] sm:$0xff] %v9096_v26  ;;  %v3585_v28 = vrot.slane %v9051_v62, %v10803_v14  ;;  %v3589_v5 = vrot.slane %v9055_v8, %v10803_v14  ;;  %v3593_v49 = vrot.slane %v9059_v23, %v10803_v14  ;;  %v10840_v26 = vld [vmem:[#allocation102_spill] sm:$0xff] }
 0x325   : > { %10802 = vst [vmem:[#allocation117_spill] sm:$0xff] %v9099_v32  ;;  %v9118_v31 = vmul.f32 %v3565_v51, %v10804_v54  ;;  %v9121_v47 = vmul.f32 %v3569_v43, %v10804_v54  ;;  %v9124_v3 = vmul.f32 %v3573_v2, %v10804_v54  ;;  %v9127_v50 = vmul.f32 %v3577_v7, %v10804_v54  ;;  %v10839_v32 = vld [vmem:[#allocation101_spill] sm:$0xff] }
 0x326   : > { %v9130_v42 = vmul.f32 %v3581_v16, %v10804_v54  ;;  %v9133_v53 = vmul.f32 %v3585_v28, %v10804_v54  ;;  %v9136_v25 = vmul.f32 %v3589_v5, %v10804_v54  ;;  %v9139_v33 = vmul.f32 %v3593_v49, %v10804_v54 }
 0x327   : > { %10805 = vst [vmem:[#allocation17_spill] sm:$0xff] %v9118_v31  ;;  %10806 = vst [vmem:[#allocation80_spill] sm:$0xff] %v9121_v47  ;;  %v3672_v22 = vadd.f32 %v8728_v38, %v10813_v41  ;;  %v3673_v27 = vadd.f32 %v8731_v36, %v10814_v12  ;;  %v3941_v15 = vrot.slane %v8567_v61, %v10603_v34  ;;  %v9149_v37 = vpop.eup %6223 }
 0x328   : > { %10807 = vst [vmem:[#allocation118_spill] sm:$0xff] %v9124_v3  ;;  %10808 = vst [vmem:[#allocation119_spill] sm:$0xff] %v9127_v50  ;;  %v3945_v11 = vrot.slane %v8571_v45, %v10603_v34  ;;  %v4133_v4 = vrot.slane %v8567_v61, %v6701_v55  ;;  %v4137_v13 = vrot.slane %v8571_v45, %v6701_v55  ;;  %v9159_v48 = vpop.eup %6225  ;;  %v3226_v46 = vrot.slane %v9149_v37, 4 }
 0x329   : > { %10809 = vst [vmem:[#allocation120_spill] sm:$0xff] %v9130_v42  ;;  %10810 = vst [vmem:[#allocation121_spill] sm:$0xff] %v9133_v53  ;;  %v4325_v38 = vrot.slane %v8567_v61, %v6703_v56  ;;  %v4329_v36 = vrot.slane %v8571_v45, %v6703_v56  ;;  %v3864_v60 = vadd.f32 %v8810_v39, %v3672_v22  ;;  %v9165_v17 = vpop.eup %6227  ;;  %v3232_v58 = vrot.slane %v9159_v48, 4  ;;  %v10837_v42 = vld [vmem:[#allocation54_spill] sm:$0xff] }
 0x32a   : > { %10811 = vst [vmem:[#allocation122_spill] sm:$0xff] %v9136_v25  ;;  %10812 = vst [vmem:[#allocation123_spill] sm:$0xff] %v9139_v33  ;;  %v3865_v30 = vadd.f32 %v8813_v29, %v3673_v27  ;;  %v4024_v10 = vmul.f32 %v3941_v15, %v10815_v52  ;;  %v4025_v44 = vmul.f32 %v3945_v11, %v10815_v52  ;;  %v9171_v2 = vpop.eup %6229  ;;  %v3238_v39 = vrot.slane %v9165_v17, 4  ;;  %v10817_v29 = vld [vmem:[#allocation60_spill] sm:$0xff] }
 0x32b   : > { %v4216_v51 = vmul.f32 %v4133_v4, %v10816_v6  ;;  %v4217_v43 = vmul.f32 %v4137_v13, %v10816_v6  ;;  %v3227_v7 = vadd.f32 %v9149_v37, %v3226_v46  ;;  %v4408_v28 = vmul.f32 %v4325_v38, %v10817_v29  ;;  %v9176_v5 = vpop.eup %6231 }
 0x32c   : > { %v4056_v16 = vadd.f32 %v4024_v10, %v3864_v60  ;;  %v3233_v49 = vadd.f32 %v9159_v48, %v3232_v58  ;;  %v3244_v54 = vrot.slane %v9171_v2, 4  ;;  %v4057_v41 = vadd.f32 %v4025_v44, %v3865_v30  ;;  %v9181_v12 = vpop.eup %6233 }
 0x32d   : > { %v4409_v22 = vmul.f32 %v4329_v36, %v10817_v29  ;;  %v3228_v27 = vrot.slane %v3227_v7, 2  ;;  %v3239_v15 = vadd.f32 %v9165_v17, %v3238_v39  ;;  %v3250_v11 = vrot.slane %v9176_v5, 4  ;;  %v9185_v13 = vpop.eup %6235 }
 0x32e   : > { %v4248_v4 = vadd.f32 %v4216_v51, %v4056_v16  ;;  %v3234_v38 = vrot.slane %v3233_v49, 2  ;;  %v3245_v46 = vadd.f32 %v9171_v2, %v3244_v54  ;;  %v3256_v60 = vrot.slane %v9181_v12, 4  ;;  %v9189_v58 = vpop.eup %6237 }
 0x32f   : > { %v4249_v10 = vadd.f32 %v4217_v43, %v4057_v41  ;;  %v3229_v30 = vadd.f32 %v3228_v27, %v3227_v7  ;;  %v3240_v36 = vrot.slane %v3239_v15, 2  ;;  %v3251_v44 = vadd.f32 %v9176_v5, %v3250_v11 }
 0x330   : > { %v3262_v18 = vrot.slane %v9185_v13, 4  ;;  %v3235_v39 = vadd.f32 %v3234_v38, %v3233_v49  ;;  %v3246_v40 = vrot.slane %v3245_v46, 2  ;;  %v3257_v51 = vadd.f32 %v9181_v12, %v3256_v60 }
 0x331   : > { %v3268_v16 = vrot.slane %v9189_v58, 4  ;;  %v3230_v47 = vrot.slane %v3229_v30, 1  ;;  %v3241_v9 = vadd.f32 %v3240_v36, %v3239_v15  ;;  %v3252_v54 = vrot.slane %v3251_v44, 2 }
 0x332   : > { %v3263_v31 = vadd.f32 %v9185_v13, %v3262_v18  ;;  %v3236_v43 = vrot.slane %v3235_v39, 1  ;;  %v3247_v41 = vadd.f32 %v3246_v40, %v3245_v46  ;;  %v3258_v63 = vrot.slane %v3257_v51, 2 }
 0x333   : > { %v3269_v7 = vadd.f32 %v9189_v58, %v3268_v16  ;;  %v3231_v27 = vadd.f32 %v3230_v47, %v3229_v30  ;;  %v3242_v11 = vrot.slane %v3241_v9, 1  ;;  %v3253_v35 = vadd.f32 %v3252_v54, %v3251_v44 }
 0x334   : > { %v3264_v57 = vrot.slane %v3263_v31, 2  ;;  %v3237_v49 = vadd.f32 %v3236_v43, %v3235_v39  ;;  %v3248_v38 = vrot.slane %v3247_v41, 1  ;;  %v3259_v50 = vadd.f32 %v3258_v63, %v3257_v51  ;;  %v10823_v43 = vld [vmem:[#allocation75_spill] sm:$0xff] }
 0x335   : > { %v3270_v60 = vrot.slane %v3269_v7, 2  ;;  %v3243_v21 = vadd.f32 %v3242_v11, %v3241_v9  ;;  %v3254_v3 = vrot.slane %v3253_v35, 1  ;;  %6239 = vrcp.f32 %v3231_v27  ;;  %v10825_v11 = vld [vmem:[#allocation114_spill] sm:$0xff] }
 0x336   : > { %v3265_v19 = vadd.f32 %v3264_v57, %v3263_v31  ;;  %v3249_v15 = vadd.f32 %v3248_v38, %v3247_v41  ;;  %v3260_v36 = vrot.slane %v3259_v50, 1  ;;  %6241 = vrcp.f32 %v3237_v49  ;;  %v10818_v31 = vld [vmem:[#allocation21_spill] sm:$0xff]  ;;  %v10824_v41 = vld [vmem:[#allocation111_spill] sm:$0xff] }
 0x337   : > { %v3271_v18 = vadd.f32 %v3270_v60, %v3269_v7  ;;  %v3255_v40 = vadd.f32 %v3254_v3, %v3253_v35  ;;  %6243 = vrcp.f32 %v3243_v21  ;;  %v4440_v16 = vadd.f32 %v4408_v28, %v4248_v4  ;;  %v10819_v3 = vld [vmem:[#allocation62_spill] sm:$0xff]  ;;  %v10826_v49 = vld [vmem:[#allocation31_spill] sm:$0xff] }
 0x338   : > { %v3266_v46 = vrot.slane %v3265_v19, 1  ;;  %v3261_v47 = vadd.f32 %v3260_v36, %v3259_v50  ;;  %6245 = vrcp.f32 %v3249_v15  ;;  %v4441_v44 = vadd.f32 %v4409_v22, %v4249_v10  ;;  %v10820_v28 = vld [vmem:[#allocation74_spill] sm:$0xff]  ;;  %v10827_v60 = vld [vmem:[#allocation115_spill] sm:$0xff]  ;;  %v10828_v36 = vld [vmem:[#allocation33_spill] sm:$0xff] }
 0x339   : > { %v3272_v30 = vrot.slane %v3271_v18, 1  ;;  %6247 = vrcp.f32 %v3255_v40  ;;  %v4517_v63 = vrot.slane %v8567_v61, %v10760_v24  ;;  %v4521_v57 = vrot.slane %v8571_v45, %v10760_v24  ;;  %v10821_v22 = vld [vmem:[#allocation110_spill] sm:$0xff] }
 0x33a   : > { %v3267_v39 = vadd.f32 %v3266_v46, %v3265_v19  ;;  %6249 = vrcp.f32 %v3261_v47  ;;  %v4709_v35 = vrot.slane %v8567_v61, %v10818_v31  ;;  %v4713_v21 = vrot.slane %v8571_v45, %v10818_v31  ;;  %v10822_v10 = vld [vmem:[#allocation50_spill] sm:$0xff] }
 0x33b   : > { %v3273_v9 = vadd.f32 %v3272_v30, %v3271_v18  ;;  %v4600_v50 = vmul.f32 %v4517_v63, %v10819_v3  ;;  %v4601_v19 = vmul.f32 %v4521_v57, %v10819_v3  ;;  %v3670_v4 = vadd.f32 %v10821_v22, %v10820_v28 }
 0x33c   : > { %6251 = vrcp.f32 %v3267_v39  ;;  %v4792_v51 = vmul.f32 %v4709_v35, %v10822_v10  ;;  %v4793_v54 = vmul.f32 %v4713_v21, %v10822_v10  ;;  %v3671_v7 = vadd.f32 %v10824_v41, %v10823_v43 }
 0x33d   : > { %6253 = vrcp.f32 %v3273_v9  ;;  %v4632_v61 = vadd.f32 %v4600_v50, %v4440_v16  ;;  %v4633_v27 = vadd.f32 %v4601_v19, %v4441_v44  ;;  %v3862_v45 = vadd.f32 %v10825_v11, %v3670_v4 }
 0x33e   : > { %v3933_v38 = vrot.slane %v10826_v49, %v10603_v34  ;;  %v3863_v15 = vadd.f32 %v10827_v60, %v3671_v7  ;;  %v3937_v18 = vrot.slane %v10828_v36, %v10603_v34  ;;  %v4125_v40 = vrot.slane %v10826_v49, %v6701_v55 }
 0x33f   : > { %v4129_v46 = vrot.slane %v10828_v36, %v6701_v55  ;;  %v9223_v47 = vadd.f32 %v4792_v51, %v4632_v61  ;;  %v9225_v16 = vadd.f32 %v4793_v54, %v4633_v27  ;;  %v4317_v44 = vrot.slane %v10826_v49, %v6703_v56 }
 0x340   : > { %v4022_v30 = vmul.f32 %v3933_v38, %v10815_v52  ;;  %v4023_v39 = vmul.f32 %v3937_v18, %v10815_v52  ;;  %v4214_v63 = vmul.f32 %v4125_v40, %v10816_v6  ;;  %v4321_v9 = vrot.slane %v10828_v36, %v6703_v56 }
 0x341   : > { %v4215_v57 = vmul.f32 %v4129_v46, %v10816_v6  ;;  %v4406_v50 = vmul.f32 %v4317_v44, %v10817_v29  ;;  %v4509_v19 = vrot.slane %v10826_v49, %v10760_v24  ;;  %v4513_v51 = vrot.slane %v10828_v36, %v10760_v24 }
 0x342   : > { %v4054_v21 = vadd.f32 %v4022_v30, %v3862_v45  ;;  %v6240_v28 = vpop.eup %6239  ;;  %v4055_v22 = vadd.f32 %v4023_v39, %v3863_v15  ;;  %v4407_v4 = vmul.f32 %v4321_v9, %v10817_v29  ;;  %v4701_v54 = vrot.slane %v10826_v49, %v10818_v31 }
 0x343   : > { %v6242_v43 = vpop.eup %6241  ;;  %v9246_v41 = vmul.f32 %v6240_v28, %v9149_v37  ;;  %v9249_v61 = vmul.f32 %v4509_v19, %v10819_v3  ;;  %v9257_v60 = vmul.f32 %v4513_v51, %v10819_v3 }
 0x344   : > { %v4246_v7 = vadd.f32 %v4214_v63, %v4054_v21  ;;  %v6244_v11 = vpop.eup %6243  ;;  %v9254_v45 = vmul.f32 %v6242_v43, %v9159_v48  ;;  %v4247_v38 = vadd.f32 %v4215_v57, %v4055_v22  ;;  %v9260_v49 = vmul.f32 %v4701_v54, %v10822_v10  ;;  %v10831_v21 = vld [vmem:[#allocation97_spill] sm:$0xff] }
 0x345   : > { %10829 = vst [vmem:[#allocation76_spill] sm:$0xff] %v9246_v41  ;;  %v6246_v37 = vpop.eup %6245  ;;  %v9263_v15 = vmul.f32 %v6244_v11, %v9165_v17  ;;  %v3437_v18 = vrot.slane %v9246_v41, %v10793_v20  ;;  %v3597_v40 = vrot.slane %v9246_v41, %v10803_v14 }
 0x346   : > { %10830 = vst [vmem:[#allocation78_spill] sm:$0xff] %v9254_v45  ;;  %v9269_v46 = vadd.f32 %v4406_v50, %v4246_v7  ;;  %v6248_v48 = vpop.eup %6247  ;;  %v9272_v30 = vmul.f32 %v6246_v37, %v9171_v2  ;;  %v3441_v44 = vrot.slane %v9254_v45, %v10793_v20  ;;  %v3601_v39 = vrot.slane %v9254_v45, %v10803_v14 }
 0x347   : > { %v9278_v17 = vadd.f32 %v4407_v4, %v4247_v38  ;;  %v6250_v63 = vpop.eup %6249  ;;  %v9281_v57 = vmul.f32 %v6248_v48, %v9176_v5  ;;  %v3445_v9 = vrot.slane %v9263_v15, %v10793_v20  ;;  %v9286_v50 = vmul.f32 %v3437_v18, %v10831_v21 }
 0x348   : > { %v3605_v2 = vrot.slane %v9263_v15, %v10803_v14  ;;  %v9291_v28 = vmul.f32 %v6250_v63, %v9181_v12  ;;  %v3449_v22 = vrot.slane %v9272_v30, %v10793_v20  ;;  %v9296_v4 = vmul.f32 %v3441_v44, %v10831_v21  ;;  %v10833_v63 = vld [vmem:[#allocation98_spill] sm:$0xff] }
 0x349   : > { %v6252_v19 = vpop.eup %6251  ;;  %v3609_v5 = vrot.slane %v9272_v30, %v10803_v14  ;;  %v3453_v43 = vrot.slane %v9281_v57, %v10793_v20  ;;  %v9304_v7 = vmul.f32 %v3445_v9, %v10831_v21  ;;  %v3613_v12 = vrot.slane %v9281_v57, %v10803_v14 }
 0x34a   : > { %10832 = vst [vmem:[#allocation56_spill] sm:$0xff] %v9296_v4  ;;  %v6254_v51 = vpop.eup %6253  ;;  %v3336_v54 = vmul.f32 %v6252_v19, %v9185_v13  ;;  %v3457_v38 = vrot.slane %v9291_v28, %v10793_v20  ;;  %v9312_v37 = vmul.f32 %v3449_v22, %v10831_v21  ;;  %v3617_v13 = vrot.slane %v9291_v28, %v10803_v14 }
 0x34b   : > { %v3337_v11 = vmul.f32 %v6254_v51, %v9189_v58  ;;  %v3494_v48 = vmul.f32 %v3453_v43, %v10831_v21  ;;  %v9320_v9 = vmul.f32 %v3597_v40, %v10833_v63  ;;  %v9326_v22 = vmul.f32 %v3601_v39, %v10833_v63  ;;  %v10835_v39 = vld [vmem:[#allocation18_spill] sm:$0xff] }
 0x34c   : > { %v3461_v18 = vrot.slane %v3336_v54, %v10793_v20  ;;  %v3621_v44 = vrot.slane %v3336_v54, %v10803_v14  ;;  %v3495_v19 = vmul.f32 %v3457_v38, %v10831_v21  ;;  %v9330_v27 = vmul.f32 %v3605_v2, %v10833_v63 }
 0x34d   : > { %v3465_v58 = vrot.slane %v3337_v11, %v10793_v20  ;;  %v3625_v51 = vrot.slane %v3337_v11, %v10803_v14  ;;  %10834 = vst [vmem:[#allocation58_spill] sm:$0xff] %v9326_v22  ;;  %v9333_v43 = vmul.f32 %v3609_v5, %v10833_v63  ;;  %v3654_v40 = vmul.f32 %v3613_v12, %v10833_v63 }
 0x34e   : > { %v3496_v35 = vmul.f32 %v3461_v18, %v10831_v21  ;;  %v3655_v20 = vmul.f32 %v3617_v13, %v10833_v63  ;;  %v3656_v38 = vmul.f32 %v3621_v44, %v10833_v63  ;;  %v3813_v1 = vrot.slane %v3336_v54, %v10835_v39 }
 0x34f   : > { %v3497_v62 = vmul.f32 %v3465_v58, %v10831_v21  ;;  %v3657_v14 = vmul.f32 %v3625_v51, %v10833_v63  ;;  %v3817_v18 = vrot.slane %v3337_v11, %v10835_v39  ;;  %v4005_v2 = vrot.slane %v3336_v54, %v10603_v34  ;;  %v10836_v58 = vld [vmem:[#allocation99_spill] sm:$0xff] }
 0x350   : > { %v4009_v53 = vrot.slane %v3337_v11, %v10603_v34  ;;  %v3688_v5 = vadd.f32 %v3656_v38, %v3496_v35  ;;  %v4197_v12 = vrot.slane %v3336_v54, %v6701_v55  ;;  %v4201_v21 = vrot.slane %v3337_v11, %v6701_v55 }
 0x351   : > { %v3689_v0 = vadd.f32 %v3657_v14, %v3497_v62  ;;  %v3848_v13 = vmul.f32 %v3813_v1, %v10836_v58  ;;  %v3849_v44 = vmul.f32 %v3817_v18, %v10836_v58  ;;  %v4040_v63 = vmul.f32 %v4005_v2, %v10837_v42 }
 0x352   : > { %v4041_v51 = vmul.f32 %v4009_v53, %v10837_v42  ;;  %v4232_v23 = vmul.f32 %v4197_v12, %v10838_v59  ;;  %v4233_v8 = vmul.f32 %v4201_v21, %v10838_v59  ;;  %v4389_v33 = vrot.slane %v3336_v54, %v6703_v56 }
 0x353   : > { %v4393_v62 = vrot.slane %v3337_v11, %v6703_v56  ;;  %v3880_v35 = vadd.f32 %v3848_v13, %v3688_v5  ;;  %v3881_v38 = vadd.f32 %v3849_v44, %v3689_v0  ;;  %v4581_v14 = vrot.slane %v3336_v54, %v10760_v24  ;;  %v10841_v5 = vld [vmem:[#allocation55_spill] sm:$0xff] }
 0x354   : > { %v4585_v1 = vrot.slane %v3337_v11, %v10760_v24  ;;  %v4424_v18 = vmul.f32 %v4389_v33, %v10839_v32  ;;  %v4773_v53 = vrot.slane %v3336_v54, %v10818_v31  ;;  %v4777_v12 = vrot.slane %v3337_v11, %v10818_v31 }
 0x355   : > { %v4425_v2 = vmul.f32 %v4393_v62, %v10839_v32  ;;  %v4072_v25 = vadd.f32 %v4040_v63, %v3880_v35  ;;  %v4073_v21 = vadd.f32 %v4041_v51, %v3881_v38  ;;  %v4616_v45 = vmul.f32 %v4581_v14, %v10840_v26 }
 0x356   : > { %v4617_v41 = vmul.f32 %v4585_v1, %v10840_v26  ;;  %v4808_v0 = vmul.f32 %v4773_v53, %v10841_v5  ;;  %v4809_v13 = vmul.f32 %v4777_v12, %v10841_v5  ;;  %v3686_v44 = vadd.f32 %v3654_v40, %v3494_v48  ;;  %v6081_v40 = vld [vmem:[%s10159_s2 + $0x4] ss:$8 sps:$4 sm:$0xff]  }
 0x357   : > { %v3687_v22 = vadd.f32 %v3655_v20, %v3495_v19  ;;  %v4264_v4 = vadd.f32 %v4232_v23, %v4072_v25  ;;  %v4265_v33 = vadd.f32 %v4233_v8, %v4073_v21  ;;  %v3805_v62 = vrot.slane %v9281_v57, %v10835_v39  ;;  %5274 = vmatprep.mubr.bf16.mxu1 %v6081_v40 }
 0x358   : > { %v3809_v54 = vrot.slane %v9291_v28, %v10835_v39  ;;  %v3997_v11 = vrot.slane %v9281_v57, %v10603_v34  ;;  %v4001_v63 = vrot.slane %v9291_v28, %v10603_v34  ;;  %v4189_v51 = vrot.slane %v9281_v57, %v6701_v55 }
 0x359   : > { %v4193_v48 = vrot.slane %v9291_v28, %v6701_v55  ;;  %v4456_v23 = vadd.f32 %v4424_v18, %v4264_v4  ;;  %v4457_v8 = vadd.f32 %v4425_v2, %v4265_v33  ;;  %v3846_v25 = vmul.f32 %v3805_v62, %v10836_v58 }
 0x35a   : > { %v3847_v19 = vmul.f32 %v3809_v54, %v10836_v58  ;;  %v4038_v20 = vmul.f32 %v3997_v11, %v10837_v42  ;;  %v4039_v35 = vmul.f32 %v4001_v63, %v10837_v42  ;;  %v4230_v38 = vmul.f32 %v4189_v51, %v10838_v59 }
 0x35b   : > { %v4231_v14 = vmul.f32 %v4193_v48, %v10838_v59  ;;  %v4648_v1 = vadd.f32 %v4616_v45, %v4456_v23  ;;  %v4649_v53 = vadd.f32 %v4617_v41, %v4457_v8  ;;  %v3878_v4 = vadd.f32 %v3846_v25, %v3686_v44 }
 0x35c   : > { %v3879_v18 = vadd.f32 %v3847_v19, %v3687_v22  ;;  %v4381_v2 = vrot.slane %v9281_v57, %v6703_v56  ;;  %v4385_v12 = vrot.slane %v9291_v28, %v6703_v56  ;;  %v4573_v21 = vrot.slane %v9281_v57, %v10760_v24 }
 0x35d   : > { %v4577_v33 = vrot.slane %v9291_v28, %v10760_v24  ;;  %v4840_v62 = vadd.f32 %v4808_v0, %v4648_v1  ;;  %v4841_v54 = vadd.f32 %v4809_v13, %v4649_v53  ;;  %v4070_v11 = vadd.f32 %v4038_v20, %v3878_v4 }
 0x35e   : > { %v4071_v45 = vadd.f32 %v4039_v35, %v3879_v18  ;;  %v4422_v41 = vmul.f32 %v4381_v2, %v10839_v32  ;;  %v4423_v22 = vmul.f32 %v4385_v12, %v10839_v32  ;;  %v4614_v44 = vmul.f32 %v4573_v21, %v10840_v26 }
 0x35f   : > { %v4615_v63 = vmul.f32 %v4577_v33, %v10840_v26  ;;  %v4857_v51 = vpack.c.bf16 %v4841_v54, %v4840_v62  ;;  %v4262_v48 = vadd.f32 %v4230_v38, %v4070_v11  ;;  %v4765_v8 = vrot.slane %v9281_v57, %v10818_v31 }
 0x360   : > { %v4263_v23 = vadd.f32 %v4231_v14, %v4071_v45  ;;  %v4769_v0 = vrot.slane %v9291_v28, %v10818_v31  ;;  %v4630_v13 = vadd.f32 %v9249_v61, %v9269_v46  ;;  %v4631_v25 = vadd.f32 %v9257_v60, %v9278_v17 }
 0x361   : > { %v10842_v19 = vrot.slane %v10828_v36, %v10818_v31  ;;  %5693 = vmatprep.subr.bf16.mxu1 %v4857_v51  ;;  %v4454_v20 = vadd.f32 %v4422_v41, %v4262_v48  ;;  %v4806_v38 = vmul.f32 %v4765_v8, %v10841_v5  ;;  %v3684_v57 = vadd.f32 %v9330_v27, %v9304_v7 }
 0x362   : > { %v4455_v35 = vadd.f32 %v4423_v22, %v4263_v23  ;;  %v10843_v28 = vpack.c.bf16 %v9225_v16, %v9223_v47  ;;  %v4807_v61 = vmul.f32 %v4769_v0, %v10841_v5  ;;  %v4822_v60 = vadd.f32 %v9260_v49, %v4630_v13 }
 0x363   : > { %v4791_v40 = vmul.f32 %v10842_v19, %v10822_v10  ;;  %v3685_v36 = vadd.f32 %v9333_v43, %v9312_v37  ;;  %v4646_v17 = vadd.f32 %v4614_v44, %v4454_v20  ;;  %v3797_v1 = vrot.slane %v9263_v15, %v10835_v39 }
 0x364   : > { %5694 = vmatpush3.bf16.msra.mxu1 %v10843_v28  ;;  %v4647_v14 = vadd.f32 %v4615_v63, %v4455_v35  ;;  %v3801_v27 = vrot.slane %v9272_v30, %v10835_v39  ;;  %v3989_v47 = vrot.slane %v9263_v15, %v10603_v34  ;;  %v3993_v16 = vrot.slane %v9272_v30, %v10603_v34  ;;  %v10844_v35 = vld [vmem:[#allocation70_spill] sm:$0xff] }
 0x365   : > { %v4823_v46 = vadd.f32 %v4791_v40, %v4631_v25  ;;  %v4181_v49 = vrot.slane %v9263_v15, %v6701_v55  ;;  %v4838_v53 = vadd.f32 %v4806_v38, %v4646_v17  ;;  %v3844_v43 = vmul.f32 %v3797_v1, %v10836_v58  ;;  %v10845_v38 = vld [vmem:[#allocation108_spill] sm:$0xff]  ;;  %v10849_v17 = vld [vmem:[#allocation30_spill] sm:$0xff] }
 0x366   : > { %v4839_v37 = vadd.f32 %v4807_v61, %v4647_v14  ;;  %v3845_v4 = vmul.f32 %v3801_v27, %v10836_v58  ;;  %v4036_v18 = vmul.f32 %v3989_v47, %v10837_v42  ;;  %v4037_v2 = vmul.f32 %v3993_v16, %v10837_v42  ;;  %v10847_v61 = vld [vmem:[#allocation109_spill] sm:$0xff]  ;;  %v10850_v27 = vld [vmem:[#allocation112_spill] sm:$0xff] }
 0x367   : > { %v4848_v7 = vpack.c.bf16 %v4823_v46, %v4822_v60  ;;  %v4185_v12 = vrot.slane %v9272_v30, %v6701_v55  ;;  %v4228_v21 = vmul.f32 %v4181_v49, %v10838_v59  ;;  %v3876_v62 = vadd.f32 %v3844_v43, %v3684_v57  ;;  %v10848_v46 = vld [vmem:[#allocation29_spill] sm:$0xff] }
 0x368   : > { %v4856_v33 = vpack.c.bf16 %v4839_v37, %v4838_v53  ;;  %v3877_v54 = vadd.f32 %v3845_v4, %v3685_v36  ;;  %v4373_v11 = vrot.slane %v9263_v15, %v6703_v56  ;;  %v4377_v41 = vrot.slane %v9272_v30, %v6703_v56  ;;  %v10851_v16 = vld [vmem:[#allocation113_spill] sm:$0xff] }
 0x369   : > { %v4229_v45 = vmul.f32 %v4185_v12, %v10838_v59  ;;  %v4565_v22 = vrot.slane %v9263_v15, %v10760_v24  ;;  %v4569_v44 = vrot.slane %v9272_v30, %v10760_v24  ;;  %v4068_v63 = vadd.f32 %v4036_v18, %v3876_v62 }
 0x36a   : > { %5695 = vmatprep.subr.bf16.mxu1 %v4856_v33  ;;  %v4069_v51 = vadd.f32 %v4037_v2, %v3877_v54  ;;  %v4420_v48 = vmul.f32 %v4373_v11, %v10839_v32  ;;  %v4757_v23 = vrot.slane %v9263_v15, %v10818_v31  ;;  %v4421_v8 = vmul.f32 %v4377_v41, %v10839_v32  ;;  %v10846_v15 = vld [vmem:[#allocation72_spill] sm:$0xff] }
 0x36b   : > { %5696 = vmatpush3.bf16.msra.mxu1 %v4848_v7  ;;  %v4612_v0 = vmul.f32 %v4565_v22, %v10840_v26  ;;  %v4613_v13 = vmul.f32 %v4569_v44, %v10840_v26  ;;  %v4761_v25 = vrot.slane %v9272_v30, %v10818_v31  ;;  %v4260_v19 = vadd.f32 %v4228_v21, %v4068_v63 }
 0x36c   : > { %v4261_v40 = vadd.f32 %v4229_v45, %v4069_v51  ;;  %v4804_v20 = vmul.f32 %v4757_v23, %v10841_v5  ;;  %v3668_v57 = vadd.f32 %v10845_v38, %v10844_v35  ;;  %v3669_v60 = vadd.f32 %v10847_v61, %v10846_v15  ;;  %v10854_v61 = vld [vmem:[#allocation76_spill] sm:$0xff] }
 0x36d   : > { %v4805_v28 = vmul.f32 %v4761_v25, %v10841_v5  ;;  %v3925_v36 = vrot.slane %v10848_v46, %v10603_v34  ;;  %v3929_v14 = vrot.slane %v10849_v17, %v10603_v34  ;;  %v4452_v1 = vadd.f32 %v4420_v48, %v4260_v19 }
 0x36e   : > { %v4453_v30 = vadd.f32 %v4421_v8, %v4261_v40  ;;  %v3860_v7 = vadd.f32 %v10850_v27, %v3668_v57  ;;  %v4117_v47 = vrot.slane %v10848_v46, %v6701_v55  ;;  %v3861_v49 = vadd.f32 %v10851_v16, %v3669_v60  ;;  %v10852_v57 = vld [vmem:[#allocation56_spill] sm:$0xff] }
 0x36f   : > { %v4020_v53 = vmul.f32 %v3925_v36, %v10815_v52  ;;  %v4021_v37 = vmul.f32 %v3929_v14, %v10815_v52  ;;  %v4121_v43 = vrot.slane %v10849_v17, %v6701_v55  ;;  %v4644_v4 = vadd.f32 %v4612_v0, %v4452_v1 }
 0x370   : > { %v4645_v18 = vadd.f32 %v4613_v13, %v4453_v30  ;;  %v4212_v2 = vmul.f32 %v4117_v47, %v10816_v6  ;;  %v4309_v12 = vrot.slane %v10848_v46, %v6703_v56  ;;  %v4313_v54 = vrot.slane %v10849_v17, %v6703_v56 }
 0x371   : > { %v4052_v21 = vadd.f32 %v4020_v53, %v3860_v7  ;;  %v4053_v33 = vadd.f32 %v4021_v37, %v3861_v49  ;;  %v4213_v62 = vmul.f32 %v4121_v43, %v10816_v6  ;;  %v4836_v11 = vadd.f32 %v4804_v20, %v4644_v4 }
 0x372   : > { %v4837_v45 = vadd.f32 %v4805_v28, %v4645_v18  ;;  %v4404_v41 = vmul.f32 %v4309_v12, %v10817_v29  ;;  %v4501_v22 = vrot.slane %v10848_v46, %v10760_v24  ;;  %v4405_v51 = vmul.f32 %v4313_v54, %v10817_v29  ;;  %v10853_v28 = vld [vmem:[#allocation58_spill] sm:$0xff] }
 0x373   : > { %v4244_v44 = vadd.f32 %v4212_v2, %v4052_v21  ;;  %v4245_v63 = vadd.f32 %v4213_v62, %v4053_v33  ;;  %v4505_v48 = vrot.slane %v10849_v17, %v10760_v24  ;;  %v4693_v0 = vrot.slane %v10848_v46, %v10818_v31 }
 0x374   : > { %v4855_v23 = vpack.c.bf16 %v4837_v45, %v4836_v11  ;;  %v4596_v8 = vmul.f32 %v4501_v22, %v10819_v3  ;;  %v4697_v13 = vrot.slane %v10849_v17, %v10818_v31  ;;  %v3682_v20 = vadd.f32 %v9320_v9, %v9286_v50  ;;  %v10855_v17 = vld [vmem:[#allocation78_spill] sm:$0xff] }
 0x375   : > { %v4436_v25 = vadd.f32 %v4404_v41, %v4244_v44  ;;  %v4437_v19 = vadd.f32 %v4405_v51, %v4245_v63  ;;  %v4597_v40 = vmul.f32 %v4505_v48, %v10819_v3  ;;  %v4788_v35 = vmul.f32 %v4693_v0, %v10822_v10 }
 0x376   : > { %5697 = vmatprep.subr.bf16.mxu1 %v4855_v23  ;;  %v4789_v38 = vmul.f32 %v4697_v13, %v10822_v10  ;;  %v3683_v15 = vadd.f32 %v10853_v28, %v10852_v57  ;;  %v3789_v60 = vrot.slane %v10854_v61, %v10835_v39  ;;  %v3793_v14 = vrot.slane %v10855_v17, %v10835_v39  ;;  %v10856_v23 = vld [vmem:[#allocation34_spill] sm:$0xff]  ;;  %v10858_v13 = vld [vmem:[#allocation36_spill] sm:$0xff]  ;;  %v10862_v28 = vld [vmem:[#allocation59_spill] sm:$0xff] }
 0x377   : > { %v4628_v46 = vadd.f32 %v4596_v8, %v4436_v25  ;;  %v4629_v36 = vadd.f32 %v4597_v40, %v4437_v19  ;;  %v3981_v1 = vrot.slane %v10854_v61, %v10603_v34  ;;  %v3985_v9 = vrot.slane %v10855_v17, %v10603_v34  ;;  %v10857_v8 = vld [vmem:[#allocation51_spill] sm:$0xff]  ;;  %v10859_v25 = vld [vmem:[#allocation106_spill] sm:$0xff] }
 0x378   : > { %v3842_v50 = vmul.f32 %v3789_v60, %v10836_v58  ;;  %v4173_v30 = vrot.slane %v10854_v61, %v6701_v55  ;;  %v4177_v27 = vrot.slane %v10855_v17, %v6701_v55  ;;  %v3843_v16 = vmul.f32 %v3793_v14, %v10836_v58  ;;  %v10860_v40 = vld [vmem:[#allocation27_spill] sm:$0xff] }
 0x379   : > { %v4820_v7 = vadd.f32 %v4788_v35, %v4628_v46  ;;  %v4821_v47 = vadd.f32 %v4789_v38, %v4629_v36  ;;  %v4034_v49 = vmul.f32 %v3981_v1, %v10837_v42  ;;  %v4035_v37 = vmul.f32 %v3985_v9, %v10837_v42  ;;  %v10861_v35 = vld [vmem:[#allocation28_spill] sm:$0xff] }
 0x37a   : > { %v3874_v53 = vadd.f32 %v3842_v50, %v3682_v20  ;;  %v4226_v43 = vmul.f32 %v4173_v30, %v10838_v59  ;;  %v4227_v4 = vmul.f32 %v4177_v27, %v10838_v59  ;;  %v3875_v2 = vadd.f32 %v3843_v16, %v3683_v15 }
 0x37b   : > { %v4847_v18 = vpack.c.bf16 %v4821_v47, %v4820_v7  ;;  %v4365_v12 = vrot.slane %v10854_v61, %v6703_v56  ;;  %v4369_v21 = vrot.slane %v10855_v17, %v6703_v56  ;;  %v4557_v58 = vrot.slane %v10854_v61, %v10760_v24 }
 0x37c   : > { %v4066_v33 = vadd.f32 %v4034_v49, %v3874_v53  ;;  %v4561_v62 = vrot.slane %v10855_v17, %v10760_v24  ;;  %v4749_v42 = vrot.slane %v10854_v61, %v10818_v31  ;;  %v4067_v59 = vadd.f32 %v4035_v37, %v3875_v2 }
 0x37d   : > { %5698 = vmatpush3.bf16.msra.mxu1 %v4847_v18  ;;  %v4418_v54 = vmul.f32 %v4365_v12, %v10839_v32  ;;  %v4419_v11 = vmul.f32 %v4369_v21, %v10839_v32  ;;  %v4753_v45 = vrot.slane %v10855_v17, %v10818_v31  ;;  %v4610_v22 = vmul.f32 %v4557_v58, %v10840_v26  ;;  %v10865_v58 = vld [vmem:[#allocation122_spill] sm:$0xff] }
 0x37e   : > { %v4258_v41 = vadd.f32 %v4226_v43, %v4066_v33  ;;  %v4611_v44 = vmul.f32 %v4561_v62, %v10840_v26  ;;  %v4802_v63 = vmul.f32 %v4749_v42, %v10841_v5  ;;  %v4259_v51 = vadd.f32 %v4227_v4, %v4067_v59  ;;  %v10864_v33 = vld [vmem:[#allocation116_spill] sm:$0xff] }
 0x37f   : > { %v4803_v48 = vmul.f32 %v4753_v45, %v10841_v5  ;;  %v3666_v0 = vadd.f32 %v10857_v8, %v10856_v23  ;;  %v3667_v19 = vadd.f32 %v10859_v25, %v10858_v13  ;;  %v3917_v20 = vrot.slane %v10860_v40, %v10603_v34  ;;  %v10863_v5 = vld [vmem:[#allocation53_spill] sm:$0xff]  ;;  %v10870_v13 = vld [vmem:[#allocation82_spill] sm:$0xff] }
 0x380   : > { %v4450_v32 = vadd.f32 %v4418_v54, %v4258_v41  ;;  %v3921_v38 = vrot.slane %v10861_v35, %v10603_v34  ;;  %v4109_v26 = vrot.slane %v10860_v40, %v6701_v55  ;;  %v4451_v57 = vadd.f32 %v4419_v11, %v4259_v51  ;;  %v10866_v54 = vld [vmem:[#allocation117_spill] sm:$0xff]  ;;  %v10867_v11 = vld [vmem:[#allocation123_spill] sm:$0xff] }
 0x381   : > { %v3858_v15 = vadd.f32 %v10862_v28, %v3666_v0  ;;  %v3859_v61 = vadd.f32 %v10863_v5, %v3667_v19  ;;  %v4113_v60 = vrot.slane %v10861_v35, %v6701_v55  ;;  %v4018_v36 = vmul.f32 %v3917_v20, %v10815_v52  ;;  %v10871_v19 = vld [vmem:[#allocation83_spill] sm:$0xff] }
 0x382   : > { %v4642_v46 = vadd.f32 %v4610_v22, %v4450_v32  ;;  %v4019_v17 = vmul.f32 %v3921_v38, %v10815_v52  ;;  %v4210_v14 = vmul.f32 %v4109_v26, %v10816_v6  ;;  %v4643_v1 = vadd.f32 %v4611_v44, %v4451_v57  ;;  %v10868_v22 = vld [vmem:[#allocation43_spill] sm:$0xff]  ;;  %v10872_v26 = vld [vmem:[#allocation88_spill] sm:$0xff] }
 0x383   : > { %v4211_v50 = vmul.f32 %v4113_v60, %v10816_v6  ;;  %v4301_v9 = vrot.slane %v10860_v40, %v6703_v56  ;;  %v4305_v30 = vrot.slane %v10861_v35, %v6703_v56  ;;  %v4050_v7 = vadd.f32 %v4018_v36, %v3858_v15 }
 0x384   : > { %v4834_v27 = vadd.f32 %v4802_v63, %v4642_v46  ;;  %v4051_v47 = vadd.f32 %v4019_v17, %v3859_v61  ;;  %v4493_v16 = vrot.slane %v10860_v40, %v10760_v24  ;;  %v4835_v49 = vadd.f32 %v4803_v48, %v4643_v1 }
 0x385   : > { %v4402_v52 = vmul.f32 %v4301_v9, %v10817_v29  ;;  %v4403_v53 = vmul.f32 %v4305_v30, %v10817_v29  ;;  %v4497_v6 = vrot.slane %v10861_v35, %v10760_v24  ;;  %v4242_v37 = vadd.f32 %v4210_v14, %v4050_v7  ;;  %v10874_v7 = vld [vmem:[#allocation92_spill] sm:$0xff] }
 0x386   : > { %v4243_v43 = vadd.f32 %v4211_v50, %v4051_v47  ;;  %v4594_v4 = vmul.f32 %v4493_v16, %v10819_v3  ;;  %v4685_v18 = vrot.slane %v10860_v40, %v10818_v31  ;;  %v4854_v2 = vpack.c.bf16 %v4835_v49, %v4834_v27  ;;  %v10873_v50 = vld [vmem:[#allocation52_spill] sm:$0xff] }
 0x387   : > { %v4595_v12 = vmul.f32 %v4497_v6, %v10819_v3  ;;  %v4689_v21 = vrot.slane %v10861_v35, %v10818_v31  ;;  %v3680_v62 = vadd.f32 %v10865_v58, %v10864_v33  ;;  %v4434_v29 = vadd.f32 %v4402_v52, %v4242_v37  ;;  %v10869_v3 = vld [vmem:[#allocation57_spill] sm:$0xff]  ;;  %v10875_v6 = vld [vmem:[#allocation19_spill] sm:$0xff]  ;;  %v10880_v58 = vld [vmem:[#allocation46_spill] sm:$0xff] }
 0x388   : > { %v4435_v42 = vadd.f32 %v4403_v53, %v4243_v43  ;;  %v4786_v59 = vmul.f32 %v4685_v18, %v10822_v10  ;;  %v3681_v45 = vadd.f32 %v10867_v11, %v10866_v54  ;;  %5699 = vmatprep.subr.bf16.mxu1 %v4854_v2  ;;  %v3781_v44 = vrot.slane %v10868_v22, %v10835_v39  ;;  %v10876_v43 = vld [vmem:[#allocation67_spill] sm:$0xff] }
 0x389   : > { %v4787_v41 = vmul.f32 %v4689_v21, %v10822_v10  ;;  %v3785_v63 = vrot.slane %v10869_v3, %v10835_v39  ;;  %v3973_v51 = vrot.slane %v10868_v22, %v10603_v34  ;;  %v4626_v48 = vadd.f32 %v4594_v4, %v4434_v29  ;;  %v10877_v4 = vld [vmem:[#allocation86_spill] sm:$0xff]  ;;  %v10879_v21 = vld [vmem:[#allocation87_spill] sm:$0xff] }
 0x38a   : > { %v4627_v23 = vadd.f32 %v4595_v12, %v4435_v42  ;;  %v3977_v8 = vrot.slane %v10869_v3, %v10603_v34  ;;  %v4165_v0 = vrot.slane %v10868_v22, %v6701_v55  ;;  %v3840_v25 = vmul.f32 %v3781_v44, %v10870_v13  ;;  %v10878_v12 = vld [vmem:[#allocation68_spill] sm:$0xff]  ;;  %v10881_v29 = vld [vmem:[#allocation47_spill] sm:$0xff] }
 0x38b   : > { %v3841_v10 = vmul.f32 %v3785_v63, %v10870_v13  ;;  %v4032_v32 = vmul.f32 %v3973_v51, %v10871_v19  ;;  %v4169_v40 = vrot.slane %v10869_v3, %v6701_v55  ;;  %v4818_v20 = vadd.f32 %v4786_v59, %v4626_v48  ;;  %v10882_v11 = vld [vmem:[#allocation95_spill] sm:$0xff] }
 0x38c   : > { %v4819_v35 = vadd.f32 %v4787_v41, %v4627_v23  ;;  %v4033_v38 = vmul.f32 %v3977_v8, %v10871_v19  ;;  %v4224_v57 = vmul.f32 %v4165_v0, %v10872_v26  ;;  %v3872_v28 = vadd.f32 %v3840_v25, %v3680_v62  ;;  %v10885_v0 = vld [vmem:[#allocation39_spill] sm:$0xff] }
 0x38d   : > { %v3873_v15 = vadd.f32 %v3841_v10, %v3681_v45  ;;  %v4225_v5 = vmul.f32 %v4169_v40, %v10872_v26  ;;  %v4357_v61 = vrot.slane %v10868_v22, %v6703_v56  ;;  %v4361_v46 = vrot.slane %v10869_v3, %v6703_v56 }
 0x38e   : > { %v4846_v60 = vpack.c.bf16 %v4819_v35, %v4818_v20  ;;  %v4549_v36 = vrot.slane %v10868_v22, %v10760_v24  ;;  %v4553_v17 = vrot.slane %v10869_v3, %v10760_v24  ;;  %v4064_v14 = vadd.f32 %v4032_v32, %v3872_v28  ;;  %v10886_v28 = vld [vmem:[#allocation40_spill] sm:$0xff] }
 0x38f   : > { %v4065_v1 = vadd.f32 %v4033_v38, %v3873_v15  ;;  %v4416_v9 = vmul.f32 %v4357_v61, %v10873_v50  ;;  %v4741_v30 = vrot.slane %v10868_v22, %v10818_v31  ;;  %v4417_v27 = vmul.f32 %v4361_v46, %v10873_v50  ;;  %v10883_v22 = vld [vmem:[#allocation96_spill] sm:$0xff] }
 0x390   : > { %5700 = vmatpush3.bf16.msra.mxu1 %v4846_v60  ;;  %v4608_v47 = vmul.f32 %v4549_v36, %v10874_v7  ;;  %v4609_v16 = vmul.f32 %v4553_v17, %v10874_v7  ;;  %v4745_v49 = vrot.slane %v10869_v3, %v10818_v31  ;;  %v4256_v52 = vadd.f32 %v4224_v57, %v4064_v14  ;;  %v10884_v3 = vld [vmem:[#allocation38_spill] sm:$0xff]  ;;  %v10887_v14 = vld [vmem:[#allocation41_spill] sm:$0xff] }
 0x391   : > { %v4257_v53 = vadd.f32 %v4225_v5, %v4065_v1  ;;  %v4800_v37 = vmul.f32 %v4741_v30, %v10875_v6  ;;  %v3664_v18 = vadd.f32 %v10877_v4, %v10876_v43  ;;  %v3665_v33 = vadd.f32 %v10879_v21, %v10878_v12  ;;  %v10893_v21 = vld [vmem:[#allocation20_spill] sm:$0xff] }
 0x392   : > { %v4801_v2 = vmul.f32 %v4745_v49, %v10875_v6  ;;  %v3909_v62 = vrot.slane %v10880_v58, %v10603_v34  ;;  %v3913_v42 = vrot.slane %v10881_v29, %v10603_v34  ;;  %v4448_v59 = vadd.f32 %v4416_v9, %v4256_v52  ;;  %v10888_v49 = vld [vmem:[#allocation16_spill] sm:$0xff] }
 0x393   : > { %v4449_v54 = vadd.f32 %v4417_v27, %v4257_v53  ;;  %v3856_v45 = vadd.f32 %v10882_v11, %v3664_v18  ;;  %v4101_v41 = vrot.slane %v10880_v58, %v6701_v55  ;;  %v3857_v44 = vadd.f32 %v10883_v22, %v3665_v33  ;;  %v10889_v52 = vld [vmem:[#allocation120_spill] sm:$0xff]  ;;  %v10891_v18 = vld [vmem:[#allocation73_spill] sm:$0xff] }
 0x394   : > { %v4016_v63 = vmul.f32 %v3909_v62, %v10884_v3  ;;  %v4017_v51 = vmul.f32 %v3913_v42, %v10884_v3  ;;  %v4105_v48 = vrot.slane %v10881_v29, %v6701_v55  ;;  %v4640_v23 = vadd.f32 %v4608_v47, %v4448_v59 }
 0x395   : > { %v4641_v8 = vadd.f32 %v4609_v16, %v4449_v54  ;;  %v4208_v25 = vmul.f32 %v4101_v41, %v10885_v0  ;;  %v4293_v10 = vrot.slane %v10880_v58, %v6703_v56  ;;  %v4297_v35 = vrot.slane %v10881_v29, %v6703_v56 }
 0x396   : > { %v4048_v32 = vadd.f32 %v4016_v63, %v3856_v45  ;;  %v4049_v40 = vadd.f32 %v4017_v51, %v3857_v44  ;;  %v4209_v20 = vmul.f32 %v4105_v48, %v10885_v0  ;;  %v4832_v38 = vadd.f32 %v4800_v37, %v4640_v23  ;;  %v10890_v37 = vld [vmem:[#allocation42_spill] sm:$0xff] }
 0x397   : > { %v4833_v57 = vadd.f32 %v4801_v2, %v4641_v8  ;;  %v4400_v15 = vmul.f32 %v4293_v10, %v10886_v28  ;;  %v4485_v5 = vrot.slane %v10880_v58, %v10760_v24  ;;  %v4401_v46 = vmul.f32 %v4297_v35, %v10886_v28  ;;  %v10892_v2 = vld [vmem:[#allocation121_spill] sm:$0xff] }
 0x398   : > { %v4240_v61 = vadd.f32 %v4208_v25, %v4048_v32  ;;  %v4241_v60 = vadd.f32 %v4209_v20, %v4049_v40  ;;  %v4489_v36 = vrot.slane %v10881_v29, %v10760_v24  ;;  %v4677_v9 = vrot.slane %v10880_v58, %v10818_v31 }
 0x399   : > { %v4853_v17 = vpack.c.bf16 %v4833_v57, %v4832_v38  ;;  %v4592_v1 = vmul.f32 %v4485_v5, %v10887_v14  ;;  %v4681_v30 = vrot.slane %v10881_v29, %v10818_v31  ;;  %v3678_v53 = vadd.f32 %v10889_v52, %v10888_v49  ;;  %v10894_v29 = vld [vmem:[#allocation71_spill] sm:$0xff]  ;;  %v10897_v52 = vld [vmem:[#allocation66_spill] sm:$0xff] }
 0x39a   : > { %v4432_v27 = vadd.f32 %v4400_v15, %v4240_v61  ;;  %v4433_v47 = vadd.f32 %v4401_v46, %v4241_v60  ;;  %v4593_v16 = vmul.f32 %v4489_v36, %v10887_v14  ;;  %v4784_v43 = vmul.f32 %v4677_v9, %v10890_v37 }
 0x39b   : > { %5701 = vmatprep.subr.bf16.mxu1 %v4853_v17  ;;  %v4785_v4 = vmul.f32 %v4681_v30, %v10890_v37  ;;  %v3679_v12 = vadd.f32 %v10892_v2, %v10891_v18  ;;  %v3773_v33 = vrot.slane %v10893_v21, %v10835_v39  ;;  %v3777_v42 = vrot.slane %v10894_v29, %v10835_v39  ;;  %v10899_v18 = vld [vmem:[#allocation44_spill] sm:$0xff] }
 0x39c   : > { %v4624_v58 = vadd.f32 %v4592_v1, %v4432_v27  ;;  %v4625_v62 = vadd.f32 %v4593_v16, %v4433_v47  ;;  %v3965_v59 = vrot.slane %v10893_v21, %v10603_v34  ;;  %v3969_v11 = vrot.slane %v10894_v29, %v10603_v34  ;;  %v10895_v47 = vld [vmem:[#allocation65_spill] sm:$0xff]  ;;  %v10896_v16 = vld [vmem:[#allocation84_spill] sm:$0xff] }
 0x39d   : > { %v3838_v54 = vmul.f32 %v3773_v33, %v10870_v13  ;;  %v4157_v45 = vrot.slane %v10893_v21, %v6701_v55  ;;  %v4161_v41 = vrot.slane %v10894_v29, %v6701_v55  ;;  %v3839_v63 = vmul.f32 %v3777_v42, %v10870_v13  ;;  %v10902_v42 = vld [vmem:[#allocation94_spill] sm:$0xff] }
 0x39e   : > { %v4816_v22 = vadd.f32 %v4784_v43, %v4624_v58  ;;  %v4817_v44 = vadd.f32 %v4785_v4, %v4625_v62  ;;  %v4030_v51 = vmul.f32 %v3965_v59, %v10871_v19  ;;  %v4031_v23 = vmul.f32 %v3969_v11, %v10871_v19  ;;  %v10901_v62 = vld [vmem:[#allocation93_spill] sm:$0xff] }
 0x39f   : > { %v3870_v48 = vadd.f32 %v3838_v54, %v3678_v53  ;;  %v4222_v8 = vmul.f32 %v4157_v45, %v10872_v26  ;;  %v4223_v25 = vmul.f32 %v4161_v41, %v10872_v26  ;;  %v3871_v32 = vadd.f32 %v3839_v63, %v3679_v12  ;;  %v10898_v53 = vld [vmem:[#allocation85_spill] sm:$0xff] }
 0x3a0   : > { %v4845_v10 = vpack.c.bf16 %v4817_v44, %v4816_v22  ;;  %v4349_v40 = vrot.slane %v10893_v21, %v6703_v56  ;;  %v4353_v20 = vrot.slane %v10894_v29, %v6703_v56  ;;  %v4541_v38 = vrot.slane %v10893_v21, %v10760_v24  ;;  %v10900_v12 = vld [vmem:[#allocation45_spill] sm:$0xff] }
 0x3a1   : > { %v4062_v35 = vadd.f32 %v4030_v51, %v3870_v48  ;;  %v4545_v57 = vrot.slane %v10894_v29, %v10760_v24  ;;  %v4733_v15 = vrot.slane %v10893_v21, %v10818_v31  ;;  %v4063_v5 = vadd.f32 %v4031_v23, %v3871_v32 }
 0x3a2   : > { %5702 = vmatpush3.bf16.msra.mxu1 %v4845_v10  ;;  %v4414_v61 = vmul.f32 %v4349_v40, %v10873_v50  ;;  %v4415_v60 = vmul.f32 %v4353_v20, %v10873_v50  ;;  %v4737_v46 = vrot.slane %v10894_v29, %v10818_v31  ;;  %v4606_v17 = vmul.f32 %v4541_v38, %v10874_v7 }
 0x3a3   : > { %v4254_v36 = vadd.f32 %v4222_v8, %v4062_v35  ;;  %v4607_v1 = vmul.f32 %v4545_v57, %v10874_v7  ;;  %v4798_v9 = vmul.f32 %v4733_v15, %v10875_v6  ;;  %v4255_v30 = vadd.f32 %v4223_v25, %v4063_v5 }
 0x3a4   : > { %v4799_v27 = vmul.f32 %v4737_v46, %v10875_v6  ;;  %v3662_v49 = vadd.f32 %v10896_v16, %v10895_v47  ;;  %v3663_v43 = vadd.f32 %v10898_v53, %v10897_v52  ;;  %v3901_v2 = vrot.slane %v10899_v18, %v10603_v34  ;;  %v10905_v47 = vld [vmem:[#allocation107_spill] sm:$0xff]  ;;  %v10907_v53 = vld [vmem:[#allocation48_spill] sm:$0xff] }
 0x3a5   : > { %v4446_v4 = vadd.f32 %v4414_v61, %v4254_v36  ;;  %v3905_v21 = vrot.slane %v10900_v12, %v10603_v34  ;;  %v4093_v33 = vrot.slane %v10899_v18, %v6701_v55  ;;  %v4447_v58 = vadd.f32 %v4415_v60, %v4255_v30  ;;  %v10903_v36 = vld [vmem:[#allocation105_spill] sm:$0xff]  ;;  %v10906_v16 = vld [vmem:[#allocation119_spill] sm:$0xff] }
 0x3a6   : > { %v3854_v29 = vadd.f32 %v10901_v62, %v3662_v49  ;;  %v3855_v59 = vadd.f32 %v10902_v42, %v3663_v43  ;;  %v4097_v54 = vrot.slane %v10900_v12, %v6701_v55  ;;  %v4014_v45 = vmul.f32 %v3901_v2, %v10884_v3 }
 0x3a7   : > { %v4638_v11 = vadd.f32 %v4606_v17, %v4446_v4  ;;  %v4015_v41 = vmul.f32 %v3905_v21, %v10884_v3  ;;  %v4206_v22 = vmul.f32 %v4093_v33, %v10885_v0  ;;  %v4639_v44 = vadd.f32 %v4607_v1, %v4447_v58  ;;  %v10904_v17 = vld [vmem:[#allocation118_spill] sm:$0xff]  ;;  %v10908_v4 = vld [vmem:[#allocation69_spill] sm:$0xff] }
 0x3a8   : > { %v4207_v63 = vmul.f32 %v4097_v54, %v10885_v0  ;;  %v4285_v51 = vrot.slane %v10899_v18, %v6703_v56  ;;  %v4289_v48 = vrot.slane %v10900_v12, %v6703_v56  ;;  %v4046_v8 = vadd.f32 %v4014_v45, %v3854_v29 }
 0x3a9   : > { %v4830_v23 = vadd.f32 %v4798_v9, %v4638_v11  ;;  %v4047_v25 = vadd.f32 %v4015_v41, %v3855_v59  ;;  %v4477_v10 = vrot.slane %v10899_v18, %v10760_v24  ;;  %v4831_v32 = vadd.f32 %v4799_v27, %v4639_v44 }
 0x3aa   : > { %v4398_v40 = vmul.f32 %v4285_v51, %v10886_v28  ;;  %v4399_v20 = vmul.f32 %v4289_v48, %v10886_v28  ;;  %v4481_v35 = vrot.slane %v10900_v12, %v10760_v24  ;;  %v4238_v38 = vadd.f32 %v4206_v22, %v4046_v8 }
 0x3ab   : > { %v4239_v57 = vadd.f32 %v4207_v63, %v4047_v25  ;;  %v4590_v15 = vmul.f32 %v4477_v10, %v10887_v14  ;;  %v4669_v5 = vrot.slane %v10899_v18, %v10818_v31  ;;  %v4852_v61 = vpack.c.bf16 %v4831_v32, %v4830_v23 }
 0x3ac   : > { %v4591_v60 = vmul.f32 %v4481_v35, %v10887_v14  ;;  %v4673_v46 = vrot.slane %v10900_v12, %v10818_v31  ;;  %v3676_v1 = vadd.f32 %v10904_v17, %v10903_v36  ;;  %v4430_v9 = vadd.f32 %v4398_v40, %v4238_v38  ;;  %v10910_v36 = vld [vmem:[#allocation79_spill] sm:$0xff] }
 0x3ad   : > { %v4431_v30 = vadd.f32 %v4399_v20, %v4239_v57  ;;  %v4782_v27 = vmul.f32 %v4669_v5, %v10890_v37  ;;  %v3677_v49 = vadd.f32 %v10906_v16, %v10905_v47  ;;  %5703 = vmatprep.subr.bf16.mxu1 %v4852_v61  ;;  %v3765_v43 = vrot.slane %v10907_v53, %v10835_v39  ;;  %v10913_v47 = vld [vmem:[#allocation25_spill] sm:$0xff] }
 0x3ae   : > { %v4783_v52 = vmul.f32 %v4673_v46, %v10890_v37  ;;  %v3769_v18 = vrot.slane %v10908_v4, %v10835_v39  ;;  %v3957_v2 = vrot.slane %v10907_v53, %v10603_v34  ;;  %v4622_v12 = vadd.f32 %v4590_v15, %v4430_v9  ;;  %v10909_v46 = vld [vmem:[#allocation63_spill] sm:$0xff]  ;;  %v10911_v9 = vld [vmem:[#allocation64_spill] sm:$0xff] }
 0x3af   : > { %v4623_v21 = vadd.f32 %v4591_v60, %v4431_v30  ;;  %v3961_v33 = vrot.slane %v10908_v4, %v10603_v34  ;;  %v4149_v58 = vrot.slane %v10907_v53, %v6701_v55  ;;  %v3836_v62 = vmul.f32 %v3765_v43, %v10870_v13  ;;  %v10912_v30 = vld [vmem:[#allocation81_spill] sm:$0xff] }
 0x3b0   : > { %v3837_v29 = vmul.f32 %v3769_v18, %v10870_v13  ;;  %v4028_v42 = vmul.f32 %v3957_v2, %v10871_v19  ;;  %v4153_v59 = vrot.slane %v10908_v4, %v6701_v55  ;;  %v4814_v54 = vadd.f32 %v4782_v27, %v4622_v12  ;;  %v10916_v12 = vld [vmem:[#allocation91_spill] sm:$0xff] }
 0x3b1   : > { %v4815_v11 = vadd.f32 %v4783_v52, %v4623_v21  ;;  %v4029_v45 = vmul.f32 %v3961_v33, %v10871_v19  ;;  %v4220_v41 = vmul.f32 %v4149_v58, %v10872_v26  ;;  %v3868_v22 = vadd.f32 %v3836_v62, %v3676_v1 }
 0x3b2   : > { %v3869_v44 = vadd.f32 %v3837_v29, %v3677_v49  ;;  %v4221_v63 = vmul.f32 %v4153_v59, %v10872_v26  ;;  %v4341_v51 = vrot.slane %v10907_v53, %v6703_v56  ;;  %v4345_v23 = vrot.slane %v10908_v4, %v6703_v56  ;;  %v10914_v49 = vld [vmem:[#allocation26_spill] sm:$0xff] }
 0x3b3   : > { %v4844_v48 = vpack.c.bf16 %v4815_v11, %v4814_v54  ;;  %v4533_v8 = vrot.slane %v10907_v53, %v10760_v24  ;;  %v4537_v25 = vrot.slane %v10908_v4, %v10760_v24  ;;  %v4060_v10 = vadd.f32 %v4028_v42, %v3868_v22 }
 0x3b4   : > { %v4061_v32 = vadd.f32 %v4029_v45, %v3869_v44  ;;  %v4412_v40 = vmul.f32 %v4341_v51, %v10873_v50  ;;  %v4725_v20 = vrot.slane %v10907_v53, %v10818_v31  ;;  %v4413_v35 = vmul.f32 %v4345_v23, %v10873_v50 }
 0x3b5   : > { %5704 = vmatpush3.bf16.msra.mxu1 %v4844_v48  ;;  %v4604_v38 = vmul.f32 %v4533_v8, %v10874_v7  ;;  %v4605_v57 = vmul.f32 %v4537_v25, %v10874_v7  ;;  %v4729_v15 = vrot.slane %v10908_v4, %v10818_v31  ;;  %v4252_v5 = vadd.f32 %v4220_v41, %v4060_v10  ;;  %v10915_v4 = vld [vmem:[#allocation90_spill] sm:$0xff] }
 0x3b6   : > { %v4253_v61 = vadd.f32 %v4221_v63, %v4061_v32  ;;  %v4796_v60 = vmul.f32 %v4725_v20, %v10875_v6  ;;  %v3660_v17 = vadd.f32 %v10910_v36, %v10909_v46  ;;  %v3661_v27 = vadd.f32 %v10912_v30, %v10911_v9  ;;  %v10921_v30 = vld [vmem:[#allocation61_spill] sm:$0xff] }
 0x3b7   : > { %v4797_v1 = vmul.f32 %v4729_v15, %v10875_v6  ;;  %v3893_v16 = vrot.slane %v10913_v47, %v10603_v34  ;;  %v3897_v52 = vrot.slane %v10914_v49, %v10603_v34  ;;  %v4444_v53 = vadd.f32 %v4412_v40, %v4252_v5  ;;  %v10917_v5 = vld [vmem:[#allocation103_spill] sm:$0xff] }
 0x3b8   : > { %v4445_v43 = vadd.f32 %v4413_v35, %v4253_v61  ;;  %v3852_v18 = vadd.f32 %v10915_v4, %v3660_v17  ;;  %v4085_v2 = vrot.slane %v10913_v47, %v6701_v55  ;;  %v3853_v21 = vadd.f32 %v10916_v12, %v3661_v27  ;;  %v10918_v61 = vld [vmem:[#allocation17_spill] sm:$0xff]  ;;  %v10919_v17 = vld [vmem:[#allocation104_spill] sm:$0xff] }
 0x3b9   : > { %v4012_v33 = vmul.f32 %v3893_v16, %v10884_v3  ;;  %v4013_v58 = vmul.f32 %v3897_v52, %v10884_v3  ;;  %v4089_v62 = vrot.slane %v10914_v49, %v6701_v55  ;;  %v4636_v29 = vadd.f32 %v4604_v38, %v4444_v53 }
 0x3ba   : > { %v4637_v42 = vadd.f32 %v4605_v57, %v4445_v43  ;;  %v4204_v59 = vmul.f32 %v4085_v2, %v10885_v0  ;;  %v4277_v54 = vrot.slane %v10913_v47, %v6703_v56  ;;  %v4281_v22 = vrot.slane %v10914_v49, %v6703_v56 }
 0x3bb   : > { %v4044_v11 = vadd.f32 %v4012_v33, %v3852_v18  ;;  %v4045_v45 = vadd.f32 %v4013_v58, %v3853_v21  ;;  %v4205_v41 = vmul.f32 %v4089_v62, %v10885_v0  ;;  %v4828_v44 = vadd.f32 %v4796_v60, %v4636_v29 }
 0x3bc   : > { %v4829_v63 = vadd.f32 %v4797_v1, %v4637_v42  ;;  %v4396_v51 = vmul.f32 %v4277_v54, %v10886_v28  ;;  %v4469_v48 = vrot.slane %v10913_v47, %v10760_v24  ;;  %v4397_v25 = vmul.f32 %v4281_v22, %v10886_v28  ;;  %v10920_v1 = vld [vmem:[#allocation80_spill] sm:$0xff] }
 0x3bd   : > { %v4236_v23 = vadd.f32 %v4204_v59, %v4044_v11  ;;  %v4237_v8 = vadd.f32 %v4205_v41, %v4045_v45  ;;  %v4473_v10 = vrot.slane %v10914_v49, %v10760_v24  ;;  %v4661_v20 = vrot.slane %v10913_v47, %v10818_v31 }
 0x3be   : > { %v4851_v32 = vpack.c.bf16 %v4829_v63, %v4828_v44  ;;  %v4588_v40 = vmul.f32 %v4469_v48, %v10887_v14  ;;  %v4665_v35 = vrot.slane %v10914_v49, %v10818_v31  ;;  %v3674_v60 = vadd.f32 %v10918_v61, %v10917_v5  ;;  %v10922_v49 = vld [vmem:[#allocation22_spill] sm:$0xff]  ;;  %v10927_v5 = vld [vmem:[#allocation23_spill] sm:$0xff] }
 0x3bf   : > { %v4428_v38 = vadd.f32 %v4396_v51, %v4236_v23  ;;  %v4429_v57 = vadd.f32 %v4397_v25, %v4237_v8  ;;  %v4589_v15 = vmul.f32 %v4473_v10, %v10887_v14  ;;  %v4780_v46 = vmul.f32 %v4661_v20, %v10890_v37  ;;  %v10924_v20 = vld [vmem:[#allocation35_spill] sm:$0xff] }
 0x3c0   : > { %5705 = vmatprep.subr.bf16.mxu1 %v4851_v32  ;;  %v4781_v36 = vmul.f32 %v4665_v35, %v10890_v37  ;;  %v3675_v9 = vadd.f32 %v10920_v1, %v10919_v17  ;;  %v3757_v27 = vrot.slane %v10921_v30, %v10835_v39  ;;  %v3761_v52 = vrot.slane %v10922_v49, %v10835_v39  ;;  %v10929_v17 = vld [vmem:[#allocation37_spill] sm:$0xff] }
 0x3c1   : > { %v4620_v47 = vadd.f32 %v4588_v40, %v4428_v38  ;;  %v4621_v16 = vadd.f32 %v4589_v15, %v4429_v57  ;;  %v3949_v53 = vrot.slane %v10921_v30, %v10603_v34  ;;  %v3953_v4 = vrot.slane %v10922_v49, %v10603_v34  ;;  %v10923_v40 = vld [vmem:[#allocation49_spill] sm:$0xff]  ;;  %v10925_v38 = vld [vmem:[#allocation32_spill] sm:$0xff] }
 0x3c2   : > { %v3834_v43 = vmul.f32 %v3757_v27, %v10870_v13  ;;  %v4141_v18 = vrot.slane %v10921_v30, %v6701_v55  ;;  %v4145_v2 = vrot.slane %v10922_v49, %v6701_v55  ;;  %v3835_v33 = vmul.f32 %v3761_v52, %v10870_v13  ;;  %v10926_v57 = vld [vmem:[#allocation77_spill] sm:$0xff] }
 0x3c3   : > { %v4812_v12 = vadd.f32 %v4780_v46, %v4620_v47  ;;  %v4813_v21 = vadd.f32 %v4781_v36, %v4621_v16  ;;  %v4026_v39 = vmul.f32 %v3949_v53, %v10871_v19  ;;  %v4027_v62 = vmul.f32 %v3953_v4, %v10871_v19 }
 0x3c4   : > { %v3866_v58 = vadd.f32 %v3834_v43, %v3674_v60  ;;  %v4218_v29 = vmul.f32 %v4141_v18, %v10872_v26  ;;  %v4219_v42 = vmul.f32 %v4145_v2, %v10872_v26  ;;  %v3867_v54 = vadd.f32 %v3835_v33, %v3675_v9  ;;  %v10928_v60 = vld [vmem:[#allocation24_spill] sm:$0xff] }
 0x3c5   : > { %v4843_v59 = vpack.c.bf16 %v4813_v21, %v4812_v12  ;;  %v4333_v11 = vrot.slane %v10921_v30, %v6703_v56  ;;  %v4337_v45 = vrot.slane %v10922_v49, %v6703_v56  ;;  %v4525_v13 = vrot.slane %v10921_v30, %v10760_v24 }
 0x3c6   : > { %v4058_v41 = vadd.f32 %v4026_v39, %v3866_v58  ;;  %v4529_v22 = vrot.slane %v10922_v49, %v10760_v24  ;;  %v4717_v19 = vrot.slane %v10921_v30, %v10818_v31  ;;  %v4059_v26 = vadd.f32 %v4027_v62, %v3867_v54 }
 0x3c7   : > { %5706 = vmatpush3.bf16.msra.mxu1 %v4843_v59  ;;  %v4410_v44 = vmul.f32 %v4333_v11, %v10873_v50  ;;  %v4411_v63 = vmul.f32 %v4337_v45, %v10873_v50  ;;  %v4721_v51 = vrot.slane %v10922_v49, %v10818_v31  ;;  %v4602_v23 = vmul.f32 %v4525_v13, %v10874_v7 }
 0x3c8   : > { %v4250_v48 = vadd.f32 %v4218_v29, %v4058_v41  ;;  %v4603_v8 = vmul.f32 %v4529_v22, %v10874_v7  ;;  %v4794_v25 = vmul.f32 %v4717_v19, %v10875_v6  ;;  %v4251_v10 = vadd.f32 %v4219_v42, %v4059_v26  ;;  %v4890_v41 = vld [vmem:[%s10160_s3] sm:$0xff] }
 0x3c9   : > { %v4795_v32 = vmul.f32 %v4721_v51, %v10875_v6  ;;  %v3658_v35 = vadd.f32 %v10924_v20, %v10923_v40  ;;  %v3659_v15 = vadd.f32 %v10926_v57, %v10925_v38  ;;  %v3885_v61 = vrot.slane %v10927_v5, %v10603_v34  ;;  %v10930_v6 = vld [vmem:[#allocation89_spill] sm:$0xff]  ;;  %4924 = vperm.xlu0 %5933, %v4890_v41   ;;  %v4900_v40 = vld [vmem:[%s10160_s3 + $0x50] sm:$0xff]  ;;  %v4901_v20 = vld [vmem:[%s10160_s3 + $0x58] sm:$0xff] }
 0x3ca   : > { %v4442_v50 = vadd.f32 %v4410_v44, %v4250_v48  ;;  %v3889_v46 = vrot.slane %v10928_v60, %v10603_v34  ;;  %v4077_v7 = vrot.slane %v10927_v5, %v6701_v55  ;;  %v4443_v36 = vadd.f32 %v4411_v63, %v4251_v10  ;;  %v6079_v26 = vld [vmem:[%s10159_s2] ss:$8 sps:$4 sm:$0xff]   ;;  %v6082_v44 = vld [vmem:[%s10159_s2 + $0x14] ss:$8 sps:$4 sm:$0xff]  }
 0x3cb   : > { %v3850_v1 = vadd.f32 %v10929_v17, %v3658_v35  ;;  %v3851_v9 = vadd.f32 %v10930_v6, %v3659_v15  ;;  %v4081_v30 = vrot.slane %v10928_v60, %v6701_v55  ;;  %v4010_v47 = vmul.f32 %v3885_v61, %v10884_v3  ;;  %v4894_v63 = vld [vmem:[%s10160_s3 + $0x20] sm:$0xff]  ;;  %v4895_v51 = vld [vmem:[%s10160_s3 + $0x28] sm:$0xff]  ;;  %v4896_v48 = vld [vmem:[%s10160_s3 + $0x30] sm:$0xff] }
 0x3cc   : > { %v4634_v27 = vadd.f32 %v4602_v23, %v4442_v50  ;;  %v4011_v16 = vmul.f32 %v3889_v46, %v10884_v3  ;;  %v4202_v49 = vmul.f32 %v4077_v7, %v10885_v0  ;;  %v4635_v52 = vadd.f32 %v4603_v8, %v4443_v36  ;;  %v4897_v23 = vld [vmem:[%s10160_s3 + $0x38] sm:$0xff]  ;;  %v4898_v10 = vld [vmem:[%s10160_s3 + $0x40] sm:$0xff]  ;;  %v4903_v15 = vld [vmem:[%s10160_s3 + $0x68] sm:$0xff] }
 0x3cd   : > { %v4203_v34 = vmul.f32 %v4081_v30, %v10885_v0  ;;  %v4269_v53 = vrot.slane %v10927_v5, %v6703_v56  ;;  %v4273_v43 = vrot.slane %v10928_v60, %v6703_v56  ;;  %v4042_v18 = vadd.f32 %v4010_v47, %v3850_v1  ;;  %v6084_v8 = vld [vmem:[%s10159_s2 + $0x10] ss:$8 sps:$4 sm:$0xff]   ;;  %v6087_v35 = vld [vmem:[%s10159_s2 + $0x20] ss:$8 sps:$4 sm:$0xff]   ;;  %v6088_v38 = vld [vmem:[%s10159_s2 + $0x34] ss:$8 sps:$4 sm:$0xff]  }
 0x3ce   : > { %v4826_v4 = vadd.f32 %v4794_v25, %v4634_v27  ;;  %v4043_v2 = vadd.f32 %v4011_v16, %v3851_v9  ;;  %v4461_v55 = vrot.slane %v10927_v5, %v10760_v24  ;;  %v4827_v12 = vadd.f32 %v4795_v32, %v4635_v52  ;;  %v6085_v25 = vld [vmem:[%s10159_s2 + $0x24] ss:$8 sps:$4 sm:$0xff]   ;;  %v4904_v50 = vld [vmem:[%s10160_s3 + $0x70] sm:$0xff]  ;;  %v4909_v17 = vld [vmem:[%s10160_s3 + $0x98] sm:$0xff] }
 0x3cf   : > { %v4394_v3 = vmul.f32 %v4269_v53, %v10886_v28  ;;  %v4465_v21 = vrot.slane %v10928_v60, %v10760_v24  ;;  %v4234_v33 = vadd.f32 %v4202_v49, %v4042_v18  ;;  %v4395_v39 = vmul.f32 %v4273_v43, %v10886_v28  ;;  %v4899_v32 = vld [vmem:[%s10160_s3 + $0x48] sm:$0xff]  ;;  %v4902_v57 = vld [vmem:[%s10160_s3 + $0x60] sm:$0xff]  ;;  %v6090_v61 = vld [vmem:[%s10159_s2 + $0x30] ss:$8 sps:$4 sm:$0xff]  }
 0x3d0   : > { %v4235_v0 = vadd.f32 %v4203_v34, %v4043_v2  ;;  %v4653_v58 = vrot.slane %v10927_v5, %v10818_v31  ;;  %v4850_v56 = vpack.c.bf16 %v4827_v12, %v4826_v4  ;;  %v4657_v62 = vrot.slane %v10928_v60, %v10818_v31  ;;  %v4892_v31 = vld [vmem:[%s10160_s3 + $0x10] sm:$0xff]  ;;  %v4905_v5 = vld [vmem:[%s10160_s3 + $0x78] sm:$0xff]  ;;  %v6091_v60 = vld [vmem:[%s10159_s2 + $0x44] ss:$8 sps:$4 sm:$0xff]  }
 0x3d1   : > { %v4426_v29 = vadd.f32 %v4394_v3, %v4234_v33  ;;  %v4586_v59 = vmul.f32 %v4461_v55, %v10887_v14  ;;  %v4587_v54 = vmul.f32 %v4465_v21, %v10887_v14  ;;  %4934 = vperm.xlu1 %5934, %v4892_v31   ;;  %v4891_v14 = vld [vmem:[%s10160_s3 + $0x8] sm:$0xff]  ;;  %v4906_v46 = vld [vmem:[%s10160_s3 + $0x80] sm:$0xff]  ;;  %v4908_v36 = vld [vmem:[%s10160_s3 + $0x90] sm:$0xff] }
 0x3d2   : > { %v4427_v42 = vadd.f32 %v4395_v39, %v4235_v0  ;;  %5707 = vmatprep.subr.bf16.mxu1 %v4850_v56  ;;  %v4778_v45 = vmul.f32 %v4653_v58, %v10890_v37  ;;  %v4779_v28 = vmul.f32 %v4657_v62, %v10890_v37  ;;  %v4893_v37 = vld [vmem:[%s10160_s3 + $0x18] sm:$0xff]  ;;  %4929 = vperm.xlu0 %5933, %v4891_v14   ;;  %v4907_v7 = vld [vmem:[%s10160_s3 + $0x88] sm:$0xff]  ;;  %v4910_v9 = vld [vmem:[%s10160_s3 + $0xa0] sm:$0xff] }
 0x3d3   : > { %v4618_v11 = vadd.f32 %v4586_v59, %v4426_v29  ;;  %v6093_v1 = vld [vmem:[%s10159_s2 + $0x40] ss:$8 sps:$4 sm:$0xff]   ;;  %v6094_v6 = vld [vmem:[%s10159_s2 + $0x54] ss:$8 sps:$4 sm:$0xff]   ;;  %v6096_v16 = vld [vmem:[%s10159_s2 + $0x50] ss:$8 sps:$4 sm:$0xff]  }
 0x3d4   : > { %v4619_v24 = vadd.f32 %v4587_v54, %v4427_v42  ;;  %v4911_v30 = vld [vmem:[%s10160_s3 + $0xa8] sm:$0xff]  ;;  %v4912_v27 = vld [vmem:[%s10160_s3 + $0xb0] sm:$0xff]  ;;  %v4913_v47 = vld [vmem:[%s10160_s3 + $0xb8] sm:$0xff] }
 0x3d5   : > { %v4810_v13 = vadd.f32 %v4778_v45, %v4618_v11  ;;  %4939 = vperm.xlu1 %5934, %v4893_v37   ;;  %v6097_v49 = vld [vmem:[%s10159_s2 + $0x64] ss:$8 sps:$4 sm:$0xff]   ;;  %v4916_v53 = vld [vmem:[%s10160_s3 + $0xd0] sm:$0xff]  ;;  %v4917_v43 = vld [vmem:[%s10160_s3 + $0xd8] sm:$0xff] }
 0x3d6   : > { %v4811_v22 = vadd.f32 %v4779_v28, %v4619_v24  ;;  %4944 = vperm.xlu0 %5933, %v4894_v63   ;;  %v4914_v52 = vld [vmem:[%s10160_s3 + $0xc0] sm:$0xff]  ;;  %v4915_v34 = vld [vmem:[%s10160_s3 + $0xc8] sm:$0xff]  ;;  %v6100_v18 = vld [vmem:[%s10159_s2 + $0x74] ss:$8 sps:$4 sm:$0xff]  }
 0x3d7   : > { %v6099_v4 = vld [vmem:[%s10159_s2 + $0x60] ss:$8 sps:$4 sm:$0xff]   ;;  %v6102_v2 = vld [vmem:[%s10159_s2 + $0x70] ss:$8 sps:$4 sm:$0xff]   ;;  %v6103_v55 = vld [vmem:[%s10159_s2 + $0x84] ss:$8 sps:$4 sm:$0xff]  }
 0x3d8   : > { %v4842_v19 = vpack.c.bf16 %v4811_v22, %v4810_v13  ;;  %v6105_v12 = vld [vmem:[%s10159_s2 + $0x80] ss:$8 sps:$4 sm:$0xff]   ;;  %v6106_v3 = vld [vmem:[%s10159_s2 + $0x94] ss:$8 sps:$4 sm:$0xff]   ;;  %v6108_v0 = vld [vmem:[%s10159_s2 + $0x90] ss:$8 sps:$4 sm:$0xff]  }
 0x3d9   : > { %4949 = vperm.xlu1 %5934, %v4895_v51   ;;  %v4919_v21 = vld [vmem:[%s10160_s3 + $0xe8] sm:$0xff]  ;;  %v4918_v33 = vld [vmem:[%s10160_s3 + $0xe0] sm:$0xff]  ;;  %v4921_v39 = vld [vmem:[%s10160_s3 + $0xf8] sm:$0xff] }
 0x3da   : > { %5708 = vmatpush3.bf16.msra.mxu1 %v4842_v19  ;;  %4954 = vperm.xlu0 %5933, %v4896_v48   ;;  %v4920_v58 = vld [vmem:[%s10160_s3 + $0xf0] sm:$0xff]  ;;  %v6109_v56 = vld [vmem:[%s10159_s2 + $0xa4] ss:$8 sps:$4 sm:$0xff]   ;;  %v6111_v62 = vld [vmem:[%s10159_s2 + $0xa0] ss:$8 sps:$4 sm:$0xff]  }
 0x3db   : > { %v6112_v29 = vld [vmem:[%s10159_s2 + $0xb4] ss:$8 sps:$4 sm:$0xff]   ;;  %v6114_v42 = vld [vmem:[%s10159_s2 + $0xb0] ss:$8 sps:$4 sm:$0xff]   ;;  %v6117_v59 = vld [vmem:[%s10159_s2 + $0xc4] ss:$8 sps:$4 sm:$0xff]  }
 0x3dc   : > { %v6115_v54 = vld [vmem:[%s10159_s2 + $0xc0] ss:$8 sps:$4 sm:$0xff]   ;;  %v6120_v11 = vld [vmem:[%s10159_s2 + $0xd4] ss:$8 sps:$4 sm:$0xff]   ;;  %v6118_v24 = vld [vmem:[%s10159_s2 + $0xd0] ss:$8 sps:$4 sm:$0xff]  }
 0x3dd   : > { %5275 = vmatmul.mubr.bf16.vlgmr.msra.gmra.mxu1 %v6079_v26  ;;  %4959 = vperm.xlu1 %5934, %v4897_v23   ;;  %v6123_v45 = vld [vmem:[%s10159_s2 + $0xe4] ss:$8 sps:$4 sm:$0xff]   ;;  %v6121_v28 = vld [vmem:[%s10159_s2 + $0xe0] ss:$8 sps:$4 sm:$0xff]   ;;  %v6126_v41 = vld [vmem:[%s10159_s2 + $0xf4] ss:$8 sps:$4 sm:$0xff]  }
 0x3de   : > { %5282 = vmatprep.mubr.bf16.mxu1 %v6082_v44  ;;  %4964 = vperm.xlu0 %5933, %v4898_v10   ;;  %v6124_v31 = vld [vmem:[%s10159_s2 + $0xf0] ss:$8 sps:$4 sm:$0xff]  }
 0x3e1   : > { %4969 = vperm.xlu1 %5934, %v4899_v32  }
 0x3e2   : > { %4974 = vperm.xlu0 %5933, %v4900_v40  }
 0x3e5   : > { %5283 = vmatmul.mubr.bf16.gmra.mxu1 %v6084_v8  ;;  %4979 = vperm.xlu1 %5934, %v4901_v20  }
 0x3e6   : > { %5290 = vmatprep.mubr.bf16.mxu1 %v6085_v25  ;;  %4984 = vperm.xlu0 %5933, %v4902_v57  }
 0x3e9   : > { %4989 = vperm.xlu1 %5934, %v4903_v15  }
 0x3ea   : > { %4994 = vperm.xlu0 %5933, %v4904_v50  }
 0x3ed   : > { %5291 = vmatmul.mubr.bf16.gmra.mxu1 %v6087_v35  ;;  %4999 = vperm.xlu1 %5934, %v4905_v5  }
 0x3ee   : > { %5298 = vmatprep.mubr.bf16.mxu1 %v6088_v38  ;;  %5004 = vperm.xlu0 %5933, %v4906_v46  }
 0x3f1   : > { %5009 = vperm.xlu1 %5934, %v4907_v7  }
 0x3f2   : > { %5014 = vperm.xlu0 %5933, %v4908_v36  }
 0x3f5   : > { %5299 = vmatmul.mubr.bf16.gmra.mxu1 %v6090_v61  ;;  %5019 = vperm.xlu1 %5934, %v4909_v17  }
 0x3f6   : > { %5306 = vmatprep.mubr.bf16.mxu1 %v6091_v60  ;;  %5024 = vperm.xlu0 %5933, %v4910_v9  }
 0x3f9   : > { %5029 = vperm.xlu1 %5934, %v4911_v30  }
 0x3fa   : > { %5034 = vperm.xlu0 %5933, %v4912_v27  }
 0x3fd   : > { %5307 = vmatmul.mubr.bf16.gmra.mxu1 %v6093_v1  ;;  %5039 = vperm.xlu1 %5934, %v4913_v47  }
 0x3fe   : > { %5314 = vmatprep.mubr.bf16.mxu1 %v6094_v6  ;;  %5044 = vperm.xlu0 %5933, %v4914_v52  }
 0x401   : > { %5049 = vperm.xlu1 %5934, %v4915_v34  }
 0x402   : > { %5054 = vperm.xlu0 %5933, %v4916_v53  }
 0x405   : > { %5315 = vmatmul.mubr.bf16.gmra.mxu1 %v6096_v16  ;;  %5059 = vperm.xlu1 %5934, %v4917_v43  }
 0x406   : > { %5322 = vmatprep.mubr.bf16.mxu1 %v6097_v49  ;;  %5064 = vperm.xlu0 %5933, %v4918_v33  }
 0x409   : > { %5069 = vperm.xlu1 %5934, %v4919_v21  }
 0x40a   : > { %5074 = vperm.xlu0 %5933, %v4920_v58  }
 0x40d   : > { %5323 = vmatmul.mubr.bf16.gmra.mxu1 %v6099_v4  ;;  %5079 = vperm.xlu1 %5934, %v4921_v39  }
 0x40e   : > { %5330 = vmatprep.mubr.bf16.mxu1 %v6100_v18 }
 0x415   : > { %5331 = vmatmul.mubr.bf16.gmra.mxu1 %v6102_v2 }
 0x416   : > { %5338 = vmatprep.mubr.bf16.mxu1 %v6103_v55 }
 0x41d   : > { %5339 = vmatmul.mubr.bf16.gmra.mxu1 %v6105_v12 }
 0x41e   : > { %5346 = vmatprep.mubr.bf16.mxu1 %v6106_v3 }
 0x425   : > { %5347 = vmatmul.mubr.bf16.gmra.mxu1 %v6108_v0 }
 0x426   : > { %5354 = vmatprep.mubr.bf16.mxu1 %v6109_v56 }
 0x42d   : > { %5355 = vmatmul.mubr.bf16.gmra.mxu1 %v6111_v62 }
 0x42e   : > { %5362 = vmatprep.mubr.bf16.mxu1 %v6112_v29 }
 0x435   : > { %5363 = vmatmul.mubr.bf16.gmra.mxu1 %v6114_v42 }
 0x436   : > { %5370 = vmatprep.mubr.bf16.mxu1 %v6117_v59 }
 0x43d   : > { %5371 = vmatmul.mubr.bf16.gmra.mxu1 %v6115_v54 }
 0x43e   : > { %5378 = vmatprep.mubr.bf16.mxu1 %v6120_v11 }
 0x444   : > { %v4925_v22 = vpop.permute.xlu0 %4924 }
 0x445   : > { %5379 = vmatmul.mubr.bf16.gmra.mxu1 %v6118_v24 }
 0x446   : > { %5386 = vmatprep.mubr.bf16.mxu1 %v6123_v45 }
 0x44c   : > { %v4935_v25 = vpop.permute.xlu1 %4934 }
 0x44d   : > { %5387 = vmatmul.mubr.bf16.gmra.mxu1 %v6121_v28  ;;  %v4930_v63 = vpop.permute.xlu0 %4929 }
 0x44e   : > { %5394 = vmatprep.mubr.bf16.mxu1 %v6126_v41 }
 0x450   : > { %v4940_v57 = vpop.permute.xlu1 %4939 }
 0x451   : > { %v4945_v60 = vpop.permute.xlu0 %4944 }
 0x454   : > { %v4950_v1 = vpop.permute.xlu1 %4949 }
 0x455   : > { %5395 = vmatmul.mubr.bf16.gmra.mxu1 %v6124_v31  ;;  %v4955_v47 = vpop.permute.xlu0 %4954 }
 0x458   : > { %v4960_v53 = vpop.permute.xlu1 %4959 }
 0x459   : > { %v4965_v55 = vpop.permute.xlu0 %4964 }
 0x45c   : > { %v4970_v0 = vpop.permute.xlu1 %4969 }
 0x45d   : > { %v4975_v29 = vpop.permute.xlu0 %4974 }
 0x460   : > { %v4980_v24 = vpop.permute.xlu1 %4979 }
 0x49d   : > { %v5709_v13 = vpop.f32.mrf.mxu1 }
 0x49f   : > { %v5710_v14 = vpop.f32.mrf.mxu1 }
 0x4a0   : > { %v5711_v19 = vadd.f32 %v5710_v14, %v5709_v13  ;;  %v4985_v13 = vpop.permute.xlu0 %4984 }
 0x4a1   : > { %v5712_v37 = vpop.f32.mrf.mxu1 }
 0x4a2   : > { %v5277_v26 = vadd.f32 %v5711_v19, %v4925_v22 }
 0x4a3   : > { %v5713_v44 = vpop.f32.mrf.mxu1 }
 0x4a4   : > { %v5714_v51 = vadd.f32 %v5713_v44, %v5712_v37  ;;  %5403 = vst [vmem:[%s10062_s6] sm:$0xff] %v5277_v26  ;;  %v4990_v26 = vpop.permute.xlu1 %4989 }
 0x4a5   : > { %v5715_v48 = vpop.f32.mrf.mxu1 }
 0x4a6   : > { %v5280_v23 = vadd.f32 %v5714_v51, %v4930_v63 }
 0x4a7   : > { %v5716_v8 = vpop.f32.mrf.mxu1 }
 0x4a8   : > { %v5717_v10 = vadd.f32 %v5716_v8, %v5715_v48  ;;  %5404 = vst [vmem:[%s10062_s6 + $0x8] sm:$0xff] %v5280_v23  ;;  %v4995_v23 = vpop.permute.xlu0 %4994 }
 0x4a9   : > { %v5718_v32 = vpop.f32.mrf.mxu1 }
 0x4aa   : > { %v5285_v40 = vadd.f32 %v5717_v10, %v4935_v25 }
 0x4ab   : > { %v5719_v20 = vpop.f32.mrf.mxu1 }
 0x4ac   : > { %v5720_v35 = vadd.f32 %v5719_v20, %v5718_v32  ;;  %5405 = vst [vmem:[%s10062_s6 + $0x10] sm:$0xff] %v5285_v40  ;;  %v5000_v40 = vpop.permute.xlu1 %4999 }
 0x4ad   : > { %v5721_v38 = vpop.f32.mrf.mxu1 }
 0x4ae   : > { %v5288_v15 = vadd.f32 %v5720_v35, %v4940_v57 }
 0x4af   : > { %v5722_v50 = vpop.f32.mrf.mxu1 }
 0x4b0   : > { %v5723_v5 = vadd.f32 %v5722_v50, %v5721_v38  ;;  %5406 = vst [vmem:[%s10062_s6 + $0x18] sm:$0xff] %v5288_v15  ;;  %v5005_v15 = vpop.permute.xlu0 %5004 }
 0x4b1   : > { %v5724_v61 = vpop.f32.mrf.mxu1 }
 0x4b2   : > { %v5293_v46 = vadd.f32 %v5723_v5, %v4945_v60 }
 0x4b3   : > { %v5725_v7 = vpop.f32.mrf.mxu1 }
 0x4b4   : > { %v5726_v36 = vadd.f32 %v5725_v7, %v5724_v61  ;;  %5407 = vst [vmem:[%s10062_s6 + $0x20] sm:$0xff] %v5293_v46  ;;  %v5010_v46 = vpop.permute.xlu1 %5009 }
 0x4b5   : > { %v5727_v17 = vpop.f32.mrf.mxu1 }
 0x4b6   : > { %v5296_v6 = vadd.f32 %v5726_v36, %v4950_v1 }
 0x4b7   : > { %v5728_v9 = vpop.f32.mrf.mxu1 }
 0x4b8   : > { %v5729_v30 = vadd.f32 %v5728_v9, %v5727_v17  ;;  %5408 = vst [vmem:[%s10062_s6 + $0x28] sm:$0xff] %v5296_v6  ;;  %v5015_v6 = vpop.permute.xlu0 %5014 }
 0x4b9   : > { %v5730_v27 = vpop.f32.mrf.mxu1 }
 0x4ba   : > { %v5301_v16 = vadd.f32 %v5729_v30, %v4955_v47 }
 0x4bb   : > { %v5731_v49 = vpop.f32.mrf.mxu1 }
 0x4bc   : > { %v5732_v52 = vadd.f32 %v5731_v49, %v5730_v27  ;;  %5409 = vst [vmem:[%s10062_s6 + $0x30] sm:$0xff] %v5301_v16  ;;  %v5020_v16 = vpop.permute.xlu1 %5019 }
 0x4bd   : > { %v5733_v34 = vpop.f32.mrf.mxu1 }
 0x4be   : > { %v5304_v43 = vadd.f32 %v5732_v52, %v4960_v53 }
 0x4bf   : > { %v5734_v4 = vpop.f32.mrf.mxu1 }
 0x4c0   : > { %v5735_v18 = vadd.f32 %v5734_v4, %v5733_v34  ;;  %5410 = vst [vmem:[%s10062_s6 + $0x38] sm:$0xff] %v5304_v43  ;;  %v5025_v43 = vpop.permute.xlu0 %5024 }
 0x4c1   : > { %v5736_v2 = vpop.f32.mrf.mxu1 }
 0x4c2   : > { %v5309_v12 = vadd.f32 %v5735_v18, %v4965_v55 }
 0x4c3   : > { %v5737_v3 = vpop.f32.mrf.mxu1 }
 0x4c4   : > { %v5738_v21 = vadd.f32 %v5737_v3, %v5736_v2  ;;  %5411 = vst [vmem:[%s10062_s6 + $0x40] sm:$0xff] %v5309_v12  ;;  %v5030_v12 = vpop.permute.xlu1 %5029 }
 0x4c5   : > { %v5739_v33 = vpop.f32.mrf.mxu1 }
 0x4c6   : > { %v5312_v39 = vadd.f32 %v5738_v21, %v4970_v0 }
 0x4c7   : > { %v5740_v58 = vpop.f32.mrf.mxu1 }
 0x4c8   : > { %v5741_v56 = vadd.f32 %v5740_v58, %v5739_v33  ;;  %5412 = vst [vmem:[%s10062_s6 + $0x48] sm:$0xff] %v5312_v39  ;;  %v5035_v39 = vpop.permute.xlu0 %5034 }
 0x4c9   : > { %v5742_v62 = vpop.f32.mrf.mxu1 }
 0x4ca   : > { %v5317_v42 = vadd.f32 %v5741_v56, %v4975_v29 }
 0x4cb   : > { %v5743_v59 = vpop.f32.mrf.mxu1 }
 0x4cc   : > { %v5744_v54 = vadd.f32 %v5743_v59, %v5742_v62  ;;  %5413 = vst [vmem:[%s10062_s6 + $0x50] sm:$0xff] %v5317_v42  ;;  %v5040_v42 = vpop.permute.xlu1 %5039 }
 0x4cd   : > { %v5745_v11 = vpop.f32.mrf.mxu1 }
 0x4ce   : > { %v5320_v45 = vadd.f32 %v5744_v54, %v4980_v24 }
 0x4cf   : > { %v5746_v28 = vpop.f32.mrf.mxu1 }
 0x4d0   : > { %v5747_v41 = vadd.f32 %v5746_v28, %v5745_v11  ;;  %5414 = vst [vmem:[%s10062_s6 + $0x58] sm:$0xff] %v5320_v45  ;;  %v5045_v45 = vpop.permute.xlu0 %5044 }
 0x4d1   : > { %v5748_v31 = vpop.f32.mrf.mxu1 }
 0x4d2   : > { %v5325_v22 = vadd.f32 %v5747_v41, %v4985_v13 }
 0x4d3   : > { %v5749_v14 = vpop.f32.mrf.mxu1 }
 0x4d4   : > { %v5750_v19 = vadd.f32 %v5749_v14, %v5748_v31  ;;  %5415 = vst [vmem:[%s10062_s6 + $0x60] sm:$0xff] %v5325_v22  ;;  %v5050_v22 = vpop.permute.xlu1 %5049 }
 0x4d5   : > { %v5751_v37 = vpop.f32.mrf.mxu1 }
 0x4d6   : > { %v5328_v44 = vadd.f32 %v5750_v19, %v4990_v26 }
 0x4d7   : > { %v5752_v63 = vpop.f32.mrf.mxu1 }
 0x4d8   : > { %v5753_v51 = vadd.f32 %v5752_v63, %v5751_v37  ;;  %5416 = vst [vmem:[%s10062_s6 + $0x68] sm:$0xff] %v5328_v44  ;;  %v5055_v44 = vpop.permute.xlu0 %5054 }
 0x4d9   : > { %v5754_v48 = vpop.f32.mrf.mxu1 }
 0x4da   : > { %v5333_v8 = vadd.f32 %v5753_v51, %v4995_v23 }
 0x4db   : > { %v5755_v25 = vpop.f32.mrf.mxu1 }
 0x4dc   : > { %v5756_v10 = vadd.f32 %v5755_v25, %v5754_v48  ;;  %5417 = vst [vmem:[%s10062_s6 + $0x70] sm:$0xff] %v5333_v8  ;;  %v5060_v8 = vpop.permute.xlu1 %5059 }
 0x4dd   : > { %v5757_v32 = vpop.f32.mrf.mxu1 }
 0x4de   : > { %v5336_v20 = vadd.f32 %v5756_v10, %v5000_v40 }
 0x4df   : > { %v5758_v35 = vpop.f32.mrf.mxu1 }
 0x4e0   : > { %v5759_v38 = vadd.f32 %v5758_v35, %v5757_v32  ;;  %5418 = vst [vmem:[%s10062_s6 + $0x78] sm:$0xff] %v5336_v20  ;;  %v5065_v20 = vpop.permute.xlu0 %5064 }
 0x4e1   : > { %v5760_v57 = vpop.f32.mrf.mxu1 }
 0x4e2   : > { %v5341_v50 = vadd.f32 %v5759_v38, %v5005_v15 }
 0x4e3   : > { %v5761_v5 = vpop.f32.mrf.mxu1 }
 0x4e4   : > { %v5762_v61 = vadd.f32 %v5761_v5, %v5760_v57  ;;  %5419 = vst [vmem:[%s10062_s6 + $0x80] sm:$0xff] %v5341_v50  ;;  %v5070_v50 = vpop.permute.xlu1 %5069 }
 0x4e5   : > { %v5763_v60 = vpop.f32.mrf.mxu1 }
 0x4e6   : > { %v5344_v7 = vadd.f32 %v5762_v61, %v5010_v46 }
 0x4e7   : > { %v5764_v36 = vpop.f32.mrf.mxu1 }
 0x4e8   : > { %v5765_v17 = vadd.f32 %v5764_v36, %v5763_v60  ;;  %5420 = vst [vmem:[%s10062_s6 + $0x88] sm:$0xff] %v5344_v7  ;;  %v5075_v7 = vpop.permute.xlu0 %5074 }
 0x4e9   : > { %v5766_v1 = vpop.f32.mrf.mxu1 }
 0x4ea   : > { %v5349_v9 = vadd.f32 %v5765_v17, %v5015_v6  ;;  %v5080_v6 = vpop.permute.xlu1 %5079 }
 0x4eb   : > { %v5767_v30 = vpop.f32.mrf.mxu1 }
 0x4ec   : > { %v5768_v27 = vadd.f32 %v5767_v30, %v5766_v1  ;;  %5421 = vst [vmem:[%s10062_s6 + $0x90] sm:$0xff] %v5349_v9 }
 0x4ed   : > { %v5769_v47 = vpop.f32.mrf.mxu1 }
 0x4ee   : > { %v5352_v49 = vadd.f32 %v5768_v27, %v5020_v16 }
 0x4ef   : > { %v5770_v52 = vpop.f32.mrf.mxu1 }
 0x4f0   : > { %v5771_v34 = vadd.f32 %v5770_v52, %v5769_v47  ;;  %5422 = vst [vmem:[%s10062_s6 + $0x98] sm:$0xff] %v5352_v49 }
 0x4f1   : > { %v5772_v53 = vpop.f32.mrf.mxu1 }
 0x4f2   : > { %v5357_v4 = vadd.f32 %v5771_v34, %v5025_v43 }
 0x4f3   : > { %v5773_v18 = vpop.f32.mrf.mxu1 }
 0x4f4   : > { %v5774_v2 = vadd.f32 %v5773_v18, %v5772_v53  ;;  %5423 = vst [vmem:[%s10062_s6 + $0xa0] sm:$0xff] %v5357_v4 }
 0x4f5   : > { %v5775_v55 = vpop.f32.mrf.mxu1 }
 0x4f6   : > { %v5360_v3 = vadd.f32 %v5774_v2, %v5030_v12 }
 0x4f7   : > { %v5776_v21 = vpop.f32.mrf.mxu1 }
 0x4f8   : > { %v5777_v33 = vadd.f32 %v5776_v21, %v5775_v55  ;;  %5424 = vst [vmem:[%s10062_s6 + $0xa8] sm:$0xff] %v5360_v3 }
 0x4f9   : > { %v5778_v0 = vpop.f32.mrf.mxu1 }
 0x4fa   : > { %v5365_v58 = vadd.f32 %v5777_v33, %v5035_v39 }
 0x4fb   : > { %v5779_v56 = vpop.f32.mrf.mxu1 }
 0x4fc   : > { %v5780_v62 = vadd.f32 %v5779_v56, %v5778_v0  ;;  %5425 = vst [vmem:[%s10062_s6 + $0xb0] sm:$0xff] %v5365_v58 }
 0x4fd   : > { %v5781_v29 = vpop.f32.mrf.mxu1 }
 0x4fe   : > { %v5368_v59 = vadd.f32 %v5780_v62, %v5040_v42 }
 0x4ff   : > { %v5782_v54 = vpop.f32.mrf.mxu1 }
 0x500   : > { %v5783_v11 = vadd.f32 %v5782_v54, %v5781_v29  ;;  %5426 = vst [vmem:[%s10062_s6 + $0xb8] sm:$0xff] %v5368_v59 }
 0x501   : > { %v5784_v24 = vpop.f32.mrf.mxu1 }
 0x502   : > { %v5373_v28 = vadd.f32 %v5783_v11, %v5045_v45 }
 0x503   : > { %v5785_v41 = vpop.f32.mrf.mxu1 }
 0x504   : > { %v5786_v31 = vadd.f32 %v5785_v41, %v5784_v24  ;;  %5427 = vst [vmem:[%s10062_s6 + $0xc0] sm:$0xff] %v5373_v28 }
 0x505   : > { %v5787_v13 = vpop.f32.mrf.mxu1 }
 0x506   : > { %v5376_v14 = vadd.f32 %v5786_v31, %v5050_v22 }
 0x507   : > { %v5788_v19 = vpop.f32.mrf.mxu1 }
 0x508   : > { %v5789_v37 = vadd.f32 %v5788_v19, %v5787_v13  ;;  %5428 = vst [vmem:[%s10062_s6 + $0xc8] sm:$0xff] %v5376_v14 }
 0x509   : > { %v5790_v26 = vpop.f32.mrf.mxu1 }
 0x50a   : > { %v5381_v63 = vadd.f32 %v5789_v37, %v5055_v44 }
 0x50b   : > { %v5791_v51 = vpop.f32.mrf.mxu1 }
 0x50c   : > { %v5792_v48 = vadd.f32 %v5791_v51, %v5790_v26  ;;  %5429 = vst [vmem:[%s10062_s6 + $0xd0] sm:$0xff] %v5381_v63 }
 0x50d   : > { %v5793_v23 = vpop.f32.mrf.mxu1 }
 0x50e   : > { %v5384_v25 = vadd.f32 %v5792_v48, %v5060_v8 }
 0x50f   : > { %v5794_v10 = vpop.f32.mrf.mxu1 }
 0x510   : > { %v5795_v32 = vadd.f32 %v5794_v10, %v5793_v23  ;;  %5430 = vst [vmem:[%s10062_s6 + $0xd8] sm:$0xff] %v5384_v25 }
 0x511   : > { %v5796_v40 = vpop.f32.mrf.mxu1 }
 0x512   : > { %v5389_v35 = vadd.f32 %v5795_v32, %v5065_v20 }
 0x513   : > { %v5797_v38 = vpop.f32.mrf.mxu1 }
 0x514   : > { %v5798_v57 = vadd.f32 %v5797_v38, %v5796_v40  ;;  %5431 = vst [vmem:[%s10062_s6 + $0xe0] sm:$0xff] %v5389_v35 }
 0x515   : > { %v5799_v15 = vpop.f32.mrf.mxu1 }
 0x516   : > { %v5392_v5 = vadd.f32 %v5798_v57, %v5070_v50 }
 0x517   : > { %v5800_v61 = vpop.f32.mrf.mxu1 }
 0x518   : > { %v5801_v60 = vadd.f32 %v5800_v61, %v5799_v15  ;;  %5432 = vst [vmem:[%s10062_s6 + $0xe8] sm:$0xff] %v5392_v5 }
 0x519   : > { %v5802_v46 = vpop.f32.mrf.mxu1 }
 0x51a   : > { %v5397_v36 = vadd.f32 %v5801_v60, %v5075_v7 }
 0x51b   : > { %v5803_v17 = vpop.f32.mrf.mxu1 }
 0x51c   : > { %v5804_v1 = vadd.f32 %v5803_v17, %v5802_v46  ;;  %5433 = vst [vmem:[%s10062_s6 + $0xf0] sm:$0xff] %v5397_v36 }
 0x51e   : > { %v5400_v9 = vadd.f32 %v5804_v1, %v5080_v6 }
 0x520   : > { %5434 = vst [vmem:[%s10062_s6 + $0xf8] sm:$0xff] %v5400_v9 }
 0x521   : > { %6322 = shalt.err (!%p6319_p0)
}
 0x522   : > { %s6323_s26 = scalar_lea.hbm %s10103_s12, 4096  ;;  %s6327_s5 = scalar_lea.hbm %s10161_s4, 16384 }
 0x523   : > { %p6324_p1 = scmp.ne.s32.totalorder %s10103_s12, %s6323_s26  ;;  %p6328_p10 = scmp.lt.s32.totalorder %s10103_s12, %s10161_s4 }
 0x524   : > { %p6329_p11 = scmp.lt.s32.totalorder %s6327_s5, %s6323_s26 }
 0x525   : > { %p6325_p4 = pnand %p6324_p1, %p10931_p5 }
 0x526   : > { %p6330_p2 = por %p6329_p11, %p6328_p10 }
 0x527   : > { %p6326_p6 = pneg %p6325_p4 }
 0x529   : > { %p6331_p3 = pnand %p6330_p2, %p6326_p6 }
 0x52b   : > { %6334 = shalt.err (!%p6331_p3)
}
 0x52c   : > { %s6418_s14 = smov 128   ;;  %s6419_s6 = smov 256  }
 0x52d   : > { %s6420_s9 = smov 8  }
 0x52e   : > { %5843 = dma.vmem_to_hbm [thread:$0]  (%p10931_p5), %s10098_s1, 4096, %s10103_s12, %s5436_s27, %s6418_s14, %s6419_s6, %s6420_s9  }
 0x52f PF: > { %s10932_s25 = sld [smem:[#allocation13_spill]] }
 0x530   : > { %s10933_s11 = sld [smem:[#allocation11_spill]] }
 0x531   : > { %s10934_s19 = sld [smem:[#allocation14_spill]] }
 0x535   : > { %p5860_p7 = scmp.ge.s32.totalorder %s10932_s25, 2 }
 0x536   : > { %s5465_s18 = sand.u32 1, %s10933_s11  }
 0x537   : > { %p10935_p8 = scmp.ne.s32.totalorder %s10934_s19, 0  ;;  %s5466_s23 = scalar_lea.sflag [#allocation4], %s5465_s18 }
 0x539   : > { %p5854_p9 = pnand %p5860_p7, %p10935_p8 }
 0x53b   : > { %p5855_p12 = pneg %p5854_p9 }
 0x53d   : > { %6376 = dma.done.wait (%p5855_p12), %s5466_s23, 4096  }
 0x53e   : > { %6378 = vsyncadd (%p5855_p12), %s5466_s23, 4294963200  ;;  %s21_s22 = sadd.s32 1, %s10932_s25   ;;  %s10936_s18 = sld [smem:[#allocation12_spill]] }
 0x53f   : > { %p18_p13 = scmp.ge.s32.totalorder %s21_s22, 6   ;;  %s10937_s20 = sld [smem:[#allocation15_spill]] }
 0x540   : > { %s10938_s15 = smov %s6385_s16  ;;  %s10939_s16 = smov %s6389_s17 }
 0x541   : > { %s10940_s17 = smov %s6574_s10  ;;  %s10941_s19 = smov %s6405_s21 }
 0x542   : > { %s10942_s21 = smov %s10948_s24  ;;  %20 = sbr.rel (!%p18_p13) target bundleno = 10 (0xa), region = 85 }
 0x547   :  { %5471 = vsyncpa [#allocation3], 1 }
 0x548   :  { %5473 = vsyncpa [#allocation3 + $0x1], 1 }
 0x549   :  { %5474 = vsyncpa [#allocation6], 1 }
 0x54a   :  { %5475 = vsyncpa [#allocation4], 1 }
 0x54b   :  { %5477 = vsyncpa [#allocation4 + $0x1], 1 }

</bundles_post_ra>
